<compile_context>
chip_gen: v5e
topology: v5e:2x2
jax: 0.10.0
libtpu: 0.0.40
codegen_flags: <defaults>
</compile_context>

<pallas_src>
import functools
import math

import jax
import jax.numpy as jnp
from jax.experimental import pallas as pl
from jax.experimental.pallas import tpu as pltpu


# ---------------------------------------------------------------------------
# Fused kernel: all DS_MSA layers for one batch chunk in a single invocation.
# ---------------------------------------------------------------------------
def ds_msa_kernel(x_ref, a_ref, pool_ref, poolt_ref, bias_ref,
                  wq_ref, wk_ref, wv_ref, wp_ref, bp_ref,
                  g_ref, beta_ref, w1_ref, b1_ref, w2_ref, b2_ref,
                  o_ref, *, depth, num_sectors, rows, eps):
    S, R = num_sectors, rows
    f32 = jnp.float32

    h = x_ref[...].astype(f32)          # (R, C)   R = (B/G)*N rows
    a_sm = a_ref[...]                   # (S*R, R) block-diag sector aggregation
    pool = pool_ref[...]                # (C, H)   channel -> head pooling
    pool_t = poolt_ref[...]             # (H, C)   head -> channel broadcast

    for d in range(depth):              # static unroll (depth is tiny)
        # ---- SpatialAttention + residual --------------------------------
        pkv = jnp.dot(a_sm, h, preferred_element_type=f32)             # (S*R, C)
        k_all = jnp.dot(pkv, wk_ref[d], preferred_element_type=f32)    # (S*R, C)
        v_all = jnp.dot(pkv, wv_ref[d], preferred_element_type=f32)    # (S*R, C)
        q = jnp.dot(h, wq_ref[d], preferred_element_type=f32)          # (R, C), scale folded in
        q_t = jnp.concatenate([q] * S, axis=0)                         # (S*R, C)

        # per-head <q,k> via head-pooling matmul; bias = rel + mask (-1e30)
        logits = (jnp.dot(q_t * k_all, pool, preferred_element_type=f32)
                  + bias_ref[d])                                        # (S*R, H)

        # softmax over the sector axis (sector blocks are sublane slices)
        m = logits[0:R]
        for s in range(1, S):
            m = jnp.maximum(m, logits[s * R:(s + 1) * R])
        e = jnp.exp(logits - jnp.concatenate([m] * S, axis=0))          # (S*R, H)
        denom = e[0:R]
        for s in range(1, S):
            denom = denom + e[s * R:(s + 1) * R]                        # (R, H)
        r = pl.reciprocal(denom, approx=True)                           # EUP
        inv = r * (2.0 - denom * r)                                     # 1 NR step -> f32 accurate

        # weighted sum of values; defer 1/denom to one post-sum multiply
        w_full = jnp.dot(e, pool_t, preferred_element_type=f32)         # (S*R, C)
        contrib = w_full * v_all
        acc = contrib[0:R]
        for s in range(1, S):
            acc = acc + contrib[s * R:(s + 1) * R]                      # (R, C)
        attn = acc * jnp.dot(inv, pool_t, preferred_element_type=f32)

        h = jnp.dot(attn, wp_ref[d], preferred_element_type=f32) + bp_ref[d] + h

        # ---- PreNorm(FeedForward) + residual -----------------------------
        mu = jnp.mean(h, axis=-1, keepdims=True)
        xc = h - mu
        var = jnp.mean(xc * xc, axis=-1, keepdims=True)
        y = xc * jax.lax.rsqrt(var + eps) * g_ref[d] + beta_ref[d]
        ff = jnp.dot(y, w1_ref[d], preferred_element_type=f32) + b1_ref[d]
        # exact erf GELU (torch.nn.GELU default); erf runs on the EUP slot
        ff = 0.5 * ff * (1.0 + jax.lax.erf(ff * 0.7071067811865476))
        h = jnp.dot(ff, w2_ref[d], preferred_element_type=f32) + b2_ref[d] + h

    o_ref[...] = h.astype(o_ref.dtype)


# ---------------------------------------------------------------------------
# DS_MSA forward (Pallas) and pure-JAX reference.
# ---------------------------------------------------------------------------
def ds_msa_forward(x, layers, assignment, mask, *, heads):
    b, c, n, t = x.shape
    B, N, C, H = b * t, n, c, heads
    S = assignment.shape[-1]
    hd = C // H
    D = len(layers)
    hidden = layers[0]['w1'].shape[1]
    scale = 1.0 / math.sqrt(hd)

    # grid: 2 balanced "parallel" steps (v7x megacore) when divisible, else 1.
    G = 2 if (B % 2 == 0 and ((B // 2) * N) % 8 == 0) else 1
    Bc = B // G
    R = Bc * N                       # rows handled per grid step

    x_flat = jnp.transpose(x, (0, 3, 2, 1)).reshape(B * N, C)

    # Block-diagonal sector-aggregation matrix, sector-major rows:
    #   a_sm[(s*Bc + b)*N + m, b*N + n] = assignment[m, n, s]
    a_t = jnp.transpose(assignment, (2, 0, 1)).astype(jnp.float32)     # (S, N, N)
    eye = jnp.eye(Bc, dtype=jnp.float32)
    a_sm = jnp.einsum('smn,bp->sbmpn', a_t, eye).reshape(S * R, R)

    # head-pooling matrices (channel c belongs to head c // hd)
    pool = (jnp.arange(C)[:, None] // hd
            == jnp.arange(H)[None, :]).astype(jnp.float32)             # (C, H)
    pool_t = pool.T                                                     # (H, C)

    # combined additive bias: relative bias + mask (-1e30), row-matched to k_all
    mask_bias = jnp.where(mask, jnp.float32(-1e30), jnp.float32(0.0))  # (N, S)

    def build_bias(rel):                                               # rel (H, S)
        bl = jnp.transpose(rel)[:, None, None, :]                      # (S,1,1,H)
        bl = bl + jnp.transpose(mask_bias)[:, None, :, None]           # (S,1,N,H)
        return jnp.broadcast_to(bl, (S, Bc, N, H)).reshape(S * R, H)

    bias_stack = jnp.stack([build_bias(lp['rel']) for lp in layers])    # (D,S*R,H)
    wq_stack = jnp.stack([lp['wq'] for lp in layers]) * scale           # scale folded
    wk_stack = jnp.stack([lp['wk'] for lp in layers])
    wv_stack = jnp.stack([lp['wv'] for lp in layers])
    wp_stack = jnp.stack([lp['wproj'] for lp in layers])
    bp_stack = jnp.stack([lp['bproj'].reshape(1, C) for lp in layers])
    g_stack = jnp.stack([lp['gamma'].reshape(1, C) for lp in layers])
    be_stack = jnp.stack([lp['beta'].reshape(1, C) for lp in layers])
    w1_stack = jnp.stack([lp['w1'] for lp in layers])
    b1_stack = jnp.stack([lp['b1'].reshape(1, hidden) for lp in layers])
    w2_stack = jnp.stack([lp['w2'] for lp in layers])
    b2_stack = jnp.stack([lp['b2'].reshape(1, C) for lp in layers])

    per_chunk = (2 * S * R * R * C            # sector aggregation
                 + 2 * 2 * S * R * C * C      # K, V projections
                 + 2 * R * C * C              # Q projection
                 + 2 * 2 * S * R * C * H      # logit + weight-broadcast matmuls
                 + 2 * R * C * C              # output projection
                 + 2 * 2 * R * C * hidden)    # FFN matmuls
    cost = pl.CostEstimate(
        flops=int(G * D * per_chunk),
        transcendentals=int(G * D * (S * R * H + R * hidden)),
        bytes_accessed=int(4 * (2 * B * N * C + S * R * R + 2 * C * H
                                + D * (4 * C * C + 2 * C * hidden
                                       + S * R * H + hidden + 5 * C))))

    kernel = functools.partial(ds_msa_kernel, depth=D, num_sectors=S,
                               rows=R, eps=1e-5)
    const2 = lambda i: (0, 0)
    const3 = lambda i: (0, 0, 0)

    out = pl.pallas_call(
        kernel,
        out_shape=jax.ShapeDtypeStruct((B * N, C), x.dtype),
        grid_spec=pltpu.PrefetchScalarGridSpec(
            num_scalar_prefetch=0,
            grid=(G,),
            in_specs=[
                pl.BlockSpec((R, C), lambda i: (i, 0)),          # x rows (chunk)
                pl.BlockSpec((S * R, R), const2),                # block-diag assignment
                pl.BlockSpec((C, H), const2),                    # head pooling
                pl.BlockSpec((H, C), const2),                    # head pooling^T
                pl.BlockSpec((D, S * R, H), const3),             # rel + mask bias
                pl.BlockSpec((D, C, C), const3),                 # Wq (scaled)
                pl.BlockSpec((D, C, C), const3),                 # Wk
                pl.BlockSpec((D, C, C), const3),                 # Wv
                pl.BlockSpec((D, C, C), const3),                 # Wproj
                pl.BlockSpec((D, 1, C), const3),                 # bproj
                pl.BlockSpec((D, 1, C), const3),                 # LN gamma
                pl.BlockSpec((D, 1, C), const3),                 # LN beta
                pl.BlockSpec((D, C, hidden), const3),            # W1
                pl.BlockSpec((D, 1, hidden), const3),            # b1
                pl.BlockSpec((D, hidden, C), const3),            # W2
                pl.BlockSpec((D, 1, C), const3),                 # b2
            ],
            out_specs=pl.BlockSpec((R, C), lambda i: (i, 0)),
        ),
        compiler_params=pltpu.CompilerParams(dimension_semantics=("parallel",)),
        cost_estimate=cost,
        input_output_aliases={0: 0},   # x + f(x): reuse the activation buffer
    )(x_flat, a_sm, pool, pool_t, bias_stack,
      wq_stack, wk_stack, wv_stack, wp_stack, bp_stack,
      g_stack, be_stack, w1_stack, b1_stack, w2_stack, b2_stack)

    return jnp.transpose(out.reshape(b, t, n, c), (0, 3, 2, 1))


def ds_msa_reference(x, layers, assignment, mask, *, heads):
    b, c, n, t = x.shape
    h = jnp.transpose(x, (0, 3, 2, 1)).reshape(b * t, n, c)
    B, N, C = h.shape
    S = assignment.shape[-1]
    hd = c // heads
    scale = 1.0 / math.sqrt(hd)
    for lp in layers:
        pre_kv = jnp.einsum('bnc,mnr->bmrc', h, assignment)            # (B,N,S,C)
        q = (h @ lp['wq']).reshape(B, N, heads, hd)
        k = (pre_kv @ lp['wk']).reshape(B, N, S, heads, hd)
        v = (pre_kv @ lp['wv']).reshape(B, N, S, heads, hd)
        logits = jnp.einsum('bnhd,bnshd->bnhs', q, k) * scale
        logits = logits + lp['rel'][None, None, :, :]
        logits = jnp.where(mask[None, :, None, :], -jnp.inf, logits)
        attn = jax.nn.softmax(logits, axis=-1)
        ao = jnp.einsum('bnhs,bnshd->bnhd', attn, v).reshape(B, N, C)
        h = ao @ lp['wproj'] + lp['bproj'] + h
        mu = jnp.mean(h, axis=-1, keepdims=True)
        var = jnp.mean((h - mu) ** 2, axis=-1, keepdims=True)
        y = (h - mu) / jnp.sqrt(var + 1e-5) * lp['gamma'] + lp['beta']
        fh = y @ lp['w1'] + lp['b1']
        fh = 0.5 * fh * (1.0 + jax.lax.erf(fh * 0.7071067811865476))
        h = fh @ lp['w2'] + lp['b2'] + h
    return jnp.transpose(h.reshape(b, t, n, c), (0, 3, 2, 1))


def _init_layer(key, c, heads, mlp_dim, num_sectors):
    ks = jax.random.split(key, 12)
    lim_c = 1.0 / math.sqrt(c)
    lim_h = 1.0 / math.sqrt(mlp_dim)
    return dict(
        wq=jax.random.uniform(ks[0], (c, c), jnp.float32, -lim_c, lim_c),
        wk=jax.random.uniform(ks[1], (c, c), jnp.float32, -lim_c, lim_c),
        wv=jax.random.uniform(ks[2], (c, c), jnp.float32, -lim_c, lim_c),
        rel=jax.random.normal(ks[3], (heads, num_sectors), jnp.float32),
        wproj=jax.random.uniform(ks[4], (c, c), jnp.float32, -lim_c, lim_c),
        bproj=jax.random.uniform(ks[5], (c,), jnp.float32, -lim_c, lim_c),
        gamma=1.0 + 0.1 * jax.random.normal(ks[6], (c,), jnp.float32),
        beta=0.1 * jax.random.normal(ks[7], (c,), jnp.float32),
        w1=jax.random.uniform(ks[8], (c, mlp_dim), jnp.float32, -lim_c, lim_c),
        b1=jax.random.uniform(ks[9], (mlp_dim,), jnp.float32, -lim_c, lim_c),
        w2=jax.random.uniform(ks[10], (mlp_dim, c), jnp.float32, -lim_h, lim_h),
        b2=jax.random.uniform(ks[11], (c,), jnp.float32, -lim_h, lim_h),
    )


if __name__ == "__main__":
    key = jax.random.PRNGKey(0)
    b, c, n, t = 2, 32, 8, 4          # x: (batch, channels=dim, nodes, time)
    heads, mlp_dim, depth, num_sectors = 4, 64, 2, 4

    k_x, k_a, k_m, k_l = jax.random.split(key, 4)
    x = jax.random.normal(k_x, (b, c, n, t), dtype=jnp.float32)
    assignment = 0.5 * jax.random.normal(k_a, (n, n, num_sectors), dtype=jnp.float32)
    mask = jax.random.uniform(k_m, (n, num_sectors)) < 0.3
    mask = mask.at[:, 0].set(False)   # ensure every row has >=1 unmasked sector

    layer_keys = jax.random.split(k_l, depth)
    layers = [_init_layer(layer_keys[d], c, heads, mlp_dim, num_sectors)
              for d in range(depth)]

    fwd = jax.jit(functools.partial(ds_msa_forward, heads=heads))
    out = jax.block_until_ready(fwd(x, layers, assignment, mask))

    ref = ds_msa_reference(x, layers, assignment, mask, heads=heads)
    assert out.shape == x.shape
    assert jnp.allclose(out, ref, atol=2e-3, rtol=2e-3), float(
        jnp.max(jnp.abs(out - ref)))

    print("KERNEL_OK")
</pallas_src>

<mosaic_0001>
module attributes {stable_mosaic.version = 11 : i64} {
  func.func @ds_msa_kernel(%arg0: i32, %arg1: memref<32x32xf32, #tpu.memory_space<vmem>>, %arg2: memref<128x32xf32, #tpu.memory_space<vmem>>, %arg3: memref<32x4xf32, #tpu.memory_space<vmem>>, %arg4: memref<4x32xf32, #tpu.memory_space<vmem>>, %arg5: memref<2x128x4xf32, #tpu.memory_space<vmem>>, %arg6: memref<2x32x32xf32, #tpu.memory_space<vmem>>, %arg7: memref<2x32x32xf32, #tpu.memory_space<vmem>>, %arg8: memref<2x32x32xf32, #tpu.memory_space<vmem>>, %arg9: memref<2x32x32xf32, #tpu.memory_space<vmem>>, %arg10: memref<2x1x32xf32, #tpu.memory_space<vmem>>, %arg11: memref<2x1x32xf32, #tpu.memory_space<vmem>>, %arg12: memref<2x1x32xf32, #tpu.memory_space<vmem>>, %arg13: memref<2x32x64xf32, #tpu.memory_space<vmem>>, %arg14: memref<2x1x64xf32, #tpu.memory_space<vmem>>, %arg15: memref<2x64x32xf32, #tpu.memory_space<vmem>>, %arg16: memref<2x1x32xf32, #tpu.memory_space<vmem>>, %arg17: memref<32x32xf32, #tpu.memory_space<vmem>>) attributes {dimension_semantics = [#tpu.dimension_semantics<parallel>], iteration_bounds = array<i64: 2>, scalar_prefetch = 0 : i64, scratch_operands = 0 : i64, tpu.core_type = #tpu.core_type<tc>, window_params = [{transform_indices = @transform_0, window_bounds = array<i64: 32, 32>}, {pipeline_mode = #tpu.pipeline_mode<synchronous>, transform_indices = @transform_1, window_bounds = array<i64: 128, 32>}, {pipeline_mode = #tpu.pipeline_mode<synchronous>, transform_indices = @transform_2, window_bounds = array<i64: 32, 4>}, {pipeline_mode = #tpu.pipeline_mode<synchronous>, transform_indices = @transform_3, window_bounds = array<i64: 4, 32>}, {pipeline_mode = #tpu.pipeline_mode<synchronous>, transform_indices = @transform_4, window_bounds = array<i64: 2, 128, 4>}, {pipeline_mode = #tpu.pipeline_mode<synchronous>, transform_indices = @transform_5, window_bounds = array<i64: 2, 32, 32>}, {pipeline_mode = #tpu.pipeline_mode<synchronous>, transform_indices = @transform_6, window_bounds = array<i64: 2, 32, 32>}, {pipeline_mode = #tpu.pipeline_mode<synchronous>, transform_indices = @transform_7, window_bounds = array<i64: 2, 32, 32>}, {pipeline_mode = #tpu.pipeline_mode<synchronous>, transform_indices = @transform_8, window_bounds = array<i64: 2, 32, 32>}, {pipeline_mode = #tpu.pipeline_mode<synchronous>, transform_indices = @transform_9, window_bounds = array<i64: 2, 1, 32>}, {pipeline_mode = #tpu.pipeline_mode<synchronous>, transform_indices = @transform_10, window_bounds = array<i64: 2, 1, 32>}, {pipeline_mode = #tpu.pipeline_mode<synchronous>, transform_indices = @transform_11, window_bounds = array<i64: 2, 1, 32>}, {pipeline_mode = #tpu.pipeline_mode<synchronous>, transform_indices = @transform_12, window_bounds = array<i64: 2, 32, 64>}, {pipeline_mode = #tpu.pipeline_mode<synchronous>, transform_indices = @transform_13, window_bounds = array<i64: 2, 1, 64>}, {pipeline_mode = #tpu.pipeline_mode<synchronous>, transform_indices = @transform_14, window_bounds = array<i64: 2, 64, 32>}, {pipeline_mode = #tpu.pipeline_mode<synchronous>, transform_indices = @transform_15, window_bounds = array<i64: 2, 1, 32>}, {transform_indices = @transform_16, window_bounds = array<i64: 32, 32>}]} {
    %c0 = arith.constant 0 : index
    %c0_0 = arith.constant 0 : index
    %0 = vector.load %arg1[%c0, %c0_0] : memref<32x32xf32, #tpu.memory_space<vmem>>, vector<32x32xf32>
    %c0_1 = arith.constant 0 : index
    %c0_2 = arith.constant 0 : index
    %1 = vector.load %arg2[%c0_1, %c0_2] : memref<128x32xf32, #tpu.memory_space<vmem>>, vector<128x32xf32>
    %c0_3 = arith.constant 0 : index
    %c0_4 = arith.constant 0 : index
    %2 = vector.load %arg3[%c0_3, %c0_4] : memref<32x4xf32, #tpu.memory_space<vmem>>, vector<32x4xf32>
    %c0_5 = arith.constant 0 : index
    %c0_6 = arith.constant 0 : index
    %3 = vector.load %arg4[%c0_5, %c0_6] : memref<4x32xf32, #tpu.memory_space<vmem>>, vector<4x32xf32>
    %cst = arith.constant dense<0.000000e+00> : vector<128x32xf32>
    %4 = tpu.matmul %1, %0, %cst {dimension_numbers = #tpu.dot_dimension_numbers<[1], [0], [0], [1], [0, 0, 1, 1], [], []>} : vector<128x32xf32>, vector<32x32xf32>, vector<128x32xf32> -> vector<128x32xf32>
    %c0_7 = arith.constant 0 : index
    %c0_8 = arith.constant 0 : index
    %c0_9 = arith.constant 0 : index
    %5 = vector.load %arg7[%c0_7, %c0_8, %c0_9] : memref<2x32x32xf32, #tpu.memory_space<vmem>>, vector<1x32x32xf32>
    %6 = vector.shape_cast %5 : vector<1x32x32xf32> to vector<32x32xf32>
    %cst_10 = arith.constant dense<0.000000e+00> : vector<128x32xf32>
    %7 = tpu.matmul %4, %6, %cst_10 {dimension_numbers = #tpu.dot_dimension_numbers<[1], [0], [0], [1], [0, 0, 1, 1], [], []>} : vector<128x32xf32>, vector<32x32xf32>, vector<128x32xf32> -> vector<128x32xf32>
    %c0_11 = arith.constant 0 : index
    %c0_12 = arith.constant 0 : index
    %c0_13 = arith.constant 0 : index
    %8 = vector.load %arg8[%c0_11, %c0_12, %c0_13] : memref<2x32x32xf32, #tpu.memory_space<vmem>>, vector<1x32x32xf32>
    %9 = vector.shape_cast %8 : vector<1x32x32xf32> to vector<32x32xf32>
    %cst_14 = arith.constant dense<0.000000e+00> : vector<128x32xf32>
    %10 = tpu.matmul %4, %9, %cst_14 {dimension_numbers = #tpu.dot_dimension_numbers<[1], [0], [0], [1], [0, 0, 1, 1], [], []>} : vector<128x32xf32>, vector<32x32xf32>, vector<128x32xf32> -> vector<128x32xf32>
    %c0_15 = arith.constant 0 : index
    %c0_16 = arith.constant 0 : index
    %c0_17 = arith.constant 0 : index
    %11 = vector.load %arg6[%c0_15, %c0_16, %c0_17] : memref<2x32x32xf32, #tpu.memory_space<vmem>>, vector<1x32x32xf32>
    %12 = vector.shape_cast %11 : vector<1x32x32xf32> to vector<32x32xf32>
    %cst_18 = arith.constant dense<0.000000e+00> : vector<32x32xf32>
    %13 = tpu.matmul %0, %12, %cst_18 {dimension_numbers = #tpu.dot_dimension_numbers<[1], [0], [0], [1], [0, 0, 1, 1], [], []>} : vector<32x32xf32>, vector<32x32xf32>, vector<32x32xf32> -> vector<32x32xf32>
    %14 = tpu.concatenate %13, %13, %13, %13 in 0 : vector<32x32xf32>, vector<32x32xf32>, vector<32x32xf32>, vector<32x32xf32> -> vector<128x32xf32>
    %15 = arith.mulf %14, %7 : vector<128x32xf32>
    %cst_19 = arith.constant dense<0.000000e+00> : vector<128x4xf32>
    %16 = tpu.matmul %15, %2, %cst_19 {dimension_numbers = #tpu.dot_dimension_numbers<[1], [0], [0], [1], [0, 0, 1, 1], [], []>} : vector<128x32xf32>, vector<32x4xf32>, vector<128x4xf32> -> vector<128x4xf32>
    %c0_20 = arith.constant 0 : index
    %c0_21 = arith.constant 0 : index
    %c0_22 = arith.constant 0 : index
    %17 = vector.load %arg5[%c0_20, %c0_21, %c0_22] : memref<2x128x4xf32, #tpu.memory_space<vmem>>, vector<1x128x4xf32>
    %18 = vector.shape_cast %17 : vector<1x128x4xf32> to vector<128x4xf32>
    %19 = arith.addf %16, %18 : vector<128x4xf32>
    %20 = vector.extract_strided_slice %19 {offsets = [0, 0], sizes = [32, 4], strides = [1, 1]} : vector<128x4xf32> to vector<32x4xf32>
    %21 = vector.extract_strided_slice %19 {offsets = [32, 0], sizes = [32, 4], strides = [1, 1]} : vector<128x4xf32> to vector<32x4xf32>
    %22 = arith.maximumf %20, %21 : vector<32x4xf32>
    %23 = vector.extract_strided_slice %19 {offsets = [64, 0], sizes = [32, 4], strides = [1, 1]} : vector<128x4xf32> to vector<32x4xf32>
    %24 = arith.maximumf %22, %23 : vector<32x4xf32>
    %25 = vector.extract_strided_slice %19 {offsets = [96, 0], sizes = [32, 4], strides = [1, 1]} : vector<128x4xf32> to vector<32x4xf32>
    %26 = arith.maximumf %24, %25 : vector<32x4xf32>
    %27 = tpu.concatenate %26, %26, %26, %26 in 0 : vector<32x4xf32>, vector<32x4xf32>, vector<32x4xf32>, vector<32x4xf32> -> vector<128x4xf32>
    %28 = arith.subf %19, %27 : vector<128x4xf32>
    %29 = math.exp %28 : vector<128x4xf32>
    %30 = vector.extract_strided_slice %29 {offsets = [0, 0], sizes = [32, 4], strides = [1, 1]} : vector<128x4xf32> to vector<32x4xf32>
    %31 = vector.extract_strided_slice %29 {offsets = [32, 0], sizes = [32, 4], strides = [1, 1]} : vector<128x4xf32> to vector<32x4xf32>
    %32 = arith.addf %30, %31 : vector<32x4xf32>
    %33 = vector.extract_strided_slice %29 {offsets = [64, 0], sizes = [32, 4], strides = [1, 1]} : vector<128x4xf32> to vector<32x4xf32>
    %34 = arith.addf %32, %33 : vector<32x4xf32>
    %35 = vector.extract_strided_slice %29 {offsets = [96, 0], sizes = [32, 4], strides = [1, 1]} : vector<128x4xf32> to vector<32x4xf32>
    %36 = arith.addf %34, %35 : vector<32x4xf32>
    %37 = tpu.reciprocal %36 {approx = true} : vector<32x4xf32> -> vector<32x4xf32>
    %38 = arith.mulf %36, %37 : vector<32x4xf32>
    %cst_23 = arith.constant 2.000000e+00 : f32
    %39 = vector.broadcast %cst_23 : f32 to vector<32x4xf32>
    %40 = arith.subf %39, %38 : vector<32x4xf32>
    %41 = arith.mulf %37, %40 : vector<32x4xf32>
    %cst_24 = arith.constant dense<0.000000e+00> : vector<128x32xf32>
    %42 = tpu.matmul %29, %3, %cst_24 {dimension_numbers = #tpu.dot_dimension_numbers<[1], [0], [0], [1], [0, 0, 1, 1], [], []>} : vector<128x4xf32>, vector<4x32xf32>, vector<128x32xf32> -> vector<128x32xf32>
    %43 = arith.mulf %42, %10 : vector<128x32xf32>
    %44 = vector.extract_strided_slice %43 {offsets = [0, 0], sizes = [32, 32], strides = [1, 1]} : vector<128x32xf32> to vector<32x32xf32>
    %45 = vector.extract_strided_slice %43 {offsets = [32, 0], sizes = [32, 32], strides = [1, 1]} : vector<128x32xf32> to vector<32x32xf32>
    %46 = arith.addf %44, %45 : vector<32x32xf32>
    %47 = vector.extract_strided_slice %43 {offsets = [64, 0], sizes = [32, 32], strides = [1, 1]} : vector<128x32xf32> to vector<32x32xf32>
    %48 = arith.addf %46, %47 : vector<32x32xf32>
    %49 = vector.extract_strided_slice %43 {offsets = [96, 0], sizes = [32, 32], strides = [1, 1]} : vector<128x32xf32> to vector<32x32xf32>
    %50 = arith.addf %48, %49 : vector<32x32xf32>
    %cst_25 = arith.constant dense<0.000000e+00> : vector<32x32xf32>
    %51 = tpu.matmul %41, %3, %cst_25 {dimension_numbers = #tpu.dot_dimension_numbers<[1], [0], [0], [1], [0, 0, 1, 1], [], []>} : vector<32x4xf32>, vector<4x32xf32>, vector<32x32xf32> -> vector<32x32xf32>
    %52 = arith.mulf %50, %51 : vector<32x32xf32>
    %c0_26 = arith.constant 0 : index
    %c0_27 = arith.constant 0 : index
    %c0_28 = arith.constant 0 : index
    %53 = vector.load %arg9[%c0_26, %c0_27, %c0_28] : memref<2x32x32xf32, #tpu.memory_space<vmem>>, vector<1x32x32xf32>
    %54 = vector.shape_cast %53 : vector<1x32x32xf32> to vector<32x32xf32>
    %cst_29 = arith.constant dense<0.000000e+00> : vector<32x32xf32>
    %55 = tpu.matmul %52, %54, %cst_29 {dimension_numbers = #tpu.dot_dimension_numbers<[1], [0], [0], [1], [0, 0, 1, 1], [], []>} : vector<32x32xf32>, vector<32x32xf32>, vector<32x32xf32> -> vector<32x32xf32>
    %c0_30 = arith.constant 0 : index
    %c0_31 = arith.constant 0 : index
    %c0_32 = arith.constant 0 : index
    %56 = vector.load %arg10[%c0_30, %c0_31, %c0_32] : memref<2x1x32xf32, #tpu.memory_space<vmem>>, vector<1x1x32xf32>
    %57 = vector.shape_cast %56 : vector<1x1x32xf32> to vector<1x32xf32>
    %58 = vector.broadcast %57 : vector<1x32xf32> to vector<32x32xf32>
    %59 = arith.addf %55, %58 : vector<32x32xf32>
    %60 = arith.addf %59, %0 : vector<32x32xf32>
    %cst_33 = arith.constant dense<0.000000e+00> : vector<32xf32>
    %61 = vector.multi_reduction <add>, %60, %cst_33 [1] : vector<32x32xf32> to vector<32xf32>
    %62 = vector.shape_cast %61 : vector<32xf32> to vector<32x1xf32>
    %cst_34 = arith.constant 3.200000e+01 : f32
    %63 = vector.broadcast %cst_34 : f32 to vector<32x1xf32>
    %64 = arith.divf %62, %63 : vector<32x1xf32>
    %65 = vector.broadcast %64 : vector<32x1xf32> to vector<32x32xf32>
    %66 = arith.subf %60, %65 : vector<32x32xf32>
    %67 = arith.mulf %66, %66 : vector<32x32xf32>
    %cst_35 = arith.constant dense<0.000000e+00> : vector<32xf32>
    %68 = vector.multi_reduction <add>, %67, %cst_35 [1] : vector<32x32xf32> to vector<32xf32>
    %69 = vector.shape_cast %68 : vector<32xf32> to vector<32x1xf32>
    %cst_36 = arith.constant 3.200000e+01 : f32
    %70 = vector.broadcast %cst_36 : f32 to vector<32x1xf32>
    %71 = arith.divf %69, %70 : vector<32x1xf32>
    %cst_37 = arith.constant 9.99999974E-6 : f32
    %72 = vector.broadcast %cst_37 : f32 to vector<32x1xf32>
    %73 = arith.addf %71, %72 : vector<32x1xf32>
    %74 = math.rsqrt %73 : vector<32x1xf32>
    %75 = vector.broadcast %74 : vector<32x1xf32> to vector<32x32xf32>
    %76 = arith.mulf %66, %75 : vector<32x32xf32>
    %c0_38 = arith.constant 0 : index
    %c0_39 = arith.constant 0 : index
    %c0_40 = arith.constant 0 : index
    %77 = vector.load %arg11[%c0_38, %c0_39, %c0_40] : memref<2x1x32xf32, #tpu.memory_space<vmem>>, vector<1x1x32xf32>
    %78 = vector.shape_cast %77 : vector<1x1x32xf32> to vector<1x32xf32>
    %79 = vector.broadcast %78 : vector<1x32xf32> to vector<32x32xf32>
    %80 = arith.mulf %76, %79 : vector<32x32xf32>
    %c0_41 = arith.constant 0 : index
    %c0_42 = arith.constant 0 : index
    %c0_43 = arith.constant 0 : index
    %81 = vector.load %arg12[%c0_41, %c0_42, %c0_43] : memref<2x1x32xf32, #tpu.memory_space<vmem>>, vector<1x1x32xf32>
    %82 = vector.shape_cast %81 : vector<1x1x32xf32> to vector<1x32xf32>
    %83 = vector.broadcast %82 : vector<1x32xf32> to vector<32x32xf32>
    %84 = arith.addf %80, %83 : vector<32x32xf32>
    %c0_44 = arith.constant 0 : index
    %c0_45 = arith.constant 0 : index
    %c0_46 = arith.constant 0 : index
    %85 = vector.load %arg13[%c0_44, %c0_45, %c0_46] : memref<2x32x64xf32, #tpu.memory_space<vmem>>, vector<1x32x64xf32>
    %86 = vector.shape_cast %85 : vector<1x32x64xf32> to vector<32x64xf32>
    %cst_47 = arith.constant dense<0.000000e+00> : vector<32x64xf32>
    %87 = tpu.matmul %84, %86, %cst_47 {dimension_numbers = #tpu.dot_dimension_numbers<[1], [0], [0], [1], [0, 0, 1, 1], [], []>} : vector<32x32xf32>, vector<32x64xf32>, vector<32x64xf32> -> vector<32x64xf32>
    %c0_48 = arith.constant 0 : index
    %c0_49 = arith.constant 0 : index
    %c0_50 = arith.constant 0 : index
    %88 = vector.load %arg14[%c0_48, %c0_49, %c0_50] : memref<2x1x64xf32, #tpu.memory_space<vmem>>, vector<1x1x64xf32>
    %89 = vector.shape_cast %88 : vector<1x1x64xf32> to vector<1x64xf32>
    %90 = vector.broadcast %89 : vector<1x64xf32> to vector<32x64xf32>
    %91 = arith.addf %87, %90 : vector<32x64xf32>
    %cst_51 = arith.constant 5.000000e-01 : f32
    %92 = vector.broadcast %cst_51 : f32 to vector<32x64xf32>
    %93 = arith.mulf %92, %91 : vector<32x64xf32>
    %cst_52 = arith.constant 0.707106769 : f32
    %94 = vector.broadcast %cst_52 : f32 to vector<32x64xf32>
    %95 = arith.mulf %91, %94 : vector<32x64xf32>
    %96 = math.erf %95 : vector<32x64xf32>
    %cst_53 = arith.constant 1.000000e+00 : f32
    %97 = vector.broadcast %cst_53 : f32 to vector<32x64xf32>
    %98 = arith.addf %97, %96 : vector<32x64xf32>
    %99 = arith.mulf %93, %98 : vector<32x64xf32>
    %c0_54 = arith.constant 0 : index
    %c0_55 = arith.constant 0 : index
    %c0_56 = arith.constant 0 : index
    %100 = vector.load %arg15[%c0_54, %c0_55, %c0_56] : memref<2x64x32xf32, #tpu.memory_space<vmem>>, vector<1x64x32xf32>
    %101 = vector.shape_cast %100 : vector<1x64x32xf32> to vector<64x32xf32>
    %cst_57 = arith.constant dense<0.000000e+00> : vector<32x32xf32>
    %102 = tpu.matmul %99, %101, %cst_57 {dimension_numbers = #tpu.dot_dimension_numbers<[1], [0], [0], [1], [0, 0, 1, 1], [], []>} : vector<32x64xf32>, vector<64x32xf32>, vector<32x32xf32> -> vector<32x32xf32>
    %c0_58 = arith.constant 0 : index
    %c0_59 = arith.constant 0 : index
    %c0_60 = arith.constant 0 : index
    %103 = vector.load %arg16[%c0_58, %c0_59, %c0_60] : memref<2x1x32xf32, #tpu.memory_space<vmem>>, vector<1x1x32xf32>
    %104 = vector.shape_cast %103 : vector<1x1x32xf32> to vector<1x32xf32>
    %105 = vector.broadcast %104 : vector<1x32xf32> to vector<32x32xf32>
    %106 = arith.addf %102, %105 : vector<32x32xf32>
    %107 = arith.addf %106, %60 : vector<32x32xf32>
    %cst_61 = arith.constant dense<0.000000e+00> : vector<128x32xf32>
    %108 = tpu.matmul %1, %107, %cst_61 {dimension_numbers = #tpu.dot_dimension_numbers<[1], [0], [0], [1], [0, 0, 1, 1], [], []>} : vector<128x32xf32>, vector<32x32xf32>, vector<128x32xf32> -> vector<128x32xf32>
    %c1 = arith.constant 1 : index
    %c0_62 = arith.constant 0 : index
    %c0_63 = arith.constant 0 : index
    %109 = vector.load %arg7[%c1, %c0_62, %c0_63] : memref<2x32x32xf32, #tpu.memory_space<vmem>>, vector<1x32x32xf32>
    %110 = vector.shape_cast %109 : vector<1x32x32xf32> to vector<32x32xf32>
    %cst_64 = arith.constant dense<0.000000e+00> : vector<128x32xf32>
    %111 = tpu.matmul %108, %110, %cst_64 {dimension_numbers = #tpu.dot_dimension_numbers<[1], [0], [0], [1], [0, 0, 1, 1], [], []>} : vector<128x32xf32>, vector<32x32xf32>, vector<128x32xf32> -> vector<128x32xf32>
    %c1_65 = arith.constant 1 : index
    %c0_66 = arith.constant 0 : index
    %c0_67 = arith.constant 0 : index
    %112 = vector.load %arg8[%c1_65, %c0_66, %c0_67] : memref<2x32x32xf32, #tpu.memory_space<vmem>>, vector<1x32x32xf32>
    %113 = vector.shape_cast %112 : vector<1x32x32xf32> to vector<32x32xf32>
    %cst_68 = arith.constant dense<0.000000e+00> : vector<128x32xf32>
    %114 = tpu.matmul %108, %113, %cst_68 {dimension_numbers = #tpu.dot_dimension_numbers<[1], [0], [0], [1], [0, 0, 1, 1], [], []>} : vector<128x32xf32>, vector<32x32xf32>, vector<128x32xf32> -> vector<128x32xf32>
    %c1_69 = arith.constant 1 : index
    %c0_70 = arith.constant 0 : index
    %c0_71 = arith.constant 0 : index
    %115 = vector.load %arg6[%c1_69, %c0_70, %c0_71] : memref<2x32x32xf32, #tpu.memory_space<vmem>>, vector<1x32x32xf32>
    %116 = vector.shape_cast %115 : vector<1x32x32xf32> to vector<32x32xf32>
    %cst_72 = arith.constant dense<0.000000e+00> : vector<32x32xf32>
    %117 = tpu.matmul %107, %116, %cst_72 {dimension_numbers = #tpu.dot_dimension_numbers<[1], [0], [0], [1], [0, 0, 1, 1], [], []>} : vector<32x32xf32>, vector<32x32xf32>, vector<32x32xf32> -> vector<32x32xf32>
    %118 = tpu.concatenate %117, %117, %117, %117 in 0 : vector<32x32xf32>, vector<32x32xf32>, vector<32x32xf32>, vector<32x32xf32> -> vector<128x32xf32>
    %119 = arith.mulf %118, %111 : vector<128x32xf32>
    %cst_73 = arith.constant dense<0.000000e+00> : vector<128x4xf32>
    %120 = tpu.matmul %119, %2, %cst_73 {dimension_numbers = #tpu.dot_dimension_numbers<[1], [0], [0], [1], [0, 0, 1, 1], [], []>} : vector<128x32xf32>, vector<32x4xf32>, vector<128x4xf32> -> vector<128x4xf32>
    %c1_74 = arith.constant 1 : index
    %c0_75 = arith.constant 0 : index
    %c0_76 = arith.constant 0 : index
    %121 = vector.load %arg5[%c1_74, %c0_75, %c0_76] : memref<2x128x4xf32, #tpu.memory_space<vmem>>, vector<1x128x4xf32>
    %122 = vector.shape_cast %121 : vector<1x128x4xf32> to vector<128x4xf32>
    %123 = arith.addf %120, %122 : vector<128x4xf32>
    %124 = vector.extract_strided_slice %123 {offsets = [0, 0], sizes = [32, 4], strides = [1, 1]} : vector<128x4xf32> to vector<32x4xf32>
    %125 = vector.extract_strided_slice %123 {offsets = [32, 0], sizes = [32, 4], strides = [1, 1]} : vector<128x4xf32> to vector<32x4xf32>
    %126 = arith.maximumf %124, %125 : vector<32x4xf32>
    %127 = vector.extract_strided_slice %123 {offsets = [64, 0], sizes = [32, 4], strides = [1, 1]} : vector<128x4xf32> to vector<32x4xf32>
    %128 = arith.maximumf %126, %127 : vector<32x4xf32>
    %129 = vector.extract_strided_slice %123 {offsets = [96, 0], sizes = [32, 4], strides = [1, 1]} : vector<128x4xf32> to vector<32x4xf32>
    %130 = arith.maximumf %128, %129 : vector<32x4xf32>
    %131 = tpu.concatenate %130, %130, %130, %130 in 0 : vector<32x4xf32>, vector<32x4xf32>, vector<32x4xf32>, vector<32x4xf32> -> vector<128x4xf32>
    %132 = arith.subf %123, %131 : vector<128x4xf32>
    %133 = math.exp %132 : vector<128x4xf32>
    %134 = vector.extract_strided_slice %133 {offsets = [0, 0], sizes = [32, 4], strides = [1, 1]} : vector<128x4xf32> to vector<32x4xf32>
    %135 = vector.extract_strided_slice %133 {offsets = [32, 0], sizes = [32, 4], strides = [1, 1]} : vector<128x4xf32> to vector<32x4xf32>
    %136 = arith.addf %134, %135 : vector<32x4xf32>
    %137 = vector.extract_strided_slice %133 {offsets = [64, 0], sizes = [32, 4], strides = [1, 1]} : vector<128x4xf32> to vector<32x4xf32>
    %138 = arith.addf %136, %137 : vector<32x4xf32>
    %139 = vector.extract_strided_slice %133 {offsets = [96, 0], sizes = [32, 4], strides = [1, 1]} : vector<128x4xf32> to vector<32x4xf32>
    %140 = arith.addf %138, %139 : vector<32x4xf32>
    %141 = tpu.reciprocal %140 {approx = true} : vector<32x4xf32> -> vector<32x4xf32>
    %142 = arith.mulf %140, %141 : vector<32x4xf32>
    %cst_77 = arith.constant 2.000000e+00 : f32
    %143 = vector.broadcast %cst_77 : f32 to vector<32x4xf32>
    %144 = arith.subf %143, %142 : vector<32x4xf32>
    %145 = arith.mulf %141, %144 : vector<32x4xf32>
    %cst_78 = arith.constant dense<0.000000e+00> : vector<128x32xf32>
    %146 = tpu.matmul %133, %3, %cst_78 {dimension_numbers = #tpu.dot_dimension_numbers<[1], [0], [0], [1], [0, 0, 1, 1], [], []>} : vector<128x4xf32>, vector<4x32xf32>, vector<128x32xf32> -> vector<128x32xf32>
    %147 = arith.mulf %146, %114 : vector<128x32xf32>
    %148 = vector.extract_strided_slice %147 {offsets = [0, 0], sizes = [32, 32], strides = [1, 1]} : vector<128x32xf32> to vector<32x32xf32>
    %149 = vector.extract_strided_slice %147 {offsets = [32, 0], sizes = [32, 32], strides = [1, 1]} : vector<128x32xf32> to vector<32x32xf32>
    %150 = arith.addf %148, %149 : vector<32x32xf32>
    %151 = vector.extract_strided_slice %147 {offsets = [64, 0], sizes = [32, 32], strides = [1, 1]} : vector<128x32xf32> to vector<32x32xf32>
    %152 = arith.addf %150, %151 : vector<32x32xf32>
    %153 = vector.extract_strided_slice %147 {offsets = [96, 0], sizes = [32, 32], strides = [1, 1]} : vector<128x32xf32> to vector<32x32xf32>
    %154 = arith.addf %152, %153 : vector<32x32xf32>
    %cst_79 = arith.constant dense<0.000000e+00> : vector<32x32xf32>
    %155 = tpu.matmul %145, %3, %cst_79 {dimension_numbers = #tpu.dot_dimension_numbers<[1], [0], [0], [1], [0, 0, 1, 1], [], []>} : vector<32x4xf32>, vector<4x32xf32>, vector<32x32xf32> -> vector<32x32xf32>
    %156 = arith.mulf %154, %155 : vector<32x32xf32>
    %c1_80 = arith.constant 1 : index
    %c0_81 = arith.constant 0 : index
    %c0_82 = arith.constant 0 : index
    %157 = vector.load %arg9[%c1_80, %c0_81, %c0_82] : memref<2x32x32xf32, #tpu.memory_space<vmem>>, vector<1x32x32xf32>
    %158 = vector.shape_cast %157 : vector<1x32x32xf32> to vector<32x32xf32>
    %cst_83 = arith.constant dense<0.000000e+00> : vector<32x32xf32>
    %159 = tpu.matmul %156, %158, %cst_83 {dimension_numbers = #tpu.dot_dimension_numbers<[1], [0], [0], [1], [0, 0, 1, 1], [], []>} : vector<32x32xf32>, vector<32x32xf32>, vector<32x32xf32> -> vector<32x32xf32>
    %c1_84 = arith.constant 1 : index
    %c0_85 = arith.constant 0 : index
    %c0_86 = arith.constant 0 : index
    %160 = vector.load %arg10[%c1_84, %c0_85, %c0_86] : memref<2x1x32xf32, #tpu.memory_space<vmem>>, vector<1x1x32xf32>
    %161 = vector.shape_cast %160 : vector<1x1x32xf32> to vector<1x32xf32>
    %162 = vector.broadcast %161 : vector<1x32xf32> to vector<32x32xf32>
    %163 = arith.addf %159, %162 : vector<32x32xf32>
    %164 = arith.addf %163, %107 : vector<32x32xf32>
    %cst_87 = arith.constant dense<0.000000e+00> : vector<32xf32>
    %165 = vector.multi_reduction <add>, %164, %cst_87 [1] : vector<32x32xf32> to vector<32xf32>
    %166 = vector.shape_cast %165 : vector<32xf32> to vector<32x1xf32>
    %cst_88 = arith.constant 3.200000e+01 : f32
    %167 = vector.broadcast %cst_88 : f32 to vector<32x1xf32>
    %168 = arith.divf %166, %167 : vector<32x1xf32>
    %169 = vector.broadcast %168 : vector<32x1xf32> to vector<32x32xf32>
    %170 = arith.subf %164, %169 : vector<32x32xf32>
    %171 = arith.mulf %170, %170 : vector<32x32xf32>
    %cst_89 = arith.constant dense<0.000000e+00> : vector<32xf32>
    %172 = vector.multi_reduction <add>, %171, %cst_89 [1] : vector<32x32xf32> to vector<32xf32>
    %173 = vector.shape_cast %172 : vector<32xf32> to vector<32x1xf32>
    %cst_90 = arith.constant 3.200000e+01 : f32
    %174 = vector.broadcast %cst_90 : f32 to vector<32x1xf32>
    %175 = arith.divf %173, %174 : vector<32x1xf32>
    %cst_91 = arith.constant 9.99999974E-6 : f32
    %176 = vector.broadcast %cst_91 : f32 to vector<32x1xf32>
    %177 = arith.addf %175, %176 : vector<32x1xf32>
    %178 = math.rsqrt %177 : vector<32x1xf32>
    %179 = vector.broadcast %178 : vector<32x1xf32> to vector<32x32xf32>
    %180 = arith.mulf %170, %179 : vector<32x32xf32>
    %c1_92 = arith.constant 1 : index
    %c0_93 = arith.constant 0 : index
    %c0_94 = arith.constant 0 : index
    %181 = vector.load %arg11[%c1_92, %c0_93, %c0_94] : memref<2x1x32xf32, #tpu.memory_space<vmem>>, vector<1x1x32xf32>
    %182 = vector.shape_cast %181 : vector<1x1x32xf32> to vector<1x32xf32>
    %183 = vector.broadcast %182 : vector<1x32xf32> to vector<32x32xf32>
    %184 = arith.mulf %180, %183 : vector<32x32xf32>
    %c1_95 = arith.constant 1 : index
    %c0_96 = arith.constant 0 : index
    %c0_97 = arith.constant 0 : index
    %185 = vector.load %arg12[%c1_95, %c0_96, %c0_97] : memref<2x1x32xf32, #tpu.memory_space<vmem>>, vector<1x1x32xf32>
    %186 = vector.shape_cast %185 : vector<1x1x32xf32> to vector<1x32xf32>
    %187 = vector.broadcast %186 : vector<1x32xf32> to vector<32x32xf32>
    %188 = arith.addf %184, %187 : vector<32x32xf32>
    %c1_98 = arith.constant 1 : index
    %c0_99 = arith.constant 0 : index
    %c0_100 = arith.constant 0 : index
    %189 = vector.load %arg13[%c1_98, %c0_99, %c0_100] : memref<2x32x64xf32, #tpu.memory_space<vmem>>, vector<1x32x64xf32>
    %190 = vector.shape_cast %189 : vector<1x32x64xf32> to vector<32x64xf32>
    %cst_101 = arith.constant dense<0.000000e+00> : vector<32x64xf32>
    %191 = tpu.matmul %188, %190, %cst_101 {dimension_numbers = #tpu.dot_dimension_numbers<[1], [0], [0], [1], [0, 0, 1, 1], [], []>} : vector<32x32xf32>, vector<32x64xf32>, vector<32x64xf32> -> vector<32x64xf32>
    %c1_102 = arith.constant 1 : index
    %c0_103 = arith.constant 0 : index
    %c0_104 = arith.constant 0 : index
    %192 = vector.load %arg14[%c1_102, %c0_103, %c0_104] : memref<2x1x64xf32, #tpu.memory_space<vmem>>, vector<1x1x64xf32>
    %193 = vector.shape_cast %192 : vector<1x1x64xf32> to vector<1x64xf32>
    %194 = vector.broadcast %193 : vector<1x64xf32> to vector<32x64xf32>
    %195 = arith.addf %191, %194 : vector<32x64xf32>
    %cst_105 = arith.constant 5.000000e-01 : f32
    %196 = vector.broadcast %cst_105 : f32 to vector<32x64xf32>
    %197 = arith.mulf %196, %195 : vector<32x64xf32>
    %cst_106 = arith.constant 0.707106769 : f32
    %198 = vector.broadcast %cst_106 : f32 to vector<32x64xf32>
    %199 = arith.mulf %195, %198 : vector<32x64xf32>
    %200 = math.erf %199 : vector<32x64xf32>
    %cst_107 = arith.constant 1.000000e+00 : f32
    %201 = vector.broadcast %cst_107 : f32 to vector<32x64xf32>
    %202 = arith.addf %201, %200 : vector<32x64xf32>
    %203 = arith.mulf %197, %202 : vector<32x64xf32>
    %c1_108 = arith.constant 1 : index
    %c0_109 = arith.constant 0 : index
    %c0_110 = arith.constant 0 : index
    %204 = vector.load %arg15[%c1_108, %c0_109, %c0_110] : memref<2x64x32xf32, #tpu.memory_space<vmem>>, vector<1x64x32xf32>
    %205 = vector.shape_cast %204 : vector<1x64x32xf32> to vector<64x32xf32>
    %cst_111 = arith.constant dense<0.000000e+00> : vector<32x32xf32>
    %206 = tpu.matmul %203, %205, %cst_111 {dimension_numbers = #tpu.dot_dimension_numbers<[1], [0], [0], [1], [0, 0, 1, 1], [], []>} : vector<32x64xf32>, vector<64x32xf32>, vector<32x32xf32> -> vector<32x32xf32>
    %c1_112 = arith.constant 1 : index
    %c0_113 = arith.constant 0 : index
    %c0_114 = arith.constant 0 : index
    %207 = vector.load %arg16[%c1_112, %c0_113, %c0_114] : memref<2x1x32xf32, #tpu.memory_space<vmem>>, vector<1x1x32xf32>
    %208 = vector.shape_cast %207 : vector<1x1x32xf32> to vector<1x32xf32>
    %209 = vector.broadcast %208 : vector<1x32xf32> to vector<32x32xf32>
    %210 = arith.addf %206, %209 : vector<32x32xf32>
    %211 = arith.addf %210, %164 : vector<32x32xf32>
    %c0_115 = arith.constant 0 : index
    %c0_116 = arith.constant 0 : index
    %212 = vector.load %arg17[%c0_115, %c0_116] : memref<32x32xf32, #tpu.memory_space<vmem>>, vector<32x32xf32>
    tpu.vector_store %arg17[%c0_115, %c0_116], %211 {strides = array<i32>} : memref<32x32xf32, #tpu.memory_space<vmem>>, vector<32x32xf32>,
    return
  }
  func.func @transform_0(%arg0: i32) -> (i32, i32) {
    %c0_i32 = arith.constant 0 : i32
    %c0_i32_0 = arith.constant 0 : i32
    return %arg0, %c0_i32 : i32, i32
  }
  func.func @transform_1(%arg0: i32) -> (i32, i32) {
    %c0_i32 = arith.constant 0 : i32
    %c0_i32_0 = arith.constant 0 : i32
    %c0_i32_1 = arith.constant 0 : i32
    return %c0_i32, %c0_i32_0 : i32, i32
  }
  func.func @transform_2(%arg0: i32) -> (i32, i32) {
    %c0_i32 = arith.constant 0 : i32
    %c0_i32_0 = arith.constant 0 : i32
    %c0_i32_1 = arith.constant 0 : i32
    return %c0_i32, %c0_i32_0 : i32, i32
  }
  func.func @transform_3(%arg0: i32) -> (i32, i32) {
    %c0_i32 = arith.constant 0 : i32
    %c0_i32_0 = arith.constant 0 : i32
    %c0_i32_1 = arith.constant 0 : i32
    return %c0_i32, %c0_i32_0 : i32, i32
  }
  func.func @transform_4(%arg0: i32) -> (i32, i32, i32) {
    %c0_i32 = arith.constant 0 : i32
    %c0_i32_0 = arith.constant 0 : i32
    %c0_i32_1 = arith.constant 0 : i32
    %c0_i32_2 = arith.constant 0 : i32
    return %c0_i32, %c0_i32_0, %c0_i32_1 : i32, i32, i32
  }
  func.func @transform_5(%arg0: i32) -> (i32, i32, i32) {
    %c0_i32 = arith.constant 0 : i32
    %c0_i32_0 = arith.constant 0 : i32
    %c0_i32_1 = arith.constant 0 : i32
    %c0_i32_2 = arith.constant 0 : i32
    return %c0_i32, %c0_i32_0, %c0_i32_1 : i32, i32, i32
  }
  func.func @transform_6(%arg0: i32) -> (i32, i32, i32) {
    %c0_i32 = arith.constant 0 : i32
    %c0_i32_0 = arith.constant 0 : i32
    %c0_i32_1 = arith.constant 0 : i32
    %c0_i32_2 = arith.constant 0 : i32
    return %c0_i32, %c0_i32_0, %c0_i32_1 : i32, i32, i32
  }
  func.func @transform_7(%arg0: i32) -> (i32, i32, i32) {
    %c0_i32 = arith.constant 0 : i32
    %c0_i32_0 = arith.constant 0 : i32
    %c0_i32_1 = arith.constant 0 : i32
    %c0_i32_2 = arith.constant 0 : i32
    return %c0_i32, %c0_i32_0, %c0_i32_1 : i32, i32, i32
  }
  func.func @transform_8(%arg0: i32) -> (i32, i32, i32) {
    %c0_i32 = arith.constant 0 : i32
    %c0_i32_0 = arith.constant 0 : i32
    %c0_i32_1 = arith.constant 0 : i32
    %c0_i32_2 = arith.constant 0 : i32
    return %c0_i32, %c0_i32_0, %c0_i32_1 : i32, i32, i32
  }
  func.func @transform_9(%arg0: i32) -> (i32, i32, i32) {
    %c0_i32 = arith.constant 0 : i32
    %c0_i32_0 = arith.constant 0 : i32
    %c0_i32_1 = arith.constant 0 : i32
    %c0_i32_2 = arith.constant 0 : i32
    return %c0_i32, %c0_i32_0, %c0_i32_1 : i32, i32, i32
  }
  func.func @transform_10(%arg0: i32) -> (i32, i32, i32) {
    %c0_i32 = arith.constant 0 : i32
    %c0_i32_0 = arith.constant 0 : i32
    %c0_i32_1 = arith.constant 0 : i32
    %c0_i32_2 = arith.constant 0 : i32
    return %c0_i32, %c0_i32_0, %c0_i32_1 : i32, i32, i32
  }
  func.func @transform_11(%arg0: i32) -> (i32, i32, i32) {
    %c0_i32 = arith.constant 0 : i32
    %c0_i32_0 = arith.constant 0 : i32
    %c0_i32_1 = arith.constant 0 : i32
    %c0_i32_2 = arith.constant 0 : i32
    return %c0_i32, %c0_i32_0, %c0_i32_1 : i32, i32, i32
  }
  func.func @transform_12(%arg0: i32) -> (i32, i32, i32) {
    %c0_i32 = arith.constant 0 : i32
    %c0_i32_0 = arith.constant 0 : i32
    %c0_i32_1 = arith.constant 0 : i32
    %c0_i32_2 = arith.constant 0 : i32
    return %c0_i32, %c0_i32_0, %c0_i32_1 : i32, i32, i32
  }
  func.func @transform_13(%arg0: i32) -> (i32, i32, i32) {
    %c0_i32 = arith.constant 0 : i32
    %c0_i32_0 = arith.constant 0 : i32
    %c0_i32_1 = arith.constant 0 : i32
    %c0_i32_2 = arith.constant 0 : i32
    return %c0_i32, %c0_i32_0, %c0_i32_1 : i32, i32, i32
  }
  func.func @transform_14(%arg0: i32) -> (i32, i32, i32) {
    %c0_i32 = arith.constant 0 : i32
    %c0_i32_0 = arith.constant 0 : i32
    %c0_i32_1 = arith.constant 0 : i32
    %c0_i32_2 = arith.constant 0 : i32
    return %c0_i32, %c0_i32_0, %c0_i32_1 : i32, i32, i32
  }
  func.func @transform_15(%arg0: i32) -> (i32, i32, i32) {
    %c0_i32 = arith.constant 0 : i32
    %c0_i32_0 = arith.constant 0 : i32
    %c0_i32_1 = arith.constant 0 : i32
    %c0_i32_2 = arith.constant 0 : i32
    return %c0_i32, %c0_i32_0, %c0_i32_1 : i32, i32, i32
  }
  func.func @transform_16(%arg0: i32) -> (i32, i32) {
    %c0_i32 = arith.constant 0 : i32
    %c0_i32_0 = arith.constant 0 : i32
    return %arg0, %c0_i32 : i32, i32
  }
}

</mosaic_0001>

<bundles_post_ra>
// kernel: ds_msa_forward.1
= control target key start
LH: loop header
LB: loop body
LE: loop exit
PB: predicated region body
PF: predicated region fallthrough
CT: control target
= control target key end

     0   :  { %s3520_s21 = smov 0   ;;  %s4612_s0 = inlined_call_operand.vmem [shape: f32[64,32], index: 0, kind: input, shape index: {}, may-alias: {0,16}]   ;;  %s4613_s1 = inlined_call_operand.vmem [shape: f32[128,32], index: 1, kind: input, shape index: {}]   ;;  %s4614_s2 = inlined_call_operand.vmem [shape: f32[32,4], index: 2, kind: input, shape index: {}]   ;;  %s4615_s3 = inlined_call_operand.vmem [shape: f32[4,32], index: 3, kind: input, shape index: {}]   ;;  %s4616_s4 = inlined_call_operand.vmem [shape: f32[2,128,4], index: 4, kind: input, shape index: {}]   ;;  %s4617_s5 = inlined_call_operand.vmem [shape: f32[2,32,32], index: 5, kind: input, shape index: {}]   ;;  %s4618_s6 = inlined_call_operand.vmem [shape: f32[2,32,32], index: 6, kind: input, shape index: {}]   ;;  %s4619_s7 = inlined_call_operand.vmem [shape: f32[2,32,32], index: 7, kind: input, shape index: {}]   ;;  %s4620_s8 = inlined_call_operand.vmem [shape: f32[2,32,32], index: 8, kind: input, shape index: {}]   ;;  %s4621_s9 = inlined_call_operand.vmem [shape: f32[2,1,32], index: 9, kind: input, shape index: {}]   ;;  %s4622_s10 = inlined_call_operand.vmem [shape: f32[2,1,32], index: 10, kind: input, shape index: {}]   ;;  %s4623_s11 = inlined_call_operand.vmem [shape: f32[2,1,32], index: 11, kind: input, shape index: {}]   ;;  %s4624_s12 = inlined_call_operand.vmem [shape: f32[2,32,64], index: 12, kind: input, shape index: {}]   ;;  %s4625_s13 = inlined_call_operand.vmem [shape: f32[2,1,64], index: 13, kind: input, shape index: {}]   ;;  %s4626_s14 = inlined_call_operand.vmem [shape: f32[2,64,32], index: 14, kind: input, shape index: {}]   ;;  %s4627_s15 = inlined_call_operand.vmem [shape: f32[2,1,32], index: 15, kind: input, shape index: {}]   ;;  %s4628_s16 = inlined_call_operand.vmem [shape: f32[64,32], index: 16, kind: output, shape index: {}, may-alias: {0,16}]  }
   0x1   :  { %4629 = sst [smem:[#allocation2_spill]] %s4612_s0 }
   0x2 LB: > { %s2992_s22 = sadd.s32 4294967295, %s3432_s21   ;;  %p2996_p0 = scmp.ge.s32.totalorder %s3432_s21, 1  ;;  %s3432_s21 = sphi %s3520_s21, %s26_s21  }
   0x3   : > { %p463_p1 = scmp.lt.s32.totalorder %s3432_s21, 3 }
   0x5   : > { %p464_p2 = pnand %p2996_p0, %p463_p1 }
   0x6   : > { %s2997_s23 = sshll.u32 (!%p464_p2), %s2992_s22, 2  ;;  %s4630_s27 = sld [smem:[#allocation2_spill]] (!%p464_p2) }
   0x7   : > { %467 = sbr.rel (%p464_p2) target bundleno = 3109 (0xc25), region = 84  ;;  %p514_p3 = scmp.lt.s32.totalorder (!%p464_p2), %s2997_s23, 7 }
   0xc   : > { %s4632_s23 = smov (!%p514_p3, %s2997_s23), 7  ;;  %v529_v4 = vld [vmem:[%s4613_s1] sm:$0xff]  ;;  %vm550_vm0 = vcmask 261120   ;;  %v530_v5 = vld [vmem:[%s4613_s1 + $0x8] sm:$0xff]  ;;  %v531_v6 = vld [vmem:[%s4613_s1 + $0x10] sm:$0xff]  ;;  %vm1177_vm1 = vcmask 1043456  }
   0xd   : > { %s2998_s24 = sshll.u32 %s4632_s23, 3  ;;  %v532_v7 = vld [vmem:[%s4613_s1 + $0x18] sm:$0xff]  ;;  %v533_v8 = vld [vmem:[%s4613_s1 + $0x20] sm:$0xff]  ;;  %v534_v9 = vld [vmem:[%s4613_s1 + $0x28] sm:$0xff]  ;;  %vm1128_vm2 = vcmask 31744  }
   0xe   : > { %s517_s28 = scalar_lea.vmem %s4630_s27, %s2998_s24  ;;  %v535_v10 = vld [vmem:[%s4613_s1 + $0x30] sm:$0xff]  ;;  %v536_v11 = vld [vmem:[%s4613_s1 + $0x38] sm:$0xff]  ;;  %v537_v12 = vld [vmem:[%s4613_s1 + $0x40] sm:$0xff]  ;;  %s523_s20 = scalar_lea.vmem %s4628_s16, %s2998_s24 }
   0xf   : > { %v3536_v0 = vld [vmem:[%s517_s28 + $0x18] sm:$0xff]  ;;  %v3538_v1 = vld [vmem:[%s517_s28 + $0x10] sm:$0xff]  ;;  %v3542_v2 = vld [vmem:[%s517_s28 + $0x8] sm:$0xff] }
  0x10   : > { %611 = vmatpush.msra.mxu0 %v3536_v0  ;;  %3264 = vmatpush.msra.mxu1 %v3536_v0  ;;  %v3546_v3 = vld [vmem:[%s517_s28] sm:$0xff]  ;;  %v538_v13 = vld [vmem:[%s4613_s1 + $0x48] sm:$0xff]  ;;  %v543_v14 = vld [vmem:[%s4613_s1 + $0x70] sm:$0xff] }
  0x11   : > { %v667_v15 = vld [vmem:[%s4618_s6 + $0x18] sm:$0xff]  ;;  %v666_v17 = vld [vmem:[%s4618_s6 + $0x10] sm:$0xff]  ;;  %v665_v19 = vld [vmem:[%s4618_s6 + $0x8] sm:$0xff] }
  0x12   : > { %612 = vmatpush.msra.mxu0 %v3538_v1  ;;  %3265 = vmatpush.msra.mxu1 %v3538_v1  ;;  %v784_v16 = vld [vmem:[%s4619_s7 + $0x18] sm:$0xff]  ;;  %v783_v18 = vld [vmem:[%s4619_s7 + $0x10] sm:$0xff]  ;;  %v782_v20 = vld [vmem:[%s4619_s7 + $0x8] sm:$0xff] }
  0x13   : > { %797 = vmatpush.msra.mxu2 %v784_v16  ;;  %v539_v21 = vld [vmem:[%s4613_s1 + $0x50] sm:$0xff]  ;;  %v544_v22 = vld [vmem:[%s4613_s1 + $0x78] sm:$0xff]  ;;  %v664_v24 = vld [vmem:[%s4618_s6] sm:$0xff] }
  0x14   : > { %613 = vmatpush.msra.mxu0 %v3542_v2  ;;  %3266 = vmatpush.msra.mxu1 %v3542_v2  ;;  %v540_v23 = vld [vmem:[%s4613_s1 + $0x58] sm:$0xff]  ;;  %v781_v25 = vld [vmem:[%s4619_s7] sm:$0xff]  ;;  %v852_v28 = vld [vmem:[%s4617_s5 + $0x10] sm:$0xff] }
  0x15   : > { %798 = vmatpush.msra.mxu2 %v783_v18  ;;  %v541_v26 = vld [vmem:[%s4613_s1 + $0x60] sm:$0xff]  ;;  %v853_v27 = vld [vmem:[%s4617_s5 + $0x18] sm:$0xff]  ;;  %v851_v29 = vld [vmem:[%s4617_s5 + $0x8] sm:$0xff] }
  0x16   : > { %614 = vmatpush.msra.mxu0 %v3546_v3  ;;  %3267 = vmatpush.msra.mxu1 %v3546_v3  ;;  %v542_v30 = vld [vmem:[%s4613_s1 + $0x68] sm:$0xff]  ;;  %v850_v31 = vld [vmem:[%s4617_s5] sm:$0xff]  ;;  %v548_v60 = vld [vmem:[%s4614_s2 + $0x18] sm:$0xff] }
  0x17   : > { %3001 = vmatmul.msk.f32.vlgmr.msra.gmra.mxu0 %vm550_vm0, %v529_v4  ;;  %3015 = vmatmul.msk.f32.vlgmr.msra.gmra.mxu1 %vm550_vm0, %v543_v14  ;;  %v547_v61 = vld [vmem:[%s4614_s2 + $0x10] sm:$0xff]  ;;  %v546_v62 = vld [vmem:[%s4614_s2 + $0x8] sm:$0xff] }
  0x18   : > { %728 = vmatpush.msrb.mxu1 %v667_v15  ;;  %799 = vmatpush.msra.mxu2 %v782_v20 }
  0x19   : > { %3268 = vmatpush.msra.mxu3 %v853_v27 }
  0x1a   : > { %729 = vmatpush.msrb.mxu1 %v666_v17  ;;  %800 = vmatpush.msra.mxu2 %v781_v25 }
  0x1b   : > { %3269 = vmatpush.msra.mxu3 %v852_v28 }
  0x1c   : > { %730 = vmatpush.msrb.mxu1 %v665_v19  ;;  %878 = vmatpush.msrb.mxu2 %v853_v27 }
  0x1d   : > { %3270 = vmatpush.msra.mxu3 %v851_v29 }
  0x1e   : > { %731 = vmatpush.msrb.mxu1 %v664_v24  ;;  %879 = vmatpush.msrb.mxu2 %v852_v28 }
  0x1f   : > { %3002 = vmatmul.msk.f32.gmra.mxu0 %vm550_vm0, %v530_v5  ;;  %3016 = vmatmul.msk.f32.gmra.mxu1 %vm550_vm0, %v544_v22  ;;  %v545_v5 = vld [vmem:[%s4614_s2] sm:$0xff] }
  0x20   : > { %880 = vmatpush.msrb.mxu2 %v851_v29  ;;  %3271 = vmatpush.msra.mxu3 %v850_v31 }
  0x21   : > { %3051 = vmatmul.msk.f32.vlgmr.msra.gmra.mxu3 %vm550_vm0, %v3538_v1 }
  0x22   : > { %881 = vmatpush.msrb.mxu2 %v850_v31  ;;  %987 = vmatpush.msrb.mxu3 %v548_v60 }
  0x24   : > { %988 = vmatpush.msrb.mxu3 %v547_v61 }
  0x26   : > { %989 = vmatpush.msrb.mxu3 %v546_v62 }
  0x27   : > { %3003 = vmatmul.msk.f32.gmra.mxu0 %vm550_vm0, %v531_v6 }
  0x28   : > { %990 = vmatpush.msrb.mxu3 %v545_v5 }
  0x29   : > { %3052 = vmatmul.msk.f32.gmra.mxu3 %vm550_vm0, %v3536_v0 }
  0x2f   : > { %3004 = vmatmul.msk.f32.gmra.mxu0 %vm550_vm0, %v532_v7 }
  0x37   : > { %3005 = vmatmul.msk.f32.gmra.mxu0 %vm550_vm0, %v533_v8 }
  0x3f   : > { %3006 = vmatmul.msk.f32.gmra.mxu0 %vm550_vm0, %v534_v9 }
  0x47   : > { %3007 = vmatmul.msk.f32.gmra.mxu0 %vm550_vm0, %v535_v10 }
  0x4f   : > { %3008 = vmatmul.msk.f32.gmra.mxu0 %vm550_vm0, %v536_v11 }
  0x57   : > { %3009 = vmatmul.msk.f32.gmra.mxu0 %vm550_vm0, %v537_v12 }
  0x5f   : > { %3010 = vmatmul.msk.f32.gmra.mxu0 %vm550_vm0, %v538_v13 }
  0x67   : > { %3011 = vmatmul.msk.f32.gmra.mxu0 %vm550_vm0, %v539_v21 }
  0x6f   : > { %3012 = vmatmul.msk.f32.gmra.mxu0 %vm550_vm0, %v540_v23 }
  0x77   : > { %3013 = vmatmul.msk.f32.gmra.mxu0 %vm550_vm0, %v541_v26 }
  0x7f   : > { %3014 = vmatmul.msk.f32.gmra.mxu0 %vm550_vm0, %v542_v30 }
  0x94   : > { %v616_v32 = vpop.f32.mrf.mxu0  ;;  %v658_v46 = vpop.f32.mrf.mxu1 }
  0x95   : > { %3017 = vmatmul.msk.f32.vlgmr.msrb.gmra.mxu1 %vm550_vm0, %v616_v32  ;;  %3033 = vmatmul.msk.f32.vlgmr.msra.gmra.mxu2 %vm550_vm0, %v616_v32 }
  0x9c   : > { %v619_v33 = vpop.f32.mrf.mxu0  ;;  %v661_v47 = vpop.f32.mrf.mxu1 }
  0x9d   : > { %3018 = vmatmul.msk.f32.gmra.mxu1 %vm550_vm0, %v619_v33  ;;  %3034 = vmatmul.msk.f32.gmra.mxu2 %vm550_vm0, %v619_v33 }
  0xa4   : > { %v622_v34 = vpop.f32.mrf.mxu0  ;;  %v889_v17 = vpop.f32.mrf.mxu3 }
  0xa5   : > { %3019 = vmatmul.msk.f32.gmra.mxu1 %vm550_vm0, %v622_v34  ;;  %3035 = vmatmul.msk.f32.gmra.mxu2 %vm550_vm0, %v622_v34 }
  0xac   : > { %v625_v35 = vpop.f32.mrf.mxu0  ;;  %v892_v20 = vpop.f32.mrf.mxu3 }
  0xad   : > { %3020 = vmatmul.msk.f32.gmra.mxu1 %vm550_vm0, %v625_v35  ;;  %3036 = vmatmul.msk.f32.gmra.mxu2 %vm550_vm0, %v625_v35 }
  0xb4   : > { %v628_v36 = vpop.f32.mrf.mxu0 }
  0xb5   : > { %3021 = vmatmul.msk.f32.gmra.mxu1 %vm550_vm0, %v628_v36  ;;  %3037 = vmatmul.msk.f32.gmra.mxu2 %vm550_vm0, %v628_v36 }
  0xbc   : > { %v631_v37 = vpop.f32.mrf.mxu0 }
  0xbd   : > { %3022 = vmatmul.msk.f32.gmra.mxu1 %vm550_vm0, %v631_v37  ;;  %3038 = vmatmul.msk.f32.gmra.mxu2 %vm550_vm0, %v631_v37 }
  0xc4   : > { %v634_v38 = vpop.f32.mrf.mxu0 }
  0xc5   : > { %3023 = vmatmul.msk.f32.gmra.mxu1 %vm550_vm0, %v634_v38  ;;  %3039 = vmatmul.msk.f32.gmra.mxu2 %vm550_vm0, %v634_v38 }
  0xcc   : > { %v637_v39 = vpop.f32.mrf.mxu0 }
  0xcd   : > { %3024 = vmatmul.msk.f32.gmra.mxu1 %vm550_vm0, %v637_v39  ;;  %3040 = vmatmul.msk.f32.gmra.mxu2 %vm550_vm0, %v637_v39 }
  0xd4   : > { %v640_v40 = vpop.f32.mrf.mxu0 }
  0xd5   : > { %3025 = vmatmul.msk.f32.gmra.mxu1 %vm550_vm0, %v640_v40  ;;  %3041 = vmatmul.msk.f32.gmra.mxu2 %vm550_vm0, %v640_v40 }
  0xdc   : > { %v643_v41 = vpop.f32.mrf.mxu0 }
  0xdd   : > { %3026 = vmatmul.msk.f32.gmra.mxu1 %vm550_vm0, %v643_v41  ;;  %3042 = vmatmul.msk.f32.gmra.mxu2 %vm550_vm0, %v643_v41 }
  0xe4   : > { %v646_v42 = vpop.f32.mrf.mxu0 }
  0xe5   : > { %3027 = vmatmul.msk.f32.gmra.mxu1 %vm550_vm0, %v646_v42  ;;  %3043 = vmatmul.msk.f32.gmra.mxu2 %vm550_vm0, %v646_v42 }
  0xec   : > { %v649_v43 = vpop.f32.mrf.mxu0 }
  0xed   : > { %3028 = vmatmul.msk.f32.gmra.mxu1 %vm550_vm0, %v649_v43  ;;  %3044 = vmatmul.msk.f32.gmra.mxu2 %vm550_vm0, %v649_v43 }
  0xf4   : > { %v652_v44 = vpop.f32.mrf.mxu0 }
  0xf5   : > { %3029 = vmatmul.msk.f32.gmra.mxu1 %vm550_vm0, %v652_v44  ;;  %3045 = vmatmul.msk.f32.gmra.mxu2 %vm550_vm0, %v652_v44 }
  0xfc   : > { %v655_v45 = vpop.f32.mrf.mxu0 }
  0xfd   : > { %3030 = vmatmul.msk.f32.gmra.mxu1 %vm550_vm0, %v655_v45  ;;  %3046 = vmatmul.msk.f32.gmra.mxu2 %vm550_vm0, %v655_v45 }
 0x105   : > { %3031 = vmatmul.msk.f32.gmra.mxu1 %vm550_vm0, %v658_v46  ;;  %3047 = vmatmul.msk.f32.gmra.mxu2 %vm550_vm0, %v658_v46 }
 0x10d   : > { %3032 = vmatmul.msk.f32.gmra.mxu1 %vm550_vm0, %v661_v47  ;;  %3048 = vmatmul.msk.f32.gmra.mxu2 %vm550_vm0, %v661_v47 }
 0x112   : > { %v733_v63 = vpop.f32.mrf.mxu1 }
 0x115   : > { %3049 = vmatmul.msk.f32.vlgmr.msrb.gmra.mxu2 %vm550_vm0, %v3546_v3 }
 0x118   : > { %v3690_v48 = vpop.f32.mrf.mxu2 }
 0x11a   : > { %v736_v7 = vpop.f32.mrf.mxu1 }
 0x11d   : > { %3050 = vmatmul.msk.f32.gmra.mxu2 %vm550_vm0, %v3542_v2 }
 0x120   : > { %v3694_v49 = vpop.f32.mrf.mxu2 }
 0x122   : > { %v739_v9 = vpop.f32.mrf.mxu1 }
 0x123   : > { %v897_v18 = vmul.f32 %v889_v17, %v739_v9 }
 0x128   : > { %v3696_v50 = vpop.f32.mrf.mxu2 }
 0x12a   : > { %v742_v11 = vpop.f32.mrf.mxu1 }
 0x12b   : > { %v898_v21 = vmul.f32 %v892_v20, %v742_v11  ;;  %v549_v11 = vld [vmem:[%s4615_s3] sm:$0xf] }
 0x12c   : > { %3069 = vmatpush.msk.msrb.mxu0 %vm1177_vm1, %v549_v11  ;;  %3086 = vmatpush.msk.msra.mxu1 %vm1177_vm1, %v549_v11 }
 0x130   : > { %v3698_v51 = vpop.f32.mrf.mxu2 }
 0x132   : > { %v745_v14 = vpop.f32.mrf.mxu1 }
 0x138   : > { %v3700_v52 = vpop.f32.mrf.mxu2 }
 0x13a   : > { %v748_v19 = vpop.f32.mrf.mxu1 }
 0x140   : > { %v3702_v53 = vpop.f32.mrf.mxu2 }
 0x142   : > { %v751_v22 = vpop.f32.mrf.mxu1 }
 0x143   : > { %v901_v27 = vmul.f32 %v889_v17, %v751_v22 }
 0x148   : > { %v3704_v54 = vpop.f32.mrf.mxu2 }
 0x14a   : > { %v754_v24 = vpop.f32.mrf.mxu1 }
 0x14b   : > { %v902_v28 = vmul.f32 %v892_v20, %v754_v24 }
 0x150   : > { %v3706_v55 = vpop.f32.mrf.mxu2 }
 0x152   : > { %v757_v26 = vpop.f32.mrf.mxu1 }
 0x158   : > { %v3708_v56 = vpop.f32.mrf.mxu2 }
 0x15a   : > { %v760_v29 = vpop.f32.mrf.mxu1 }
 0x160   : > { %v3710_v57 = vpop.f32.mrf.mxu2 }
 0x162   : > { %v763_v31 = vpop.f32.mrf.mxu1 }
 0x163   : > { %v905_v34 = vmul.f32 %v889_v17, %v763_v31 }
 0x168   : > { %v3712_v58 = vpop.f32.mrf.mxu2 }
 0x16a   : > { %v766_v33 = vpop.f32.mrf.mxu1 }
 0x16b   : > { %v906_v36 = vmul.f32 %v892_v20, %v766_v33 }
 0x170   : > { %v3714_v59 = vpop.f32.mrf.mxu2 }
 0x172   : > { %v769_v35 = vpop.f32.mrf.mxu1 }
 0x178   : > { %v3725_v4 = vpop.f32.mrf.mxu2 }
 0x17a   : > { %v772_v38 = vpop.f32.mrf.mxu1 }
 0x180   : > { %v3730_v6 = vpop.f32.mrf.mxu2 }
 0x182   : > { %v775_v40 = vpop.f32.mrf.mxu1 }
 0x183   : > { %v909_v41 = vmul.f32 %v889_v17, %v775_v40 }
 0x188   : > { %v3732_v8 = vpop.f32.mrf.mxu2 }
 0x18a   : > { %v778_v42 = vpop.f32.mrf.mxu1 }
 0x18b   : > { %v910_v43 = vmul.f32 %v892_v20, %v778_v42  ;;  %v913_v42 = vld [vmem:[%s4616_s4 + $0x10] sm:$0xff] }
 0x190   : > { %v3734_v10 = vpop.f32.mrf.mxu2 }
 0x198   : > { %v883_v12 = vpop.f32.mrf.mxu2 }
 0x199   : > { %v895_v13 = vmul.f32 %v883_v12, %v733_v63  ;;  %v899_v23 = vmul.f32 %v883_v12, %v745_v14  ;;  %v903_v30 = vmul.f32 %v883_v12, %v757_v26  ;;  %v907_v37 = vmul.f32 %v883_v12, %v769_v35  ;;  %v915_v12 = vld [vmem:[%s4616_s4 + $0x20] sm:$0xff]  ;;  %v920_v26 = vld [vmem:[%s4616_s4 + $0x48] sm:$0xff] }
 0x19a   : > { %v911_v14 = vld [vmem:[%s4616_s4] sm:$0xff]  ;;  %v924_v35 = vld [vmem:[%s4616_s4 + $0x68] sm:$0xff] }
 0x19b   : > { %3053 = vmatmul.msk.f32.vlgmr.msrb.gmra.mxu3 %vm550_vm0, %v895_v13 }
 0x1a0   : > { %v886_v15 = vpop.f32.mrf.mxu2 }
 0x1a1   : > { %v896_v16 = vmul.f32 %v886_v15, %v736_v7  ;;  %v900_v25 = vmul.f32 %v886_v15, %v748_v19  ;;  %v904_v32 = vmul.f32 %v886_v15, %v760_v29  ;;  %v908_v39 = vmul.f32 %v886_v15, %v772_v38  ;;  %v919_v15 = vld [vmem:[%s4616_s4 + $0x40] sm:$0xff] }
 0x1a2   : > { %v923_v19 = vld [vmem:[%s4616_s4 + $0x60] sm:$0xff] }
 0x1a3   : > { %3054 = vmatmul.msk.f32.gmra.mxu3 %vm550_vm0, %v896_v16 }
 0x1ab   : > { %3055 = vmatmul.msk.f32.gmra.mxu3 %vm550_vm0, %v897_v18 }
 0x1b3   : > { %3056 = vmatmul.msk.f32.gmra.mxu3 %vm550_vm0, %v898_v21  ;;  %v916_v21 = vld [vmem:[%s4616_s4 + $0x28] sm:$0xff] }
 0x1bb   : > { %3057 = vmatmul.msk.f32.gmra.mxu3 %vm550_vm0, %v899_v23  ;;  %v912_v23 = vld [vmem:[%s4616_s4 + $0x8] sm:$0xff] }
 0x1c3   : > { %3058 = vmatmul.msk.f32.gmra.mxu3 %vm550_vm0, %v900_v25 }
 0x1cb   : > { %3059 = vmatmul.msk.f32.gmra.mxu3 %vm550_vm0, %v901_v27 }
 0x1d3   : > { %3060 = vmatmul.msk.f32.gmra.mxu3 %vm550_vm0, %v902_v28 }
 0x1db   : > { %3061 = vmatmul.msk.f32.gmra.mxu3 %vm550_vm0, %v903_v30 }
 0x1e3   : > { %3062 = vmatmul.msk.f32.gmra.mxu3 %vm550_vm0, %v904_v32 }
 0x1eb   : > { %3063 = vmatmul.msk.f32.gmra.mxu3 %vm550_vm0, %v905_v34 }
 0x1f3   : > { %3064 = vmatmul.msk.f32.gmra.mxu3 %vm550_vm0, %v906_v36 }
 0x1fb   : > { %3065 = vmatmul.msk.f32.gmra.mxu3 %vm550_vm0, %v907_v37 }
 0x203   : > { %3066 = vmatmul.msk.f32.gmra.mxu3 %vm550_vm0, %v908_v39  ;;  %v917_v39 = vld [vmem:[%s4616_s4 + $0x30] sm:$0xff] }
 0x20b   : > { %3067 = vmatmul.msk.f32.gmra.mxu3 %vm550_vm0, %v909_v41 }
 0x213   : > { %3068 = vmatmul.msk.f32.gmra.mxu3 %vm550_vm0, %v910_v43 }
 0x21e   : > { %v992_v44 = vpop.f32.mrf.mxu3 }
 0x21f   : > { %v993_v17 = vadd.f32 %v992_v44, %v911_v14  ;;  %v921_v44 = vld [vmem:[%s4616_s4 + $0x50] sm:$0xff] }
 0x226   : > { %v995_v45 = vpop.f32.mrf.mxu3 }
 0x227   : > { %v996_v29 = vadd.f32 %v995_v45, %v912_v23  ;;  %v914_v23 = vld [vmem:[%s4616_s4 + $0x18] sm:$0xff] }
 0x22e   : > { %v998_v46 = vpop.f32.mrf.mxu3 }
 0x236   : > { %v3752_v47 = vpop.f32.mrf.mxu3 }
 0x23e   : > { %v1004_v60 = vpop.f32.mrf.mxu3 }
 0x23f   : > { %v1005_v16 = vadd.f32 %v1004_v60, %v915_v12 }
 0x241   : > { %v1040_v20 = vmax.f32 %v993_v17, %v1005_v16 }
 0x246   : > { %v1007_v61 = vpop.f32.mrf.mxu3 }
 0x247   : > { %v1008_v27 = vadd.f32 %v1007_v61, %v916_v21 }
 0x249   : > { %v1041_v36 = vmax.f32 %v996_v29, %v1008_v27 }
 0x24e   : > { %v1010_v62 = vpop.f32.mrf.mxu3 }
 0x24f   : > { %v1011_v61 = vadd.f32 %v1010_v62, %v917_v39 }
 0x256   : > { %v3754_v63 = vpop.f32.mrf.mxu3 }
 0x25e   : > { %v1016_v5 = vpop.f32.mrf.mxu3 }
 0x25f   : > { %v1017_v18 = vadd.f32 %v1016_v5, %v919_v15 }
 0x261   : > { %v1044_v24 = vmax.f32 %v1040_v20, %v1017_v18 }
 0x266   : > { %v1019_v7 = vpop.f32.mrf.mxu3 }
 0x267   : > { %v1020_v30 = vadd.f32 %v1019_v7, %v920_v26  ;;  %v999_v7 = vadd.f32 %v998_v46, %v913_v42  ;;  %v918_v46 = vld [vmem:[%s4616_s4 + $0x38] sm:$0xff] }
 0x269   : > { %v1045_v43 = vmax.f32 %v1041_v36, %v1020_v30 }
 0x26e   : > { %v1022_v9 = vpop.f32.mrf.mxu3 }
 0x26f   : > { %v1023_v11 = vadd.f32 %v1022_v9, %v921_v44 }
 0x276   : > { %v3764_v13 = vpop.f32.mrf.mxu3 }
 0x27e   : > { %v1028_v22 = vpop.f32.mrf.mxu3 }
 0x27f   : > { %v1029_v25 = vadd.f32 %v1028_v22, %v923_v19  ;;  %v1042_v19 = vmax.f32 %v999_v7, %v1011_v61 }
 0x281   : > { %v1048_v28 = vmax.f32 %v1044_v24, %v1029_v25  ;;  %v1046_v24 = vmax.f32 %v1042_v19, %v1023_v11 }
 0x283   : > { %v1052_v31 = vsub.f32 %v993_v17, %v1048_v28  ;;  %v1056_v32 = vsub.f32 %v1005_v16, %v1048_v28  ;;  %v1060_v33 = vsub.f32 %v1017_v18, %v1048_v28  ;;  %v1064_v34 = vsub.f32 %v1029_v25, %v1048_v28  ;;  %v925_v17 = vld [vmem:[%s4616_s4 + $0x70] sm:$0xff]  ;;  %v922_v25 = vld [vmem:[%s4616_s4 + $0x58] sm:$0xff] }
 0x285   : > { %v1068_v37 = vmul.f32 1.442695, %v1052_v31  ;;  %v1076_v38 = vmul.f32 1.442695, %v1056_v32  ;;  %v1084_v40 = vmul.f32 1.442695, %v1060_v33 }
 0x286   : > { %v1031_v41 = vpop.f32.mrf.mxu3  ;;  %v1092_v60 = vmul.f32 1.442695, %v1064_v34  ;;  %v1002_v34 = vadd.f32 %v3752_v47, %v914_v23 }
 0x287   : > { %3291 = vpow2.f32 %v1068_v37  ;;  %v1032_v45 = vadd.f32 %v1031_v41, %v924_v35  ;;  %v1026_v35 = vadd.f32 %v3764_v13, %v922_v25 }
 0x288   : > { %3293 = vpow2.f32 %v1076_v38 }
 0x289   : > { %v1049_v5 = vmax.f32 %v1045_v43, %v1032_v45  ;;  %3295 = vpow2.f32 %v1084_v40 }
 0x28a   : > { %3297 = vpow2.f32 %v1092_v60 }
 0x28b   : > { %v1053_v12 = vsub.f32 %v996_v29, %v1049_v5  ;;  %v1057_v14 = vsub.f32 %v1008_v27, %v1049_v5  ;;  %v1061_v15 = vsub.f32 %v1020_v30, %v1049_v5  ;;  %v1065_v16 = vsub.f32 %v1032_v45, %v1049_v5 }
 0x28c   : > { %v1014_v30 = vadd.f32 %v3754_v63, %v918_v46  ;;  %v926_v63 = vld [vmem:[%s4616_s4 + $0x78] sm:$0xff] }
 0x28d   : > { %v3292_v18 = vpop.eup %3291  ;;  %v1070_v20 = vmul.f32 1.442695, %v1053_v12  ;;  %v1078_v21 = vmul.f32 1.442695, %v1057_v14  ;;  %v1086_v62 = vmul.f32 1.442695, %v1061_v15 }
 0x28e   : > { %v3799_v22 = vpop.eup %3293  ;;  %v1034_v9 = vpop.f32.mrf.mxu3  ;;  %3070 = vmatmul.msk.f32.vlgmr.msrb.gmra.mxu0 %vm1128_vm2, %v3292_v18  ;;  %v1094_v29 = vmul.f32 1.442695, %v1065_v16  ;;  %v1043_v42 = vmax.f32 %v1002_v34, %v1014_v30 }
 0x28f   : > { %v1100_v26 = vadd.f32 %v3799_v22, %v3292_v18  ;;  %3299 = vpow2.f32 %v1070_v20  ;;  %v1035_v27 = vadd.f32 %v1034_v9, %v925_v17  ;;  %v3812_v28 = vpop.eup %3295 }
 0x290   : > { %3301 = vpow2.f32 %v1078_v21  ;;  %v3816_v33 = vpop.eup %3297  ;;  %v1047_v60 = vmax.f32 %v1043_v42, %v1026_v35 }
 0x291   : > { %v1104_v31 = vadd.f32 %v3812_v28, %v1100_v26  ;;  %v1050_v32 = vmax.f32 %v1046_v24, %v1035_v27  ;;  %3303 = vpow2.f32 %v1086_v62 }
 0x292   : > { %3305 = vpow2.f32 %v1094_v29 }
 0x293   : > { %v1108_v36 = vadd.f32 %v3816_v33, %v1104_v31  ;;  %v1054_v37 = vsub.f32 %v999_v7, %v1050_v32  ;;  %v1058_v38 = vsub.f32 %v1011_v61, %v1050_v32  ;;  %v1062_v39 = vsub.f32 %v1023_v11, %v1050_v32 }
 0x294   : > { %v1066_v40 = vsub.f32 %v1035_v27, %v1050_v32 }
 0x295   : > { %v3300_v41 = vpop.eup %3299  ;;  %3307 = vrcp.f32 %v1108_v36  ;;  %v1072_v43 = vmul.f32 1.442695, %v1054_v37  ;;  %v1080_v44 = vmul.f32 1.442695, %v1058_v38  ;;  %v1088_v13 = vmul.f32 1.442695, %v1062_v39 }
 0x296   : > { %v3824_v47 = vpop.eup %3301  ;;  %v1037_v45 = vpop.f32.mrf.mxu3  ;;  %3071 = vmatmul.msk.f32.gmra.mxu0 %vm1128_vm2, %v3300_v41  ;;  %v1096_v11 = vmul.f32 1.442695, %v1066_v40 }
 0x297   : > { %3309 = vpow2.f32 %v1072_v43  ;;  %v1038_v61 = vadd.f32 %v1037_v45, %v926_v63  ;;  %v1101_v5 = vadd.f32 %v3824_v47, %v3300_v41  ;;  %v3828_v7 = vpop.eup %3303 }
 0x298   : > { %3311 = vpow2.f32 %v1080_v44  ;;  %v3831_v15 = vpop.eup %3305 }
 0x299   : > { %v1051_v12 = vmax.f32 %v1047_v60, %v1038_v61  ;;  %v1105_v14 = vadd.f32 %v3828_v7, %v1101_v5  ;;  %3313 = vpow2.f32 %v1088_v13 }
 0x29a   : > { %3315 = vpow2.f32 %v1096_v11 }
 0x29b   : > { %v3308_v16 = vpop.eup %3307  ;;  %v1055_v17 = vsub.f32 %v1002_v34, %v1051_v12  ;;  %v1059_v18 = vsub.f32 %v1014_v30, %v1051_v12  ;;  %v1063_v19 = vsub.f32 %v1026_v35, %v1051_v12  ;;  %v1067_v21 = vsub.f32 %v1038_v61, %v1051_v12 }
 0x29c   : > { %v1116_v20 = vmul.f32 %v3308_v16, %v1108_v36  ;;  %v1109_v46 = vadd.f32 %v3831_v15, %v1105_v14 }
 0x29d   : > { %v3310_v62 = vpop.eup %3309  ;;  %v1074_v9 = vmul.f32 1.442695, %v1055_v17  ;;  %v1082_v23 = vmul.f32 1.442695, %v1059_v18  ;;  %v1090_v25 = vmul.f32 1.442695, %v1063_v19 }
 0x29e   : > { %v3312_v24 = vpop.eup %3311  ;;  %3072 = vmatmul.msk.f32.gmra.mxu0 %vm1128_vm2, %v3310_v62  ;;  %v1120_v26 = vsub.f32 2.0, %v1116_v20  ;;  %3317 = vrcp.f32 %v1109_v46  ;;  %v1098_v30 = vmul.f32 1.442695, %v1067_v21 }
 0x29f   : > { %3319 = vpow2.f32 %v1074_v9  ;;  %v1102_v27 = vadd.f32 %v3312_v24, %v3310_v62  ;;  %v3314_v29 = vpop.eup %3313  ;;  %v1319_v62 = vld [vmem:[%s4620_s8] sm:$0xff] }
 0x2a0   : > { %3321 = vpow2.f32 %v1082_v23  ;;  %v1124_v31 = vmul.f32 %v3308_v16, %v1120_v26  ;;  %v3316_v34 = vpop.eup %3315 }
 0x2a1   : > { %v1106_v32 = vadd.f32 %v3314_v29, %v1102_v27  ;;  %3323 = vpow2.f32 %v1090_v25 }
 0x2a2   : > { %3087 = vmatmul.msk.f32.vlgmr.msra.gmra.mxu1 %vm1128_vm2, %v1124_v31  ;;  %3325 = vpow2.f32 %v1098_v30 }
 0x2a3   : > { %v1110_v35 = vadd.f32 %v3316_v34, %v1106_v32 }
 0x2a4   : > { %v3318_v36 = vpop.eup %3317 }
 0x2a5   : > { %v3320_v37 = vpop.eup %3319  ;;  %v1117_v38 = vmul.f32 %v3318_v36, %v1109_v46  ;;  %3327 = vrcp.f32 %v1110_v35  ;;  %v1320_v46 = vld [vmem:[%s4620_s8 + $0x8] sm:$0xff] }
 0x2a6   : > { %v3322_v39 = vpop.eup %3321  ;;  %3073 = vmatmul.msk.f32.gmra.mxu0 %vm1128_vm2, %v3320_v37 }
 0x2a7   : > { %v1121_v40 = vsub.f32 2.0, %v1117_v38  ;;  %v1103_v63 = vadd.f32 %v3322_v39, %v3320_v37  ;;  %v3324_v41 = vpop.eup %3323 }
 0x2a8   : > { %v3326_v44 = vpop.eup %3325 }
 0x2a9   : > { %v1125_v42 = vmul.f32 %v3318_v36, %v1121_v40  ;;  %v1107_v43 = vadd.f32 %v3324_v41, %v1103_v63 }
 0x2ab   : > { %v3328_v13 = vpop.eup %3327  ;;  %3088 = vmatmul.msk.f32.gmra.mxu1 %vm1128_vm2, %v1125_v42  ;;  %v1111_v45 = vadd.f32 %v3326_v44, %v1107_v43 }
 0x2ac   : > { %v1118_v60 = vmul.f32 %v3328_v13, %v1110_v35 }
 0x2ad   : > { %3329 = vrcp.f32 %v1111_v45 }
 0x2ae   : > { %3074 = vmatmul.msk.f32.gmra.mxu0 %vm1128_vm2, %v3799_v22  ;;  %v1122_v61 = vsub.f32 2.0, %v1118_v60 }
 0x2b0   : > { %v1126_v5 = vmul.f32 %v3328_v13, %v1122_v61 }
 0x2b3   : > { %v3330_v11 = vpop.eup %3329  ;;  %3089 = vmatmul.msk.f32.gmra.mxu1 %vm1128_vm2, %v1126_v5 }
 0x2b4   : > { %v1119_v12 = vmul.f32 %v3330_v11, %v1111_v45 }
 0x2b6   : > { %3075 = vmatmul.msk.f32.gmra.mxu0 %vm1128_vm2, %v3824_v47  ;;  %v1123_v14 = vsub.f32 2.0, %v1119_v12 }
 0x2b8   : > { %v1127_v16 = vmul.f32 %v3330_v11, %v1123_v14 }
 0x2bb   : > { %3090 = vmatmul.msk.f32.gmra.mxu1 %vm1128_vm2, %v1127_v16 }
 0x2be   : > { %3076 = vmatmul.msk.f32.gmra.mxu0 %vm1128_vm2, %v3312_v24 }
 0x2c6   : > { %3077 = vmatmul.msk.f32.gmra.mxu0 %vm1128_vm2, %v3322_v39 }
 0x2ce   : > { %3078 = vmatmul.msk.f32.gmra.mxu0 %vm1128_vm2, %v3812_v28 }
 0x2d6   : > { %3079 = vmatmul.msk.f32.gmra.mxu0 %vm1128_vm2, %v3828_v7 }
 0x2de   : > { %3080 = vmatmul.msk.f32.gmra.mxu0 %vm1128_vm2, %v3314_v29 }
 0x2e6   : > { %3081 = vmatmul.msk.f32.gmra.mxu0 %vm1128_vm2, %v3324_v41 }
 0x2ee   : > { %3082 = vmatmul.msk.f32.gmra.mxu0 %vm1128_vm2, %v3816_v33  ;;  %v1322_v33 = vld [vmem:[%s4620_s8 + $0x18] sm:$0xff] }
 0x2ef   : > { %1351 = vmatpush.msra.mxu2 %v1322_v33 }
 0x2f6   : > { %3083 = vmatmul.msk.f32.gmra.mxu0 %vm1128_vm2, %v3831_v15  ;;  %v1321_v15 = vld [vmem:[%s4620_s8 + $0x10] sm:$0xff] }
 0x2f7   : > { %1352 = vmatpush.msra.mxu2 %v1321_v15 }
 0x2f9   : > { %1353 = vmatpush.msra.mxu2 %v1320_v46  ;;  %v3434_v46 = vmov 32.0  }
 0x2fa   : > { %3331 = vrcp.f32 %v3434_v46 }
 0x2fb   : > { %1354 = vmatpush.msra.mxu2 %v1319_v62 }
 0x2fe   : > { %3084 = vmatmul.msk.f32.gmra.mxu0 %vm1128_vm2, %v3316_v34 }
 0x300   : > { %v3332_v62 = vpop.eup %3331 }
 0x301   : > { %vm1389_vm3 = vweird.f32 %v3332_v62 }
 0x306   : > { %3085 = vmatmul.msk.f32.gmra.mxu0 %vm1128_vm2, %v3326_v44 }
 0x30b   : > { %v1198_v22 = vpop.f32.mrf.mxu0 }
 0x30c   : > { %v1246_v26 = vmul.f32 %v1198_v22, %v3690_v48 }
 0x313   : > { %v1201_v47 = vpop.f32.mrf.mxu0 }
 0x314   : > { %v1247_v37 = vmul.f32 %v1201_v47, %v3694_v49 }
 0x31b   : > { %v1204_v28 = vpop.f32.mrf.mxu0 }
 0x31f   : > { %v1303_v29 = vpop.f32.mrf.mxu1 }
 0x323   : > { %v1207_v17 = vpop.f32.mrf.mxu0 }
 0x328   : > { %v1306_v48 = vpop.f32.mrf.mxu1 }
 0x32b   : > { %v1210_v18 = vpop.f32.mrf.mxu0 }
 0x32c   : > { %v1250_v25 = vmul.f32 %v1210_v18, %v3700_v52 }
 0x32e   : > { %v1262_v30 = vadd.f32 %v1250_v25, %v1246_v26 }
 0x330   : > { %v1309_v45 = vpop.f32.mrf.mxu1 }
 0x333   : > { %v1213_v7 = vpop.f32.mrf.mxu0 }
 0x334   : > { %v1251_v35 = vmul.f32 %v1213_v7, %v3702_v53 }
 0x336   : > { %v1263_v40 = vadd.f32 %v1251_v35, %v1247_v37 }
 0x338   : > { %v1312_v16 = vpop.f32.mrf.mxu1 }
 0x33b   : > { %v1216_v19 = vpop.f32.mrf.mxu0 }
 0x33c   : > { %v1252_v41 = vmul.f32 %v1216_v19, %v3704_v54 }
 0x343   : > { %v1219_v20 = vpop.f32.mrf.mxu0 }
 0x344   : > { %v1253_v60 = vmul.f32 %v1219_v20, %v3706_v55  ;;  %v3281_v55 = vld [vmem:[%s4621_s9] ss:$0 sm:$0xff] }
 0x34b   : > { %v1222_v21 = vpop.f32.mrf.mxu0 }
 0x34c   : > { %v1254_v27 = vmul.f32 %v1222_v21, %v3708_v56 }
 0x34e   : > { %v1266_v32 = vadd.f32 %v1262_v30, %v1254_v27 }
 0x353   : > { %v1225_v9 = vpop.f32.mrf.mxu0 }
 0x354   : > { %v1255_v38 = vmul.f32 %v1225_v9, %v3710_v57  ;;  %v1385_v9 = vmul.f32 32.0, %v3332_v62 }
 0x356   : > { %v1267_v56 = vadd.f32 %v1263_v40, %v1255_v38 }
 0x35b   : > { %v1228_v23 = vpop.f32.mrf.mxu0 }
 0x35c   : > { %v1256_v53 = vmul.f32 %v1228_v23, %v3712_v58  ;;  %v1386_v23 = vsub.f32 1.0, %v1385_v9 }
 0x363   : > { %v1231_v24 = vpop.f32.mrf.mxu0 }
 0x364   : > { %v1257_v54 = vmul.f32 %v1231_v24, %v3714_v59 }
 0x36b   : > { %v1234_v31 = vpop.f32.mrf.mxu0 }
 0x36c   : > { %v1258_v34 = vmul.f32 %v1234_v31, %v3725_v4  ;;  %v1248_v4 = vmul.f32 %v1204_v28, %v3696_v50 }
 0x36e   : > { %v1270_v36 = vadd.f32 %v1266_v32, %v1258_v34  ;;  %v1264_v49 = vadd.f32 %v1252_v41, %v1248_v4  ;;  %v1486_v4 = vld [vmem:[%s4624_s12 + $0x18] sm:$0xff] }
 0x36f   : > { %1515 = vmatpush.msrb.mxu1 %v1486_v4 }
 0x370   : > { %v1315_v39 = vmul.f32 %v1303_v29, %v1270_v36  ;;  %v1268_v44 = vadd.f32 %v1264_v49, %v1256_v53  ;;  %v1485_v53 = vld [vmem:[%s4624_s12 + $0x10] sm:$0xff]  ;;  %v1483_v49 = vld [vmem:[%s4624_s12] sm:$0xff] }
 0x371   : > { %1516 = vmatpush.msrb.mxu1 %v1485_v53 }
 0x372   : > { %3091 = vmatmul.msk.f32.vlgmr.msra.gmra.mxu2 %vm550_vm0, %v1315_v39 }
 0x373   : > { %v1237_v52 = vpop.f32.mrf.mxu0 }
 0x374   : > { %v1259_v63 = vmul.f32 %v1237_v52, %v3730_v6  ;;  %v1249_v6 = vmul.f32 %v1207_v17, %v3698_v51 }
 0x376   : > { %v1271_v42 = vadd.f32 %v1267_v56, %v1259_v63  ;;  %v1265_v50 = vadd.f32 %v1253_v60, %v1249_v6 }
 0x378   : > { %v1316_v43 = vmul.f32 %v1306_v48, %v1271_v42  ;;  %v1269_v11 = vadd.f32 %v1265_v50, %v1257_v54 }
 0x37a   : > { %3092 = vmatmul.msk.f32.gmra.mxu2 %vm550_vm0, %v1316_v43  ;;  %v1484_v43 = vld [vmem:[%s4624_s12 + $0x8] sm:$0xff] }
 0x37b   : > { %v1240_v57 = vpop.f32.mrf.mxu0  ;;  %1517 = vmatpush.msrb.mxu1 %v1484_v43 }
 0x37c   : > { %v1260_v13 = vmul.f32 %v1240_v57, %v3732_v8 }
 0x37d   : > { %1518 = vmatpush.msrb.mxu1 %v1483_v49 }
 0x37e   : > { %v1272_v61 = vadd.f32 %v1268_v44, %v1260_v13 }
 0x380   : > { %v1317_v5 = vmul.f32 %v1309_v45, %v1272_v61 }
 0x382   : > { %3093 = vmatmul.msk.f32.gmra.mxu2 %vm550_vm0, %v1317_v5 }
 0x383   : > { %v1243_v58 = vpop.f32.mrf.mxu0 }
 0x384   : > { %v1261_v12 = vmul.f32 %v1243_v58, %v3734_v10 }
 0x386   : > { %v1273_v14 = vadd.f32 %v1269_v11, %v1261_v12 }
 0x388   : > { %v1318_v22 = vmul.f32 %v1312_v16, %v1273_v14 }
 0x38a   : > { %3094 = vmatmul.msk.f32.gmra.mxu2 %vm550_vm0, %v1318_v22 }
 0x3f5   : > { %v1356_v51 = vpop.f32.mrf.mxu2 }
 0x3f6   : > { %v1357_v8 = vadd.f32 %v3281_v55, %v1356_v51  ;;  %v3282_v51 = vld [vmem:[%s4622_s10] ss:$0 sm:$0xff] }
 0x3f8   : > { %v3894_v59 = vadd.f32 %v1357_v8, %v3546_v3 }
 0x3fa   : > { %v1372_v47 = vsel %vm550_vm0, %v3894_v59, 0.0 }
 0x3fb   : > { %1373 = vadd.xlane.f32.xlu0 %v1372_v47 }
 0x3fd   : > { %v1359_v28 = vpop.f32.mrf.mxu2 }
 0x3fe   : > { %v1360_v10 = vadd.f32 %v3281_v55, %v1359_v28 }
 0x400   : > { %v3899_v17 = vadd.f32 %v1360_v10, %v3542_v2  ;;  %v3283_v10 = vld [vmem:[%s4623_s11] ss:$0 sm:$0xff] }
 0x402   : > { %v1375_v18 = vsel %vm550_vm0, %v3899_v17, 0.0 }
 0x403   : > { %1376 = vadd.xlane.f32.xlu0 %v1375_v18 }
 0x405   : > { %v1362_v7 = vpop.f32.mrf.mxu2 }
 0x406   : > { %v1363_v19 = vadd.f32 %v3281_v55, %v1362_v7 }
 0x408   : > { %v3904_v20 = vadd.f32 %v1363_v19, %v3538_v1  ;;  %v1387_v1 = vmul.f32 %v3332_v62, %v1386_v23 }
 0x40a   : > { %v1378_v3 = vsel %vm550_vm0, %v3904_v20, 0.0  ;;  %v1388_v24 = vadd.f32 %v3332_v62, %v1387_v1 }
 0x40b   : > { %1379 = vadd.xlane.f32.xlu1 %v1378_v3 }
 0x40c   : > { %v3913_v25 = vsel %vm1389_vm3, %v3332_v62, %v1388_v24 }
 0x40d   : > { %v1365_v21 = vpop.f32.mrf.mxu2 }
 0x40e   : > { %v1366_v33 = vadd.f32 %v3281_v55, %v1365_v21 }
 0x410   : > { %v3909_v15 = vadd.f32 %v1366_v33, %v3536_v0 }
 0x412   : > { %v1381_v2 = vsel %vm550_vm0, %v3909_v15, 0.0 }
 0x413   : > { %1382 = vadd.xlane.f32.xlu1 %v1381_v2 }
 0x46e   : > { %v1374_v26 = vpop.xlane.xlu0 %1373 }
 0x46f   : > { %v1391_v27 = vmul.f32 %v3913_v25, %v1374_v26 }
 0x471   : > { %v1395_v0 = vsub.f32 %v3894_v59, %v1391_v27 }
 0x473   : > { %v1399_v29 = vmul.f32 %v1395_v0, %v1395_v0 }
 0x475   : > { %v1403_v30 = vsel %vm550_vm0, %v1399_v29, 0.0 }
 0x476   : > { %1404 = vadd.xlane.f32.xlu2 %v1403_v30  ;;  %v1377_v31 = vpop.xlane.xlu0 %1376 }
 0x477   : > { %v1392_v32 = vmul.f32 %v3913_v25, %v1377_v31 }
 0x479   : > { %v3920_v34 = vsub.f32 %v3899_v17, %v1392_v32 }
 0x47b   : > { %v1400_v35 = vmul.f32 %v3920_v34, %v3920_v34 }
 0x47d   : > { %v1406_v36 = vsel %vm550_vm0, %v1400_v35, 0.0 }
 0x47e   : > { %1407 = vadd.xlane.f32.xlu2 %v1406_v36  ;;  %v1380_v37 = vpop.xlane.xlu1 %1379 }
 0x47f   : > { %v1393_v38 = vmul.f32 %v3913_v25, %v1380_v37 }
 0x481   : > { %v3927_v39 = vsub.f32 %v3904_v20, %v1393_v38 }
 0x483   : > { %v1401_v40 = vmul.f32 %v3927_v39, %v3927_v39 }
 0x485   : > { %v1409_v48 = vsel %vm550_vm0, %v1401_v40, 0.0 }
 0x486   : > { %1410 = vadd.xlane.f32.xlu0 %v1409_v48  ;;  %v1383_v52 = vpop.xlane.xlu1 %1382 }
 0x487   : > { %v1394_v56 = vmul.f32 %v3913_v25, %v1383_v52 }
 0x489   : > { %v3934_v63 = vsub.f32 %v3909_v15, %v1394_v56 }
 0x48b   : > { %v1402_v41 = vmul.f32 %v3934_v63, %v3934_v63 }
 0x48d   : > { %v1412_v42 = vsel %vm550_vm0, %v1402_v41, 0.0 }
 0x48e   : > { %1413 = vadd.xlane.f32.xlu1 %v1412_v42 }
 0x4e9   : > { %v1405_v57 = vpop.xlane.xlu2 %1404 }
 0x4ea   : > { %v1415_v44 = vmul.f32 %v1405_v57, %v3913_v25 }
 0x4ec   : > { %v1419_v13 = vadd.f32 1e-05, %v1415_v44 }
 0x4ee   : > { %3333 = vrsqrt.f32 %v1419_v13  ;;  %vm1429_vm5 = vweird.f32 %v1419_v13 }
 0x4f1   : > { %v1408_v45 = vpop.xlane.xlu2 %1407 }
 0x4f2   : > { %v1416_v60 = vmul.f32 %v1408_v45, %v3913_v25 }
 0x4f4   : > { %v3334_v61 = vpop.eup %3333  ;;  %v1420_v6 = vadd.f32 1e-05, %v1416_v60 }
 0x4f5   : > { %v1424_v54 = vmul.f32 %v3334_v61, %v1419_v13  ;;  %vm1430_vm4 = vweird.f32 %v3334_v61 }
 0x4f6   : > { %3335 = vrsqrt.f32 %v1420_v6  ;;  %vm1431_vm6 = vmor %vm1429_vm5, %vm1430_vm4  ;;  %vm1439_vm8 = vweird.f32 %v1420_v6 }
 0x4f7   : > { %v1425_v5 = vmul.f32 %v3334_v61, %v1424_v54 }
 0x4f9   : > { %v1426_v50 = vmul.f32 0.5, %v1425_v5  ;;  %v1411_v58 = vpop.xlane.xlu0 %1410 }
 0x4fa   : > { %v1417_v11 = vmul.f32 %v1411_v58, %v3913_v25 }
 0x4fb   : > { %v1427_v12 = vsub.f32 1.5, %v1426_v50  ;;  %v1714_v50 = vld [vmem:[%s4626_s14 + $0x30] sm:$0xff] }
 0x4fc   : > { %v3336_v14 = vpop.eup %3335  ;;  %v1421_v16 = vadd.f32 1e-05, %v1417_v11 }
 0x4fd   : > { %v1428_v22 = vmul.f32 %v3334_v61, %v1427_v12  ;;  %v1434_v55 = vmul.f32 %v3336_v14, %v1420_v6  ;;  %vm1440_vm7 = vweird.f32 %v3336_v14 }
 0x4fe   : > { %3337 = vrsqrt.f32 %v1421_v16  ;;  %vm1441_vm9 = vmor %vm1439_vm8, %vm1440_vm7  ;;  %vm1449_vm11 = vweird.f32 %v1421_v16  ;;  %vm1720_vm7 = vcmask 523264  }
 0x4ff   : > { %v1432_v8 = vsel %vm1431_vm6, %v3334_v61, %v1428_v22  ;;  %v1435_v47 = vmul.f32 %v3336_v14, %v1434_v55  ;;  %v1715_v61 = vld [vmem:[%s4626_s14 + $0x38] sm:$0xff] }
 0x500   : > { %v1463_v28 = vmul.f32 %v1432_v8, %v1395_v0  ;;  %1741 = vmatpush.msrb.mxu2 %v1715_v61  ;;  %v1712_v8 = vld [vmem:[%s4626_s14 + $0x20] sm:$0xff] }
 0x501   : > { %v1436_v18 = vmul.f32 0.5, %v1435_v47  ;;  %v1414_v7 = vpop.xlane.xlu1 %1413 }
 0x502   : > { %v1471_v19 = vmul.f32 %v3282_v51, %v1463_v28  ;;  %v1418_v3 = vmul.f32 %v1414_v7, %v3913_v25  ;;  %1742 = vmatpush.msrb.mxu2 %v1714_v50 }
 0x503   : > { %v1437_v21 = vsub.f32 1.5, %v1436_v18  ;;  %v1711_v18 = vld [vmem:[%s4626_s14 + $0x18] sm:$0xff] }
 0x504   : > { %v3338_v33 = vpop.eup %3337  ;;  %v1422_v2 = vadd.f32 1e-05, %v1418_v3  ;;  %v1479_v46 = vadd.f32 %v3283_v10, %v1471_v19 }
 0x505   : > { %v1438_v62 = vmul.f32 %v3336_v14, %v1437_v21  ;;  %v1444_v9 = vmul.f32 %v3338_v33, %v1421_v16  ;;  %vm1450_vm10 = vweird.f32 %v3338_v33 }
 0x506   : > { %3339 = vrsqrt.f32 %v1422_v2  ;;  %3095 = vmatmul.msk.f32.vlgmr.msrb.gmra.mxu1 %vm550_vm0, %v1479_v46  ;;  %vm1451_vm12 = vmor %vm1449_vm11, %vm1450_vm10  ;;  %vm1459_vm14 = vweird.f32 %v1422_v2 }
 0x507   : > { %v1442_v23 = vsel %vm1441_vm9, %v3336_v14, %v1438_v62  ;;  %v1445_v1 = vmul.f32 %v3338_v33, %v1444_v9  ;;  %v1713_v14 = vld [vmem:[%s4626_s14 + $0x28] sm:$0xff] }
 0x508   : > { %v1464_v24 = vmul.f32 %v1442_v23, %v3920_v34  ;;  %1743 = vmatpush.msrb.mxu2 %v1713_v14 }
 0x509   : > { %v1446_v26 = vmul.f32 0.5, %v1445_v1  ;;  %v1709_v1 = vld [vmem:[%s4626_s14 + $0x8] sm:$0xff] }
 0x50a   : > { %v1472_v27 = vmul.f32 %v3282_v51, %v1464_v24  ;;  %1744 = vmatpush.msrb.mxu2 %v1712_v8 }
 0x50b   : > { %v1447_v0 = vsub.f32 1.5, %v1446_v26 }
 0x50c   : > { %v3340_v29 = vpop.eup %3339  ;;  %v1480_v30 = vadd.f32 %v3283_v10, %v1472_v27  ;;  %1745 = vmatpush.msrb.mxu2 %v1711_v18 }
 0x50d   : > { %v1448_v31 = vmul.f32 %v3338_v33, %v1447_v0  ;;  %v1454_v32 = vmul.f32 %v3340_v29, %v1422_v2  ;;  %vm1460_vm13 = vweird.f32 %v3340_v29  ;;  %v1710_v2 = vld [vmem:[%s4626_s14 + $0x10] sm:$0xff] }
 0x50e   : > { %3096 = vmatmul.msk.f32.gmra.mxu1 %vm550_vm0, %v1480_v30  ;;  %vm1461_vm15 = vmor %vm1459_vm14, %vm1460_vm13  ;;  %1746 = vmatpush.msrb.mxu2 %v1710_v2  ;;  %v1708_v30 = vld [vmem:[%s4626_s14] sm:$0xff] }
 0x50f   : > { %v1452_v35 = vsel %vm1451_vm12, %v3338_v33, %v1448_v31  ;;  %v1455_v36 = vmul.f32 %v3340_v29, %v1454_v32 }
 0x510   : > { %v1465_v37 = vmul.f32 %v1452_v35, %v3927_v39  ;;  %v3284_v39 = vld [vmem:[%s4625_s13] ss:$0 sm:$0xff]  ;;  %1747 = vmatpush.msrb.mxu2 %v1709_v1 }
 0x511   : > { %v1456_v38 = vmul.f32 0.5, %v1455_v36 }
 0x512   : > { %v1473_v40 = vmul.f32 %v3282_v51, %v1465_v37  ;;  %1748 = vmatpush.msrb.mxu2 %v1708_v30 }
 0x513   : > { %v1457_v48 = vsub.f32 1.5, %v1456_v38 }
 0x514   : > { %v1481_v34 = vadd.f32 %v3283_v10, %v1473_v40 }
 0x515   : > { %v1458_v52 = vmul.f32 %v3340_v29, %v1457_v48 }
 0x516   : > { %3097 = vmatmul.msk.f32.gmra.mxu1 %vm550_vm0, %v1481_v34 }
 0x517   : > { %v1462_v56 = vsel %vm1461_vm15, %v3340_v29, %v1458_v52 }
 0x518   : > { %v1466_v41 = vmul.f32 %v1462_v56, %v3934_v63 }
 0x51a   : > { %v1474_v42 = vmul.f32 %v3282_v51, %v1466_v41 }
 0x51c   : > { %v1482_v4 = vadd.f32 %v3283_v10, %v1474_v42 }
 0x51e   : > { %3098 = vmatmul.msk.f32.gmra.mxu1 %vm550_vm0, %v1482_v4 }
 0x583   : > { %v1520_v53 = vpop.f32.mrf.mxu1 }
 0x584   : > { %v3971_v43 = vadd.f32 %v3284_v39, %v1520_v53 }
 0x586   : > { %v3974_v49 = vmul.f32 0.70710677, %v3971_v43 }
 0x588   : > { %v1540_v57 = vmul.f32 %v3974_v49, %v3974_v49 }
 0x58a   : > { %v3978_v44 = vmin.f32 %v1540_v57, 16.0 }
 0x58b   : > { %v1523_v63 = vpop.f32.mrf.mxu1 }
 0x58c   : > { %v1542_v13 = vmul.f32 2.1237322e-06, %v3978_v44  ;;  %v1553_v45 = vmul.f32 3.8918573e-05, %v3978_v44  ;;  %v3982_v60 = vadd.f32 %v3284_v39, %v1523_v63 }
 0x58e   : > { %v1543_v6 = vadd.f32 0.00028619796, %v1542_v13  ;;  %v1554_v54 = vadd.f32 0.001143296, %v1553_v45  ;;  %v3988_v5 = vmul.f32 0.70710677, %v3982_v60 }
 0x590   : > { %v1544_v58 = vmul.f32 %v1543_v6, %v3978_v44  ;;  %v1555_v11 = vmul.f32 %v1554_v54, %v3978_v44  ;;  %v1580_v12 = vmul.f32 %v3988_v5, %v3988_v5 }
 0x592   : > { %v1556_v16 = vadd.f32 0.014752088, %v1555_v11  ;;  %v1545_v22 = vadd.f32 0.0036580483, %v1544_v58  ;;  %v4000_v55 = vmin.f32 %v1580_v12, 16.0 }
 0x593   : > { %v1526_v51 = vpop.f32.mrf.mxu1 }
 0x594   : > { %v1557_v47 = vmul.f32 %v1556_v16, %v3978_v44  ;;  %v4006_v28 = vadd.f32 %v3284_v39, %v1526_v51  ;;  %v1582_v10 = vmul.f32 2.1237322e-06, %v4000_v55  ;;  %v1593_v7 = vmul.f32 3.8918573e-05, %v4000_v55 }
 0x595   : > { %v1546_v3 = vmul.f32 %v1545_v22, %v3978_v44 }
 0x596   : > { %v1558_v19 = vadd.f32 0.112945676, %v1557_v47  ;;  %v1583_v21 = vadd.f32 0.00028619796, %v1582_v10  ;;  %v4015_v33 = vmul.f32 0.70710677, %v4006_v28 }
 0x597   : > { %v1594_v62 = vadd.f32 0.001143296, %v1593_v7  ;;  %v1547_v27 = vadd.f32 0.05243302, %v1546_v3 }
 0x598   : > { %v1559_v46 = vmul.f32 %v1558_v19, %v3978_v44  ;;  %v1584_v9 = vmul.f32 %v1583_v21, %v4000_v55  ;;  %v1620_v23 = vmul.f32 %v4015_v33, %v4015_v33 }
 0x599   : > { %v1595_v26 = vmul.f32 %v1594_v62, %v4000_v55  ;;  %v1548_v34 = vmul.f32 %v1547_v27, %v3978_v44 }
 0x59a   : > { %v1560_v24 = vadd.f32 0.4994258, %v1559_v46  ;;  %v4028_v0 = vmin.f32 %v1620_v23, 16.0  ;;  %v1585_v32 = vadd.f32 0.0036580483, %v1584_v9 }
 0x59b   : > { %v1529_v29 = vpop.f32.mrf.mxu1  ;;  %v1596_v38 = vadd.f32 0.014752088, %v1595_v26  ;;  %v1549_v63 = vadd.f32 0.18741608, %v1548_v34 }
 0x59c   : > { %v1561_v31 = vmul.f32 %v1560_v24, %v3978_v44  ;;  %v4034_v35 = vadd.f32 %v3284_v39, %v1529_v29  ;;  %v1622_v36 = vmul.f32 2.1237322e-06, %v4028_v0  ;;  %v1633_v37 = vmul.f32 3.8918573e-05, %v4028_v0 }
 0x59d   : > { %v1597_v41 = vmul.f32 %v1596_v38, %v4000_v55  ;;  %v1586_v42 = vmul.f32 %v1585_v32, %v4000_v55  ;;  %v1550_v16 = vmul.f32 %v1549_v63, %v3978_v44 }
 0x59e   : > { %v1562_v40 = vadd.f32 1.0, %v1561_v31  ;;  %v4039_v48 = vmul.f32 0.70710677, %v4034_v35  ;;  %v1623_v52 = vadd.f32 0.00028619796, %v1622_v36 }
 0x59f   : > { %v1634_v56 = vadd.f32 0.001143296, %v1633_v37  ;;  %v1598_v57 = vadd.f32 0.112945676, %v1597_v41  ;;  %v1587_v54 = vadd.f32 0.05243302, %v1586_v42 }
 0x5a0   : > { %3341 = vrcp.f32 %v1562_v40  ;;  %v1624_v4 = vmul.f32 %v1623_v52, %v4028_v0  ;;  %v1660_v53 = vmul.f32 %v4039_v48, %v4039_v48  ;;  %v1574_v19 = vand.u32 2147483648, %v1562_v40 }
 0x5a1   : > { %v1635_v39 = vmul.f32 %v1634_v56, %v4028_v0  ;;  %v1599_v6 = vmul.f32 %v1598_v57, %v4000_v55  ;;  %v1588_v3 = vmul.f32 %v1587_v54, %v4000_v55  ;;  %v1551_v44 = vadd.f32 1.1283791, %v1550_v16 }
 0x5a2   : > { %v1625_v13 = vadd.f32 0.0036580483, %v1624_v4  ;;  %v4048_v61 = vmin.f32 %v1660_v53, 16.0  ;;  %v1572_v23 = vand.u32 2147483647, %v1562_v40  ;;  %vm1568_vm4 = vweird.f32 %v1562_v40 }
 0x5a3   : > { %v1636_v45 = vadd.f32 0.014752088, %v1635_v39  ;;  %v1600_v14 = vadd.f32 0.4994258, %v1599_v6  ;;  %v1575_v29 = vor.u32 1.1754944e-38, %v1574_v19  ;;  %v1552_v37 = vmul.f32 %v1551_v44, %v3974_v49 }
 0x5a4   : > { %v1662_v11 = vmul.f32 2.1237322e-06, %v4048_v61  ;;  %v1673_v12 = vmul.f32 3.8918573e-05, %v4048_v61  ;;  %v1626_v51 = vmul.f32 %v1625_v13, %v4028_v0  ;;  %v1589_v30 = vadd.f32 0.18741608, %v1588_v3 }
 0x5a5   : > { %v1637_v58 = vmul.f32 %v1636_v45, %v4028_v0  ;;  %v1601_v18 = vmul.f32 %v1600_v14, %v4000_v55  ;;  %vm1573_vm6 = vcmp.eq.f32.partialorder %v1572_v23, 8.507059e+37  ;;  %v1532_v13 = vmul.f32 0.5, %v3971_v43 }
 0x5a6   : > { %v3342_v50 = vpop.eup %3341  ;;  %v1663_v47 = vadd.f32 0.00028619796, %v1662_v11  ;;  %v1674_v10 = vadd.f32 0.001143296, %v1673_v12  ;;  %v1627_v1 = vadd.f32 0.05243302, %v1626_v51 }
 0x5a7   : > { %v1564_v22 = vmul.f32 %v3342_v50, %v1562_v40  ;;  %v1638_v8 = vadd.f32 0.112945676, %v1637_v58  ;;  %v4061_v62 = vadd.f32 1.0, %v1601_v18  ;;  %vm1569_vm3 = vweird.f32 %v3342_v50 }
 0x5a8   : > { %v1664_v2 = vmul.f32 %v1663_v47, %v4048_v61  ;;  %v1675_v46 = vmul.f32 %v1674_v10, %v4048_v61  ;;  %vm1570_vm5 = vmor %vm1568_vm4, %vm1569_vm3  ;;  %v1628_v52 = vmul.f32 %v1627_v1, %v4028_v0  ;;  %v1590_v40 = vmul.f32 %v1589_v30, %v4000_v55  ;;  %v3166_v55 = vld [vmem:[%s4617_s5 + $0x38] sm:$0xff] }
 0x5a9   : > { %v1565_v7 = vsub.f32 1.0, %v1564_v22  ;;  %v1639_v21 = vmul.f32 %v1638_v8, %v4028_v0  ;;  %3343 = vrcp.f32 %v4061_v62  ;;  %v1614_v16 = vand.u32 2147483648, %v4061_v62  ;;  %2048 = vmatpush.msra.mxu0 %v3166_v55  ;;  %v3406_v55 = vld [vmem:[%s4614_s2 + $0x10] sm:$0xff] }
 0x5aa   : > { %v1676_v26 = vadd.f32 0.014752088, %v1675_v46  ;;  %v1665_v32 = vadd.f32 0.0036580483, %v1664_v2  ;;  %v1629_v49 = vadd.f32 0.18741608, %v1628_v52  ;;  %vm1608_vm9 = vweird.f32 %v4061_v62 }
 0x5ab   : > { %v1566_v9 = vmul.f32 %v3342_v50, %v1565_v7  ;;  %v1640_v24 = vadd.f32 0.4994258, %v1639_v21  ;;  %v1612_v51 = vand.u32 2147483647, %v4061_v62  ;;  %v1615_v3 = vor.u32 1.1754944e-38, %v1614_v16 }
 0x5ac   : > { %v1677_v36 = vmul.f32 %v1676_v26, %v4048_v61  ;;  %v1666_v39 = vmul.f32 %v1665_v32, %v4048_v61  ;;  %v1630_v43 = vmul.f32 %v1629_v49, %v4028_v0 }
 0x5ad   : > { %v1567_v27 = vadd.f32 %v3342_v50, %v1566_v9  ;;  %v1641_v31 = vmul.f32 %v1640_v24, %v4028_v0  ;;  %vm1613_vm11 = vcmp.eq.f32.partialorder %v1612_v51, 8.507059e+37 }
 0x5ae   : > { %v1678_v41 = vadd.f32 0.112945676, %v1677_v36  ;;  %v1667_v58 = vadd.f32 0.05243302, %v1666_v39  ;;  %v1631_v21 = vadd.f32 1.1283791, %v1630_v43 }
 0x5af   : > { %v1571_v38 = vsel %vm1570_vm5, %v3342_v50, %v1567_v27  ;;  %v1642_v56 = vadd.f32 1.0, %v1641_v31  ;;  %v3344_v4 = vpop.eup %3343  ;;  %v1591_v50 = vadd.f32 1.1283791, %v1590_v40  ;;  %v1533_v27 = vmul.f32 0.5, %v3982_v60 }
 0x5b0   : > { %v1576_v34 = vsel %vm1573_vm6, %v1575_v29, %v1571_v38  ;;  %v1679_v57 = vmul.f32 %v1678_v41, %v4048_v61  ;;  %v1604_v63 = vmul.f32 %v3344_v4, %v4061_v62  ;;  %vm1609_vm8 = vweird.f32 %v3344_v4 }
 0x5b1   : > { %v1577_v42 = vmul.f32 %v1576_v34, %v1552_v37  ;;  %3345 = vrcp.f32 %v1642_v56  ;;  %v1668_v10 = vmul.f32 %v1667_v58, %v4048_v61  ;;  %v1592_v7 = vmul.f32 %v1591_v50, %v3988_v5  ;;  %vm1610_vm10 = vmor %vm1608_vm9, %vm1609_vm8  ;;  %v3163_v58 = vld [vmem:[%s4617_s5 + $0x20] sm:$0xff] }
 0x5b2   : > { %v1680_v6 = vadd.f32 0.4994258, %v1679_v57  ;;  %v1605_v54 = vsub.f32 1.0, %v1604_v63  ;;  %v1654_v0 = vand.u32 2147483648, %v1642_v56  ;;  %v1652_v44 = vand.u32 2147483647, %v1642_v56 }
 0x5b3   : > { %v3099_v53 = vclamps-f32 %v1577_v42, 1.0  ;;  %v1669_v23 = vadd.f32 0.18741608, %v1668_v10  ;;  %vm1648_vm13 = vweird.f32 %v1642_v56  ;;  %v1632_v29 = vmul.f32 %v1631_v21, %v4015_v33  ;;  %v3412_v21 = vld [vmem:[%s4613_s1 + $0x10] sm:$0xff] }
 0x5b4   : > { %v1681_v12 = vmul.f32 %v1680_v6, %v4048_v61  ;;  %v1606_v14 = vmul.f32 %v3344_v4, %v1605_v54  ;;  %v1655_v62 = vor.u32 1.1754944e-38, %v1654_v0  ;;  %vm1653_vm15 = vcmp.eq.f32.partialorder %v1652_v44, 8.507059e+37  ;;  %v3413_v0 = vld [vmem:[%s4613_s1 + $0x18] sm:$0xff]  ;;  %v3416_v44 = vld [vmem:[%s4613_s1 + $0x30] sm:$0xff] }
 0x5b5   : > { %v1700_v45 = vadd.f32 1.0, %v3099_v53  ;;  %v1670_v32 = vmul.f32 %v1669_v23, %v4048_v61  ;;  %v1534_v33 = vmul.f32 0.5, %v4006_v28  ;;  %v1535_v6 = vmul.f32 0.5, %v4034_v35  ;;  %v3165_v28 = vld [vmem:[%s4617_s5 + $0x30] sm:$0xff]  ;;  %v3405_v35 = vld [vmem:[%s4614_s2 + $0x18] sm:$0xff]  ;;  %v3418_v23 = vld [vmem:[%s4613_s1 + $0x40] sm:$0xff] }
 0x5b6   : > { %v1682_v47 = vadd.f32 1.0, %v1681_v12  ;;  %v1607_v18 = vadd.f32 %v3344_v4, %v1606_v14  ;;  %2049 = vmatpush.msra.mxu0 %v3165_v28  ;;  %v3408_v12 = vld [vmem:[%s4614_s2] sm:$0xff] }
 0x5b7   : > { %v1704_v11 = vmul.f32 %v1700_v45, %v1532_v13  ;;  %v3346_v22 = vpop.eup %3345  ;;  %v1671_v42 = vadd.f32 1.1283791, %v1670_v32  ;;  %v3285_v14 = vld [vmem:[%s4627_s15] ss:$0 sm:$0xff]  ;;  %v3144_v32 = vld [vmem:[%s4619_s7 + $0x28] sm:$0xff] }
 0x5b8   : > { %v1644_v8 = vmul.f32 %v3346_v22, %v1642_v56  ;;  %3347 = vrcp.f32 %v1682_v47  ;;  %v1611_v2 = vsel %vm1610_vm10, %v3344_v4, %v1607_v18  ;;  %vm1649_vm12 = vweird.f32 %v3346_v22 }
 0x5b9   : > { %3103 = vmatmul.msk.f32.vlgmr.msrb.gmra.mxu2 %vm1720_vm7, %v1704_v11  ;;  %v1616_v9 = vsel %vm1613_vm11, %v1615_v3, %v1611_v2  ;;  %vm1650_vm14 = vmor %vm1648_vm13, %vm1649_vm12  ;;  %v1694_v56 = vand.u32 2147483648, %v1682_v47  ;;  %v1692_v40 = vand.u32 2147483647, %v1682_v47  ;;  %vm1688_vm4 = vweird.f32 %v1682_v47  ;;  %v3407_v11 = vld [vmem:[%s4614_s2 + $0x8] sm:$0xff]  ;;  %v3414_v2 = vld [vmem:[%s4613_s1 + $0x20] sm:$0xff] }
 0x5ba   : > { %v1645_v19 = vsub.f32 1.0, %v1644_v8  ;;  %v1617_v1 = vmul.f32 %v1616_v9, %v1592_v7  ;;  %v1672_v57 = vmul.f32 %v1671_v42, %v4039_v48  ;;  %v3164_v48 = vld [vmem:[%s4617_s5 + $0x28] sm:$0xff]  ;;  %v3417_v9 = vld [vmem:[%s4613_s1 + $0x38] sm:$0xff] }
 0x5bb   : > { %v1695_v61 = vor.u32 1.1754944e-38, %v1694_v56  ;;  %vm1693_vm6 = vcmp.eq.f32.partialorder %v1692_v40, 8.507059e+37  ;;  %2050 = vmatpush.msra.mxu0 %v3164_v48 }
 0x5bc   : > { %v1646_v46 = vmul.f32 %v3346_v22, %v1645_v19  ;;  %v3100_v26 = vclamps-f32 %v1617_v1, 1.0  ;;  %v3419_v1 = vld [vmem:[%s4613_s1 + $0x48] sm:$0xff] }
 0x5bd   : > { %2051 = vmatpush.msra.mxu0 %v3163_v58 }
 0x5be   : > { %v1647_v24 = vadd.f32 %v3346_v22, %v1646_v46  ;;  %v3348_v5 = vpop.eup %3347  ;;  %v1701_v37 = vadd.f32 1.0, %v3100_v26  ;;  %v3415_v46 = vld [vmem:[%s4613_s1 + $0x28] sm:$0xff]  ;;  %v3126_v26 = vld [vmem:[%s4618_s6 + $0x38] sm:$0xff] }
 0x5bf   : > { %v1684_v36 = vmul.f32 %v3348_v5, %v1682_v47  ;;  %vm1689_vm3 = vweird.f32 %v3348_v5  ;;  %2158 = vmatpush.msrb.mxu0 %v3405_v35  ;;  %1896 = vmatpush.msra.mxu1 %v3126_v26 }
 0x5c0   : > { %v1651_v30 = vsel %vm1650_vm14, %v3346_v22, %v1647_v24  ;;  %v1705_v52 = vmul.f32 %v1701_v37, %v1533_v27  ;;  %vm1690_vm5 = vmor %vm1688_vm4, %vm1689_vm3  ;;  %v3420_v24 = vld [vmem:[%s4613_s1 + $0x50] sm:$0xff]  ;;  %v3124_v27 = vld [vmem:[%s4618_s6 + $0x28] sm:$0xff] }
 0x5c1   : > { %v1656_v31 = vsel %vm1653_vm15, %v1655_v62, %v1651_v30  ;;  %v1685_v34 = vsub.f32 1.0, %v1684_v36  ;;  %2159 = vmatpush.msrb.mxu0 %v3406_v55  ;;  %v3421_v62 = vld [vmem:[%s4613_s1 + $0x58] sm:$0xff]  ;;  %v3422_v30 = vld [vmem:[%s4613_s1 + $0x60] sm:$0xff] }
 0x5c2   : > { %v1657_v38 = vmul.f32 %v1656_v31, %v1632_v29  ;;  %3104 = vmatmul.msk.f32.gmra.mxu2 %vm1720_vm7, %v1705_v52  ;;  %v3146_v29 = vld [vmem:[%s4619_s7 + $0x38] sm:$0xff]  ;;  %v3145_v31 = vld [vmem:[%s4619_s7 + $0x30] sm:$0xff]  ;;  %v3123_v36 = vld [vmem:[%s4618_s6 + $0x20] sm:$0xff] }
 0x5c3   : > { %v1686_v4 = vmul.f32 %v3348_v5, %v1685_v34  ;;  %2160 = vmatpush.msrb.mxu0 %v3407_v11  ;;  %1966 = vmatpush.msra.mxu2 %v3146_v29  ;;  %v3143_v37 = vld [vmem:[%s4619_s7 + $0x20] sm:$0xff]  ;;  %v3424_v34 = vld [vmem:[%s4613_s1 + $0x70] sm:$0xff]  ;;  %v3425_v52 = vld [vmem:[%s4613_s1 + $0x78] sm:$0xff] }
 0x5c4   : > { %v3101_v41 = vclamps-f32 %v1657_v38, 1.0  ;;  %v3423_v38 = vld [vmem:[%s4613_s1 + $0x68] sm:$0xff] }
 0x5c5   : > { %v1687_v39 = vadd.f32 %v3348_v5, %v1686_v4  ;;  %2161 = vmatpush.msrb.mxu0 %v3408_v12  ;;  %1967 = vmatpush.msra.mxu2 %v3145_v31 }
 0x5c6   : > { %v1702_v60 = vadd.f32 1.0, %v3101_v41 }
 0x5c7   : > { %v1691_v63 = vsel %vm1690_vm5, %v3348_v5, %v1687_v39  ;;  %v3125_v5 = vld [vmem:[%s4618_s6 + $0x30] sm:$0xff]  ;;  %1968 = vmatpush.msra.mxu2 %v3144_v32 }
 0x5c8   : > { %v1706_v53 = vmul.f32 %v1702_v60, %v1534_v33  ;;  %v1696_v49 = vsel %vm1693_vm6, %v1695_v61, %v1691_v63  ;;  %1897 = vmatpush.msra.mxu1 %v3125_v5 }
 0x5c9   : > { %v1697_v13 = vmul.f32 %v1696_v49, %v1672_v57  ;;  %1969 = vmatpush.msra.mxu2 %v3143_v37 }
 0x5ca   : > { %3105 = vmatmul.msk.f32.gmra.mxu2 %vm1720_vm7, %v1706_v53  ;;  %1898 = vmatpush.msra.mxu1 %v3124_v27 }
 0x5cb   : > { %v3102_v45 = vclamps-f32 %v1697_v13, 1.0 }
 0x5cc   : > { %1899 = vmatpush.msra.mxu1 %v3123_v36 }
 0x5cd   : > { %v1703_v54 = vadd.f32 1.0, %v3102_v45 }
 0x5cf   : > { %v1707_v50 = vmul.f32 %v1703_v54, %v1535_v6 }
 0x5d2   : > { %3106 = vmatmul.msk.f32.gmra.mxu2 %vm1720_vm7, %v1707_v50 }
 0x63c   : > { %v1750_v16 = vpop.f32.mrf.mxu2 }
 0x63d   : > { %v1751_v22 = vadd.f32 %v3285_v14, %v1750_v16 }
 0x63f   : > { %v4118_v43 = vadd.f32 %v1751_v22, %v3894_v59 }
 0x641   : > { %3167 = vmatmul.msk.f32.vlgmr.msra.gmra.mxu0 %vm550_vm0, %v4118_v43 }
 0x645   : > { %v1753_v51 = vpop.f32.mrf.mxu2 }
 0x646   : > { %v1754_v8 = vadd.f32 %v3285_v14, %v1753_v51 }
 0x648   : > { %v4123_v47 = vadd.f32 %v1754_v8, %v3899_v17  ;;  %v3409_v17 = vld [vmem:[%s4613_s1] sm:$0xff] }
 0x64a   : > { %3168 = vmatmul.msk.f32.gmra.mxu0 %vm550_vm0, %v4123_v47 }
 0x64d   : > { %v1756_v10 = vpop.f32.mrf.mxu2 }
 0x64e   : > { %v1757_v18 = vadd.f32 %v3285_v14, %v1756_v10 }
 0x650   : > { %v4128_v7 = vadd.f32 %v1757_v18, %v3904_v20  ;;  %v3410_v20 = vld [vmem:[%s4615_s3] sm:$0xf] }
 0x651   : > { %3220 = vmatpush.msk.msrb.mxu1 %vm1177_vm1, %v3410_v20 }
 0x652   : > { %3169 = vmatmul.msk.f32.gmra.mxu0 %vm550_vm0, %v4128_v7 }
 0x655   : > { %v1759_v59 = vpop.f32.mrf.mxu2 }
 0x656   : > { %v1760_v19 = vadd.f32 %v3285_v14, %v1759_v59 }
 0x658   : > { %v4133_v3 = vadd.f32 %v1760_v19, %v3909_v15  ;;  %v3411_v15 = vld [vmem:[%s4613_s1 + $0x8] sm:$0xff] }
 0x65a   : > { %1778 = vmatpush.msra.mxu3 %v4133_v3  ;;  %3170 = vmatmul.msk.f32.gmra.mxu0 %vm550_vm0, %v4133_v3 }
 0x65c   : > { %1779 = vmatpush.msra.mxu3 %v4128_v7 }
 0x65e   : > { %1780 = vmatpush.msra.mxu3 %v4123_v47 }
 0x660   : > { %1781 = vmatpush.msra.mxu3 %v4118_v43 }
 0x661   : > { %3107 = vmatmul.msk.f32.vlgmr.msra.gmra.mxu3 %vm550_vm0, %v3409_v17 }
 0x662   : > { %3203 = vmatpush.msk.msrb.mxu3 %vm1177_vm1, %v3410_v20 }
 0x669   : > { %3108 = vmatmul.msk.f32.gmra.mxu3 %vm550_vm0, %v3411_v15 }
 0x671   : > { %3109 = vmatmul.msk.f32.gmra.mxu3 %vm550_vm0, %v3412_v21 }
 0x679   : > { %3110 = vmatmul.msk.f32.gmra.mxu3 %vm550_vm0, %v3413_v0 }
 0x681   : > { %3111 = vmatmul.msk.f32.gmra.mxu3 %vm550_vm0, %v3414_v2 }
 0x689   : > { %3112 = vmatmul.msk.f32.gmra.mxu3 %vm550_vm0, %v3415_v46 }
 0x691   : > { %3113 = vmatmul.msk.f32.gmra.mxu3 %vm550_vm0, %v3416_v44 }
 0x699   : > { %3114 = vmatmul.msk.f32.gmra.mxu3 %vm550_vm0, %v3417_v9 }
 0x6a1   : > { %3115 = vmatmul.msk.f32.gmra.mxu3 %vm550_vm0, %v3418_v23 }
 0x6a9   : > { %3116 = vmatmul.msk.f32.gmra.mxu3 %vm550_vm0, %v3419_v1 }
 0x6b1   : > { %3117 = vmatmul.msk.f32.gmra.mxu3 %vm550_vm0, %v3420_v24 }
 0x6b9   : > { %3118 = vmatmul.msk.f32.gmra.mxu3 %vm550_vm0, %v3421_v62 }
 0x6be   : > { %v2053_v6 = vpop.f32.mrf.mxu0 }
 0x6c1   : > { %3119 = vmatmul.msk.f32.gmra.mxu3 %vm550_vm0, %v3422_v30 }
 0x6c7   : > { %v2056_v48 = vpop.f32.mrf.mxu0 }
 0x6c9   : > { %3120 = vmatmul.msk.f32.gmra.mxu3 %vm550_vm0, %v3423_v38 }
 0x6cf   : > { %v2059_v55 = vpop.f32.mrf.mxu0 }
 0x6d1   : > { %3121 = vmatmul.msk.f32.gmra.mxu3 %vm550_vm0, %v3424_v34 }
 0x6d7   : > { %v2062_v14 = vpop.f32.mrf.mxu0 }
 0x6d9   : > { %3122 = vmatmul.msk.f32.gmra.mxu3 %vm550_vm0, %v3425_v52 }
 0x6e4   : > { %v1783_v41 = vpop.f32.mrf.mxu3 }
 0x6e5   : > { %3127 = vmatmul.msk.f32.vlgmr.msra.gmra.mxu1 %vm550_vm0, %v1783_v41  ;;  %3147 = vmatmul.msk.f32.vlgmr.msra.gmra.mxu2 %vm550_vm0, %v1783_v41 }
 0x6ec   : > { %v1786_v56 = vpop.f32.mrf.mxu3 }
 0x6ed   : > { %3128 = vmatmul.msk.f32.gmra.mxu1 %vm550_vm0, %v1786_v56  ;;  %3148 = vmatmul.msk.f32.gmra.mxu2 %vm550_vm0, %v1786_v56 }
 0x6f4   : > { %v1789_v42 = vpop.f32.mrf.mxu3 }
 0x6f5   : > { %3129 = vmatmul.msk.f32.gmra.mxu1 %vm550_vm0, %v1789_v42  ;;  %3149 = vmatmul.msk.f32.gmra.mxu2 %vm550_vm0, %v1789_v42 }
 0x6fc   : > { %v1792_v4 = vpop.f32.mrf.mxu3 }
 0x6fd   : > { %3130 = vmatmul.msk.f32.gmra.mxu1 %vm550_vm0, %v1792_v4  ;;  %3150 = vmatmul.msk.f32.gmra.mxu2 %vm550_vm0, %v1792_v4 }
 0x704   : > { %v1795_v40 = vpop.f32.mrf.mxu3 }
 0x705   : > { %3131 = vmatmul.msk.f32.gmra.mxu1 %vm550_vm0, %v1795_v40  ;;  %3151 = vmatmul.msk.f32.gmra.mxu2 %vm550_vm0, %v1795_v40  ;;  %v3175_v40 = vld [vmem:[%s4616_s4 + $0xa0] sm:$0xff] }
 0x70c   : > { %v1798_v60 = vpop.f32.mrf.mxu3 }
 0x70d   : > { %3132 = vmatmul.msk.f32.gmra.mxu1 %vm550_vm0, %v1798_v60  ;;  %3152 = vmatmul.msk.f32.gmra.mxu2 %vm550_vm0, %v1798_v60 }
 0x714   : > { %v1801_v33 = vpop.f32.mrf.mxu3 }
 0x715   : > { %3133 = vmatmul.msk.f32.gmra.mxu1 %vm550_vm0, %v1801_v33  ;;  %3153 = vmatmul.msk.f32.gmra.mxu2 %vm550_vm0, %v1801_v33  ;;  %v3171_v33 = vld [vmem:[%s4616_s4 + $0x80] sm:$0xff] }
 0x71c   : > { %v1804_v39 = vpop.f32.mrf.mxu3 }
 0x71d   : > { %3134 = vmatmul.msk.f32.gmra.mxu1 %vm550_vm0, %v1804_v39  ;;  %3154 = vmatmul.msk.f32.gmra.mxu2 %vm550_vm0, %v1804_v39  ;;  %v3179_v39 = vld [vmem:[%s4616_s4 + $0xc0] sm:$0xff] }
 0x724   : > { %v1807_v61 = vpop.f32.mrf.mxu3 }
 0x725   : > { %3135 = vmatmul.msk.f32.gmra.mxu1 %vm550_vm0, %v1807_v61  ;;  %3155 = vmatmul.msk.f32.gmra.mxu2 %vm550_vm0, %v1807_v61 }
 0x72c   : > { %v1810_v53 = vpop.f32.mrf.mxu3 }
 0x72d   : > { %3136 = vmatmul.msk.f32.gmra.mxu1 %vm550_vm0, %v1810_v53  ;;  %3156 = vmatmul.msk.f32.gmra.mxu2 %vm550_vm0, %v1810_v53 }
 0x734   : > { %v1813_v57 = vpop.f32.mrf.mxu3 }
 0x735   : > { %3137 = vmatmul.msk.f32.gmra.mxu1 %vm550_vm0, %v1813_v57  ;;  %3157 = vmatmul.msk.f32.gmra.mxu2 %vm550_vm0, %v1813_v57 }
 0x73c   : > { %v1816_v63 = vpop.f32.mrf.mxu3 }
 0x73d   : > { %3138 = vmatmul.msk.f32.gmra.mxu1 %vm550_vm0, %v1816_v63  ;;  %3158 = vmatmul.msk.f32.gmra.mxu2 %vm550_vm0, %v1816_v63  ;;  %v3183_v63 = vld [vmem:[%s4616_s4 + $0xe0] sm:$0xff] }
 0x744   : > { %v1819_v49 = vpop.f32.mrf.mxu3 }
 0x745   : > { %3139 = vmatmul.msk.f32.gmra.mxu1 %vm550_vm0, %v1819_v49  ;;  %3159 = vmatmul.msk.f32.gmra.mxu2 %vm550_vm0, %v1819_v49 }
 0x74c   : > { %v1822_v13 = vpop.f32.mrf.mxu3 }
 0x74d   : > { %3140 = vmatmul.msk.f32.gmra.mxu1 %vm550_vm0, %v1822_v13  ;;  %3160 = vmatmul.msk.f32.gmra.mxu2 %vm550_vm0, %v1822_v13  ;;  %v3176_v13 = vld [vmem:[%s4616_s4 + $0xa8] sm:$0xff] }
 0x754   : > { %v1825_v45 = vpop.f32.mrf.mxu3 }
 0x755   : > { %3141 = vmatmul.msk.f32.gmra.mxu1 %vm550_vm0, %v1825_v45  ;;  %3161 = vmatmul.msk.f32.gmra.mxu2 %vm550_vm0, %v1825_v45 }
 0x75c   : > { %v1828_v54 = vpop.f32.mrf.mxu3 }
 0x75d   : > { %3142 = vmatmul.msk.f32.gmra.mxu1 %vm550_vm0, %v1828_v54  ;;  %3162 = vmatmul.msk.f32.gmra.mxu2 %vm550_vm0, %v1828_v54 }
 0x762   : > { %v1901_v50 = vpop.f32.mrf.mxu1 }
 0x763   : > { %v2065_v28 = vmul.f32 %v2053_v6, %v1901_v50 }
 0x765   : > { %3187 = vmatmul.msk.f32.vlgmr.msrb.gmra.mxu0 %vm550_vm0, %v2065_v28  ;;  %v3180_v28 = vld [vmem:[%s4616_s4 + $0xc8] sm:$0xff] }
 0x76a   : > { %v1904_v58 = vpop.f32.mrf.mxu1 }
 0x76b   : > { %v2066_v35 = vmul.f32 %v2056_v48, %v1904_v58 }
 0x76d   : > { %3188 = vmatmul.msk.f32.gmra.mxu0 %vm550_vm0, %v2066_v35 }
 0x772   : > { %v1907_v11 = vpop.f32.mrf.mxu1 }
 0x773   : > { %v2067_v12 = vmul.f32 %v2059_v55, %v1907_v11 }
 0x775   : > { %3189 = vmatmul.msk.f32.gmra.mxu0 %vm550_vm0, %v2067_v12 }
 0x77a   : > { %v1910_v16 = vpop.f32.mrf.mxu1 }
 0x77b   : > { %v2068_v22 = vmul.f32 %v2062_v14, %v1910_v16 }
 0x77d   : > { %3190 = vmatmul.msk.f32.gmra.mxu0 %vm550_vm0, %v2068_v22  ;;  %v3184_v22 = vld [vmem:[%s4616_s4 + $0xe8] sm:$0xff] }
 0x782   : > { %v1913_v51 = vpop.f32.mrf.mxu1 }
 0x783   : > { %v2069_v8 = vmul.f32 %v2053_v6, %v1913_v51 }
 0x785   : > { %3191 = vmatmul.msk.f32.gmra.mxu0 %vm550_vm0, %v2069_v8 }
 0x78a   : > { %v1916_v10 = vpop.f32.mrf.mxu1 }
 0x78b   : > { %v2070_v18 = vmul.f32 %v2056_v48, %v1916_v10 }
 0x78d   : > { %3192 = vmatmul.msk.f32.gmra.mxu0 %vm550_vm0, %v2070_v18  ;;  %v3177_v18 = vld [vmem:[%s4616_s4 + $0xb0] sm:$0xff] }
 0x792   : > { %v1919_v59 = vpop.f32.mrf.mxu1 }
 0x793   : > { %v2071_v19 = vmul.f32 %v2059_v55, %v1919_v59 }
 0x795   : > { %3193 = vmatmul.msk.f32.gmra.mxu0 %vm550_vm0, %v2071_v19 }
 0x79a   : > { %v1922_v17 = vpop.f32.mrf.mxu1 }
 0x79b   : > { %v2072_v20 = vmul.f32 %v2062_v14, %v1922_v17  ;;  %v3173_v17 = vld [vmem:[%s4616_s4 + $0x90] sm:$0xff] }
 0x79d   : > { %3194 = vmatmul.msk.f32.gmra.mxu0 %vm550_vm0, %v2072_v20 }
 0x7a2   : > { %v1925_v15 = vpop.f32.mrf.mxu1 }
 0x7a3   : > { %v2073_v21 = vmul.f32 %v2053_v6, %v1925_v15 }
 0x7a5   : > { %3195 = vmatmul.msk.f32.gmra.mxu0 %vm550_vm0, %v2073_v21  ;;  %v3181_v21 = vld [vmem:[%s4616_s4 + $0xd0] sm:$0xff] }
 0x7aa   : > { %v1928_v0 = vpop.f32.mrf.mxu1 }
 0x7ab   : > { %v2074_v2 = vmul.f32 %v2056_v48, %v1928_v0 }
 0x7ad   : > { %3196 = vmatmul.msk.f32.gmra.mxu0 %vm550_vm0, %v2074_v2 }
 0x7b2   : > { %v1931_v46 = vpop.f32.mrf.mxu1 }
 0x7b3   : > { %v2075_v44 = vmul.f32 %v2059_v55, %v1931_v46 }
 0x7b5   : > { %3197 = vmatmul.msk.f32.gmra.mxu0 %vm550_vm0, %v2075_v44 }
 0x7ba   : > { %v1934_v9 = vpop.f32.mrf.mxu1 }
 0x7bb   : > { %v2076_v23 = vmul.f32 %v2062_v14, %v1934_v9 }
 0x7bd   : > { %3198 = vmatmul.msk.f32.gmra.mxu0 %vm550_vm0, %v2076_v23 }
 0x7c2   : > { %v1937_v1 = vpop.f32.mrf.mxu1 }
 0x7c3   : > { %v2077_v24 = vmul.f32 %v2053_v6, %v1937_v1  ;;  %v3172_v6 = vld [vmem:[%s4616_s4 + $0x88] sm:$0xff] }
 0x7c5   : > { %3199 = vmatmul.msk.f32.gmra.mxu0 %vm550_vm0, %v2077_v24 }
 0x7ca   : > { %v1940_v62 = vpop.f32.mrf.mxu1 }
 0x7cb   : > { %v2078_v26 = vmul.f32 %v2056_v48, %v1940_v62 }
 0x7cd   : > { %3200 = vmatmul.msk.f32.gmra.mxu0 %vm550_vm0, %v2078_v26  ;;  %v3185_v26 = vld [vmem:[%s4616_s4 + $0xf0] sm:$0xff] }
 0x7d2   : > { %v1943_v5 = vpop.f32.mrf.mxu1 }
 0x7d3   : > { %v2079_v27 = vmul.f32 %v2059_v55, %v1943_v5 }
 0x7d5   : > { %3201 = vmatmul.msk.f32.gmra.mxu0 %vm550_vm0, %v2079_v27 }
 0x7da   : > { %v1946_v29 = vpop.f32.mrf.mxu1 }
 0x7db   : > { %v2080_v30 = vmul.f32 %v2062_v14, %v1946_v29 }
 0x7dd   : > { %3202 = vmatmul.msk.f32.gmra.mxu0 %vm550_vm0, %v2080_v30 }
 0x7e2   : > { %v2163_v31 = vpop.f32.mrf.mxu0 }
 0x7e3   : > { %v2164_v53 = vadd.f32 %v3171_v33, %v2163_v31 }
 0x7ea   : > { %v2166_v32 = vpop.f32.mrf.mxu0 }
 0x7eb   : > { %v2167_v35 = vadd.f32 %v3172_v6, %v2166_v32  ;;  %v3178_v32 = vld [vmem:[%s4616_s4 + $0xb8] sm:$0xff] }
 0x7f2   : > { %v2169_v36 = vpop.f32.mrf.mxu0 }
 0x7f3   : > { %v2170_v44 = vadd.f32 %v3173_v17, %v2169_v36 }
 0x7fa   : > { %v4282_v37 = vpop.f32.mrf.mxu0 }
 0x802   : > { %v2175_v38 = vpop.f32.mrf.mxu0 }
 0x803   : > { %v2176_v61 = vadd.f32 %v3175_v40, %v2175_v38 }
 0x805   : > { %v2211_v49 = vmax.f32 %v2164_v53, %v2176_v61 }
 0x80a   : > { %v2178_v34 = vpop.f32.mrf.mxu0 }
 0x80b   : > { %v2179_v48 = vadd.f32 %v3176_v13, %v2178_v34  ;;  %v3174_v34 = vld [vmem:[%s4616_s4 + $0x98] sm:$0xff] }
 0x80d   : > { %v2212_v51 = vmax.f32 %v2167_v35, %v2179_v48 }
 0x812   : > { %v2181_v52 = vpop.f32.mrf.mxu0 }
 0x813   : > { %v2182_v2 = vadd.f32 %v3177_v18, %v2181_v52 }
 0x815   : > { %v2213_v27 = vmax.f32 %v2170_v44, %v2182_v2 }
 0x81a   : > { %v4284_v41 = vpop.f32.mrf.mxu0 }
 0x822   : > { %v2187_v56 = vpop.f32.mrf.mxu0 }
 0x823   : > { %v2188_v57 = vadd.f32 %v3179_v39, %v2187_v56  ;;  %v3182_v56 = vld [vmem:[%s4616_s4 + $0xd8] sm:$0xff]  ;;  %v2185_v39 = vadd.f32 %v3178_v32, %v4284_v41 }
 0x824   : > { %v3186_v41 = vld [vmem:[%s4616_s4 + $0xf8] sm:$0xff] }
 0x825   : > { %v2215_v54 = vmax.f32 %v2211_v49, %v2188_v57 }
 0x82a   : > { %v2190_v42 = vpop.f32.mrf.mxu0 }
 0x82b   : > { %v2191_v55 = vadd.f32 %v3180_v28, %v2190_v42 }
 0x82d   : > { %v2216_v20 = vmax.f32 %v2212_v51, %v2191_v55 }
 0x832   : > { %v2193_v4 = vpop.f32.mrf.mxu0 }
 0x833   : > { %v2194_v9 = vadd.f32 %v3181_v21, %v2193_v4 }
 0x835   : > { %v2217_v52 = vmax.f32 %v2213_v27, %v2194_v9 }
 0x83a   : > { %v4289_v60 = vpop.f32.mrf.mxu0 }
 0x83b   : > { %v2197_v49 = vadd.f32 %v3182_v56, %v4289_v60 }
 0x842   : > { %v2199_v45 = vpop.f32.mrf.mxu0 }
 0x843   : > { %v2200_v50 = vadd.f32 %v3183_v63, %v2199_v45  ;;  %v2173_v63 = vadd.f32 %v3174_v34, %v4282_v37 }
 0x845   : > { %v2219_v58 = vmax.f32 %v2215_v54, %v2200_v50 }
 0x847   : > { %v2223_v11 = vsub.f32 %v2164_v53, %v2219_v58  ;;  %v2227_v12 = vsub.f32 %v2176_v61, %v2219_v58  ;;  %v2231_v14 = vsub.f32 %v2188_v57, %v2219_v58  ;;  %v2235_v16 = vsub.f32 %v2200_v50, %v2219_v58 }
 0x849   : > { %v2239_v8 = vmul.f32 1.442695, %v2223_v11  ;;  %v2247_v10 = vmul.f32 1.442695, %v2227_v12  ;;  %v2255_v59 = vmul.f32 1.442695, %v2231_v14 }
 0x84a   : > { %v2202_v19 = vpop.f32.mrf.mxu0  ;;  %v2263_v0 = vmul.f32 1.442695, %v2235_v16 }
 0x84b   : > { %3349 = vpow2.f32 %v2239_v8  ;;  %v2203_v15 = vadd.f32 %v3184_v22, %v2202_v19 }
 0x84c   : > { %3351 = vpow2.f32 %v2247_v10 }
 0x84d   : > { %v2220_v46 = vmax.f32 %v2216_v20, %v2203_v15  ;;  %3353 = vpow2.f32 %v2255_v59 }
 0x84e   : > { %3355 = vpow2.f32 %v2263_v0 }
 0x84f   : > { %v2224_v23 = vsub.f32 %v2167_v35, %v2220_v46  ;;  %v2228_v1 = vsub.f32 %v2179_v48, %v2220_v46  ;;  %v2232_v24 = vsub.f32 %v2191_v55, %v2220_v46  ;;  %v2236_v62 = vsub.f32 %v2203_v15, %v2220_v46 }
 0x850   : > { %v2214_v48 = vmax.f32 %v2173_v63, %v2185_v39 }
 0x851   : > { %v3350_v5 = vpop.eup %3349  ;;  %v2241_v29 = vmul.f32 1.442695, %v2224_v23  ;;  %v2249_v30 = vmul.f32 1.442695, %v2228_v1  ;;  %v2257_v36 = vmul.f32 1.442695, %v2232_v24 }
 0x852   : > { %v4324_v31 = vpop.eup %3351  ;;  %v2205_v38 = vpop.f32.mrf.mxu0  ;;  %3204 = vmatmul.msk.f32.vlgmr.msrb.gmra.mxu3 %vm1128_vm2, %v3350_v5  ;;  %v2265_v33 = vmul.f32 1.442695, %v2236_v62  ;;  %v2218_v11 = vmax.f32 %v2214_v48, %v2197_v49 }
 0x853   : > { %v2271_v42 = vadd.f32 %v4324_v31, %v3350_v5  ;;  %3357 = vpow2.f32 %v2241_v29  ;;  %v2206_v4 = vadd.f32 %v3185_v26, %v2205_v38  ;;  %v4337_v40 = vpop.eup %3353 }
 0x854   : > { %3359 = vpow2.f32 %v2249_v30  ;;  %v4341_v57 = vpop.eup %3355 }
 0x855   : > { %v2275_v61 = vadd.f32 %v4337_v40, %v2271_v42  ;;  %v2221_v53 = vmax.f32 %v2217_v52, %v2206_v4  ;;  %3361 = vpow2.f32 %v2257_v36 }
 0x856   : > { %3363 = vpow2.f32 %v2265_v33 }
 0x857   : > { %v2279_v13 = vadd.f32 %v4341_v57, %v2275_v61  ;;  %v2225_v45 = vsub.f32 %v2170_v44, %v2221_v53  ;;  %v2229_v6 = vsub.f32 %v2182_v2, %v2221_v53  ;;  %v2233_v54 = vsub.f32 %v2194_v9, %v2221_v53 }
 0x858   : > { %v2237_v50 = vsub.f32 %v2206_v4, %v2221_v53 }
 0x859   : > { %v3358_v28 = vpop.eup %3357  ;;  %3365 = vrcp.f32 %v2279_v13  ;;  %v2243_v58 = vmul.f32 1.442695, %v2225_v45  ;;  %v2251_v35 = vmul.f32 1.442695, %v2229_v6  ;;  %v2259_v60 = vmul.f32 1.442695, %v2233_v54 }
 0x85a   : > { %v4349_v37 = vpop.eup %3359  ;;  %v2208_v55 = vpop.f32.mrf.mxu0  ;;  %3205 = vmatmul.msk.f32.gmra.mxu3 %vm1128_vm2, %v3358_v28  ;;  %v2267_v22 = vmul.f32 1.442695, %v2237_v50 }
 0x85b   : > { %v2272_v12 = vadd.f32 %v4349_v37, %v3358_v28  ;;  %3367 = vpow2.f32 %v2243_v58  ;;  %v2209_v14 = vadd.f32 %v3186_v41, %v2208_v55  ;;  %v4353_v16 = vpop.eup %3361 }
 0x85c   : > { %3369 = vpow2.f32 %v2251_v35  ;;  %v4356_v10 = vpop.eup %3363 }
 0x85d   : > { %v2276_v51 = vadd.f32 %v4353_v16, %v2272_v12  ;;  %v2222_v8 = vmax.f32 %v2218_v11, %v2209_v14  ;;  %3371 = vpow2.f32 %v2259_v60 }
 0x85e   : > { %3373 = vpow2.f32 %v2267_v22 }
 0x85f   : > { %v3366_v18 = vpop.eup %3365  ;;  %v2280_v59 = vadd.f32 %v4356_v10, %v2276_v51  ;;  %v2226_v19 = vsub.f32 %v2173_v63, %v2222_v8  ;;  %v2230_v17 = vsub.f32 %v2185_v39, %v2222_v8  ;;  %v2234_v20 = vsub.f32 %v2197_v49, %v2222_v8 }
 0x860   : > { %v2287_v15 = vmul.f32 %v3366_v18, %v2279_v13  ;;  %v2238_v21 = vsub.f32 %v2209_v14, %v2222_v8 }
 0x861   : > { %v3368_v0 = vpop.eup %3367  ;;  %3375 = vrcp.f32 %v2280_v59  ;;  %v2245_v2 = vmul.f32 1.442695, %v2226_v19  ;;  %v2253_v46 = vmul.f32 1.442695, %v2230_v17  ;;  %v2261_v23 = vmul.f32 1.442695, %v2234_v20 }
 0x862   : > { %v3370_v44 = vpop.eup %3369  ;;  %v2291_v9 = vsub.f32 2.0, %v2287_v15  ;;  %3206 = vmatmul.msk.f32.gmra.mxu3 %vm1128_vm2, %v3368_v0  ;;  %v2269_v26 = vmul.f32 1.442695, %v2238_v21  ;;  %v3225_v17 = vld [vmem:[%s4620_s8 + $0x20] sm:$0xff] }
 0x863   : > { %v2273_v1 = vadd.f32 %v3370_v44, %v3368_v0  ;;  %3377 = vpow2.f32 %v2245_v2  ;;  %v3372_v24 = vpop.eup %3371 }
 0x864   : > { %v2295_v62 = vmul.f32 %v3366_v18, %v2291_v9  ;;  %3379 = vpow2.f32 %v2253_v46  ;;  %v3374_v27 = vpop.eup %3373  ;;  %v3227_v18 = vld [vmem:[%s4620_s8 + $0x30] sm:$0xff] }
 0x865   : > { %v2277_v5 = vadd.f32 %v3372_v24, %v2273_v1  ;;  %3381 = vpow2.f32 %v2261_v23 }
 0x866   : > { %3221 = vmatmul.msk.f32.vlgmr.msrb.gmra.mxu1 %vm1128_vm2, %v2295_v62  ;;  %3383 = vpow2.f32 %v2269_v26 }
 0x867   : > { %v3376_v29 = vpop.eup %3375  ;;  %v2281_v30 = vadd.f32 %v3374_v27, %v2277_v5 }
 0x868   : > { %v2288_v32 = vmul.f32 %v3376_v29, %v2280_v59  ;;  %v3226_v59 = vld [vmem:[%s4620_s8 + $0x28] sm:$0xff] }
 0x869   : > { %v3378_v36 = vpop.eup %3377  ;;  %3385 = vrcp.f32 %v2281_v30 }
 0x86a   : > { %v3380_v38 = vpop.eup %3379  ;;  %3207 = vmatmul.msk.f32.gmra.mxu3 %vm1128_vm2, %v3378_v36  ;;  %v2292_v34 = vsub.f32 2.0, %v2288_v32 }
 0x86b   : > { %v2274_v52 = vadd.f32 %v3380_v38, %v3378_v36  ;;  %v3382_v56 = vpop.eup %3381 }
 0x86c   : > { %v2296_v42 = vmul.f32 %v3376_v29, %v2292_v34  ;;  %v3384_v33 = vpop.eup %3383 }
 0x86d   : > { %v2278_v4 = vadd.f32 %v3382_v56, %v2274_v52 }
 0x86e   : > { %3222 = vmatmul.msk.f32.gmra.mxu1 %vm1128_vm2, %v2296_v42 }
 0x86f   : > { %v3386_v39 = vpop.eup %3385  ;;  %v2282_v61 = vadd.f32 %v3384_v33, %v2278_v4 }
 0x870   : > { %v2289_v53 = vmul.f32 %v3386_v39, %v2281_v30 }
 0x871   : > { %3387 = vrcp.f32 %v2282_v61 }
 0x872   : > { %3208 = vmatmul.msk.f32.gmra.mxu3 %vm1128_vm2, %v4324_v31  ;;  %v2293_v63 = vsub.f32 2.0, %v2289_v53  ;;  %v1971_v31 = vpop.f32.mrf.mxu2 }
 0x874   : > { %v2297_v49 = vmul.f32 %v3386_v39, %v2293_v63 }
 0x876   : > { %3223 = vmatmul.msk.f32.gmra.mxu1 %vm1128_vm2, %v2297_v49 }
 0x877   : > { %v3388_v13 = vpop.eup %3387 }
 0x878   : > { %v2290_v45 = vmul.f32 %v3388_v13, %v2282_v61 }
 0x87a   : > { %3209 = vmatmul.msk.f32.gmra.mxu3 %vm1128_vm2, %v4349_v37  ;;  %v2294_v6 = vsub.f32 2.0, %v2290_v45  ;;  %v1974_v50 = vpop.f32.mrf.mxu2 }
 0x87c   : > { %v2298_v54 = vmul.f32 %v3388_v13, %v2294_v6 }
 0x87e   : > { %3224 = vmatmul.msk.f32.gmra.mxu1 %vm1128_vm2, %v2298_v54 }
 0x882   : > { %3210 = vmatmul.msk.f32.gmra.mxu3 %vm1128_vm2, %v3370_v44 }
 0x88a   : > { %3211 = vmatmul.msk.f32.gmra.mxu3 %vm1128_vm2, %v3380_v38 }
 0x892   : > { %3212 = vmatmul.msk.f32.gmra.mxu3 %vm1128_vm2, %v4337_v40  ;;  %v1977_v40 = vpop.f32.mrf.mxu2 }
 0x89a   : > { %3213 = vmatmul.msk.f32.gmra.mxu3 %vm1128_vm2, %v4353_v16  ;;  %v4383_v41 = vpop.f32.mrf.mxu2 }
 0x8a2   : > { %3214 = vmatmul.msk.f32.gmra.mxu3 %vm1128_vm2, %v3372_v24  ;;  %v1983_v58 = vpop.f32.mrf.mxu2 }
 0x8aa   : > { %3215 = vmatmul.msk.f32.gmra.mxu3 %vm1128_vm2, %v3382_v56  ;;  %v1986_v37 = vpop.f32.mrf.mxu2 }
 0x8b2   : > { %3216 = vmatmul.msk.f32.gmra.mxu3 %vm1128_vm2, %v4341_v57  ;;  %v1989_v55 = vpop.f32.mrf.mxu2 }
 0x8ba   : > { %3217 = vmatmul.msk.f32.gmra.mxu3 %vm1128_vm2, %v4356_v10  ;;  %v1992_v11 = vpop.f32.mrf.mxu2  ;;  %v3228_v10 = vld [vmem:[%s4620_s8 + $0x38] sm:$0xff] }
 0x8bb   : > { %2519 = vmatpush.msrb.mxu2 %v3228_v10 }
 0x8bd   : > { %2520 = vmatpush.msrb.mxu2 %v3227_v18 }
 0x8bf   : > { %2521 = vmatpush.msrb.mxu2 %v3226_v59 }
 0x8c1   : > { %2522 = vmatpush.msrb.mxu2 %v3225_v17 }
 0x8c2   : > { %3218 = vmatmul.msk.f32.gmra.mxu3 %vm1128_vm2, %v3374_v27  ;;  %v1995_v16 = vpop.f32.mrf.mxu2 }
 0x8ca   : > { %3219 = vmatmul.msk.f32.gmra.mxu3 %vm1128_vm2, %v3384_v33  ;;  %v1998_v51 = vpop.f32.mrf.mxu2 }
 0x8d2   : > { %v2001_v19 = vpop.f32.mrf.mxu2 }
 0x8d5   : > { %v2364_v28 = vpop.f32.mrf.mxu3 }
 0x8d6   : > { %v2412_v44 = vmul.f32 %v2364_v28, %v1971_v31 }
 0x8da   : > { %v2004_v15 = vpop.f32.mrf.mxu2 }
 0x8dd   : > { %v2367_v48 = vpop.f32.mrf.mxu3 }
 0x8de   : > { %v2413_v30 = vmul.f32 %v2367_v48, %v1974_v50 }
 0x8e2   : > { %v2007_v2 = vpop.f32.mrf.mxu2 }
 0x8e3   : > { %v2469_v23 = vpop.f32.mrf.mxu1 }
 0x8e5   : > { %v2370_v35 = vpop.f32.mrf.mxu3 }
 0x8e6   : > { %v2414_v39 = vmul.f32 %v2370_v35, %v1977_v40 }
 0x8ea   : > { %v2010_v29 = vpop.f32.mrf.mxu2 }
 0x8eb   : > { %v2472_v34 = vpop.f32.mrf.mxu1 }
 0x8ed   : > { %v2373_v60 = vpop.f32.mrf.mxu3 }
 0x8ee   : > { %v2415_v28 = vmul.f32 %v2373_v60, %v4383_v41 }
 0x8f2   : > { %v2013_v63 = vpop.f32.mrf.mxu2 }
 0x8f3   : > { %v2475_v54 = vpop.f32.mrf.mxu1 }
 0x8f5   : > { %v2376_v57 = vpop.f32.mrf.mxu3 }
 0x8f6   : > { %v2416_v46 = vmul.f32 %v2376_v57, %v1983_v58 }
 0x8f8   : > { %v2428_v1 = vadd.f32 %v2416_v46, %v2412_v44 }
 0x8fa   : > { %v2016_v40 = vpop.f32.mrf.mxu2 }
 0x8fd   : > { %v2379_v12 = vpop.f32.mrf.mxu3 }
 0x8fe   : > { %v2417_v5 = vmul.f32 %v2379_v12, %v1986_v37 }
 0x900   : > { %v2429_v38 = vadd.f32 %v2417_v5, %v2413_v30 }
 0x905   : > { %v2382_v14 = vpop.f32.mrf.mxu3 }
 0x906   : > { %v2418_v4 = vmul.f32 %v2382_v14, %v1989_v55  ;;  %v2478_v14 = vpop.f32.mrf.mxu1 }
 0x908   : > { %v2430_v49 = vadd.f32 %v2418_v4, %v2414_v39  ;;  %v3237_v4 = vld [vmem:[%s4624_s12 + $0x28] sm:$0xff] }
 0x90d   : > { %v2385_v22 = vpop.f32.mrf.mxu3 }
 0x90e   : > { %v2419_v31 = vmul.f32 %v2385_v22, %v1992_v11  ;;  %v3286_v11 = vld [vmem:[%s4621_s9 + $0x1] ss:$0 sm:$0xff] }
 0x910   : > { %v2431_v37 = vadd.f32 %v2419_v31, %v2415_v28 }
 0x915   : > { %v2388_v8 = vpop.f32.mrf.mxu3 }
 0x916   : > { %v2420_v9 = vmul.f32 %v2388_v8, %v1995_v16 }
 0x918   : > { %v2432_v62 = vadd.f32 %v2428_v1, %v2420_v9 }
 0x91d   : > { %v2391_v20 = vpop.f32.mrf.mxu3 }
 0x91e   : > { %v2421_v32 = vmul.f32 %v2391_v20, %v1998_v51 }
 0x920   : > { %v2433_v56 = vadd.f32 %v2429_v38, %v2421_v32 }
 0x925   : > { %v2394_v21 = vpop.f32.mrf.mxu3 }
 0x926   : > { %v2422_v61 = vmul.f32 %v2394_v21, %v2001_v19 }
 0x928   : > { %v2434_v45 = vadd.f32 %v2430_v49, %v2422_v61 }
 0x92d   : > { %v2397_v0 = vpop.f32.mrf.mxu3 }
 0x92e   : > { %v2423_v48 = vmul.f32 %v2397_v0, %v2004_v15 }
 0x930   : > { %v2435_v55 = vadd.f32 %v2431_v37, %v2423_v48 }
 0x935   : > { %v2400_v24 = vpop.f32.mrf.mxu3 }
 0x936   : > { %v2424_v26 = vmul.f32 %v2400_v24, %v2007_v2 }
 0x938   : > { %v2436_v27 = vadd.f32 %v2432_v62, %v2424_v26 }
 0x93a   : > { %v2481_v36 = vmul.f32 %v2469_v23, %v2436_v27 }
 0x93c   : > { %3230 = vmatmul.msk.f32.vlgmr.msrb.gmra.mxu2 %vm550_vm0, %v2481_v36 }
 0x93d   : > { %v2403_v52 = vpop.f32.mrf.mxu3 }
 0x93e   : > { %v2425_v42 = vmul.f32 %v2403_v52, %v2010_v29 }
 0x940   : > { %v2437_v33 = vadd.f32 %v2433_v56, %v2425_v42  ;;  %v3239_v56 = vld [vmem:[%s4624_s12 + $0x38] sm:$0xff]  ;;  %v3238_v42 = vld [vmem:[%s4624_s12 + $0x30] sm:$0xff] }
 0x941   : > { %2680 = vmatpush.msra.mxu1 %v3239_v56 }
 0x942   : > { %v2482_v53 = vmul.f32 %v2472_v34, %v2437_v33  ;;  %v3236_v33 = vld [vmem:[%s4624_s12 + $0x20] sm:$0xff] }
 0x943   : > { %2681 = vmatpush.msra.mxu1 %v3238_v42 }
 0x944   : > { %3231 = vmatmul.msk.f32.gmra.mxu2 %vm550_vm0, %v2482_v53 }
 0x945   : > { %v2406_v13 = vpop.f32.mrf.mxu3  ;;  %2682 = vmatpush.msra.mxu1 %v3237_v4 }
 0x946   : > { %v2426_v6 = vmul.f32 %v2406_v13, %v2013_v63 }
 0x947   : > { %2683 = vmatpush.msra.mxu1 %v3236_v33 }
 0x948   : > { %v2438_v50 = vadd.f32 %v2434_v45, %v2426_v6 }
 0x94a   : > { %v2483_v58 = vmul.f32 %v2475_v54, %v2438_v50 }
 0x94c   : > { %3232 = vmatmul.msk.f32.gmra.mxu2 %vm550_vm0, %v2483_v58 }
 0x94d   : > { %v2409_v35 = vpop.f32.mrf.mxu3 }
 0x94e   : > { %v2427_v57 = vmul.f32 %v2409_v35, %v2016_v40 }
 0x950   : > { %v2439_v12 = vadd.f32 %v2435_v55, %v2427_v57  ;;  %v3287_v55 = vld [vmem:[%s4622_s10 + $0x1] ss:$0 sm:$0xff] }
 0x952   : > { %v2484_v16 = vmul.f32 %v2478_v14, %v2439_v12  ;;  %v3288_v14 = vld [vmem:[%s4623_s11 + $0x1] ss:$0 sm:$0xff] }
 0x954   : > { %3233 = vmatmul.msk.f32.gmra.mxu2 %vm550_vm0, %v2484_v16 }
 0x9bf   : > { %v2524_v22 = vpop.f32.mrf.mxu2 }
 0x9c0   : > { %v2525_v41 = vadd.f32 %v3286_v11, %v2524_v22 }
 0x9c2   : > { %v4406_v60 = vadd.f32 %v2525_v41, %v4118_v43 }
 0x9c4   : > { %v2540_v51 = vsel %vm550_vm0, %v4406_v60, 0.0 }
 0x9c5   : > { %2541 = vadd.xlane.f32.xlu2 %v2540_v51 }
 0x9c7   : > { %v2527_v8 = vpop.f32.mrf.mxu2 }
 0x9c8   : > { %v2528_v10 = vadd.f32 %v3286_v11, %v2527_v8 }
 0x9ca   : > { %v4411_v18 = vadd.f32 %v2528_v10, %v4123_v47 }
 0x9cc   : > { %v2543_v59 = vsel %vm550_vm0, %v4411_v18, 0.0 }
 0x9cd   : > { %2544 = vadd.xlane.f32.xlu0 %v2543_v59 }
 0x9cf   : > { %v2530_v19 = vpop.f32.mrf.mxu2 }
 0x9d0   : > { %v2531_v17 = vadd.f32 %v3286_v11, %v2530_v19 }
 0x9d2   : > { %v4416_v20 = vadd.f32 %v2531_v17, %v4128_v7 }
 0x9d4   : > { %v2546_v43 = vsel %vm550_vm0, %v4416_v20, 0.0 }
 0x9d5   : > { %2547 = vadd.xlane.f32.xlu1 %v2546_v43 }
 0x9d7   : > { %v2533_v15 = vpop.f32.mrf.mxu2 }
 0x9d8   : > { %v2534_v21 = vadd.f32 %v3286_v11, %v2533_v15 }
 0x9da   : > { %v4421_v0 = vadd.f32 %v2534_v21, %v4133_v3 }
 0x9dc   : > { %v2549_v47 = vsel %vm550_vm0, %v4421_v0, 0.0 }
 0x9dd   : > { %2550 = vadd.xlane.f32.xlu2 %v2549_v47 }
 0xa38   : > { %v2542_v2 = vpop.xlane.xlu2 %2541 }
 0xa39   : > { %v2552_v46 = vmul.f32 %v2542_v2, %v3913_v25 }
 0xa3b   : > { %v2556_v44 = vsub.f32 %v4406_v60, %v2552_v46 }
 0xa3d   : > { %v2560_v7 = vmul.f32 %v2556_v44, %v2556_v44 }
 0xa3f   : > { %v2564_v9 = vsel %vm550_vm0, %v2560_v7, 0.0 }
 0xa40   : > { %2565 = vadd.xlane.f32.xlu0 %v2564_v9  ;;  %v2545_v23 = vpop.xlane.xlu0 %2544 }
 0xa41   : > { %v2553_v1 = vmul.f32 %v2545_v23, %v3913_v25 }
 0xa43   : > { %v4430_v24 = vsub.f32 %v4411_v18, %v2553_v1 }
 0xa45   : > { %v2561_v3 = vmul.f32 %v4430_v24, %v4430_v24 }
 0xa47   : > { %v2567_v62 = vsel %vm550_vm0, %v2561_v3, 0.0 }
 0xa48   : > { %2568 = vadd.xlane.f32.xlu1 %v2567_v62  ;;  %v2548_v26 = vpop.xlane.xlu1 %2547 }
 0xa49   : > { %v2554_v5 = vmul.f32 %v2548_v26, %v3913_v25 }
 0xa4b   : > { %v4437_v27 = vsub.f32 %v4416_v20, %v2554_v5 }
 0xa4d   : > { %v2562_v29 = vmul.f32 %v4437_v27, %v4437_v27 }
 0xa4f   : > { %v2570_v30 = vsel %vm550_vm0, %v2562_v29, 0.0 }
 0xa50   : > { %2571 = vadd.xlane.f32.xlu2 %v2570_v30  ;;  %v2551_v32 = vpop.xlane.xlu2 %2550 }
 0xa51   : > { %v2555_v36 = vmul.f32 %v2551_v32, %v3913_v25 }
 0xa53   : > { %v4444_v38 = vsub.f32 %v4421_v0, %v2555_v36 }
 0xa55   : > { %v2563_v34 = vmul.f32 %v4444_v38, %v4444_v38 }
 0xa57   : > { %v2573_v52 = vsel %vm550_vm0, %v2563_v34, 0.0 }
 0xa58   : > { %2574 = vadd.xlane.f32.xlu0 %v2573_v52 }
 0xab3   : > { %v2566_v39 = vpop.xlane.xlu0 %2565 }
 0xab4   : > { %v2576_v61 = vmul.f32 %v2566_v39, %v3913_v25 }
 0xab6   : > { %v2580_v53 = vadd.f32 1e-05, %v2576_v61 }
 0xab8   : > { %3389 = vrsqrt.f32 %v2580_v53  ;;  %vm2590_vm2 = vweird.f32 %v2580_v53 }
 0xabb   : > { %v2569_v63 = vpop.xlane.xlu1 %2568 }
 0xabc   : > { %v2577_v49 = vmul.f32 %v2569_v63, %v3913_v25 }
 0xabe   : > { %v3390_v13 = vpop.eup %3389  ;;  %v2581_v45 = vadd.f32 1e-05, %v2577_v49 }
 0xabf   : > { %v2585_v6 = vmul.f32 %v3390_v13, %v2580_v53  ;;  %vm2591_vm1 = vweird.f32 %v3390_v13 }
 0xac0   : > { %3391 = vrsqrt.f32 %v2581_v45  ;;  %vm2592_vm8 = vmor %vm2590_vm2, %vm2591_vm1  ;;  %vm2600_vm10 = vweird.f32 %v2581_v45 }
 0xac1   : > { %v2586_v54 = vmul.f32 %v3390_v13, %v2585_v6  ;;  %v3256_v6 = vld [vmem:[%s4626_s14 + $0x78] sm:$0xff] }
 0xac2   : > { %2907 = vmatpush.msra.mxu2 %v3256_v6 }
 0xac3   : > { %v2587_v31 = vmul.f32 0.5, %v2586_v54  ;;  %v2572_v50 = vpop.xlane.xlu2 %2571 }
 0xac4   : > { %v2578_v28 = vmul.f32 %v2572_v50, %v3913_v25 }
 0xac5   : > { %v2588_v48 = vsub.f32 1.5, %v2587_v31 }
 0xac6   : > { %v3392_v58 = vpop.eup %3391  ;;  %v2582_v37 = vadd.f32 1e-05, %v2578_v28  ;;  %v3255_v28 = vld [vmem:[%s4626_s14 + $0x70] sm:$0xff] }
 0xac7   : > { %v2589_v40 = vmul.f32 %v3390_v13, %v2588_v48  ;;  %v2595_v35 = vmul.f32 %v3392_v58, %v2581_v45  ;;  %vm2601_vm9 = vweird.f32 %v3392_v58  ;;  %2908 = vmatpush.msra.mxu2 %v3255_v28 }
 0xac8   : > { %3393 = vrsqrt.f32 %v2582_v37  ;;  %vm2602_vm11 = vmor %vm2600_vm10, %vm2601_vm9  ;;  %vm2610_vm13 = vweird.f32 %v2582_v37 }
 0xac9   : > { %v2593_v57 = vsel %vm2592_vm8, %v3390_v13, %v2589_v40  ;;  %v2596_v12 = vmul.f32 %v3392_v58, %v2595_v35  ;;  %v3254_v35 = vld [vmem:[%s4626_s14 + $0x68] sm:$0xff] }
 0xaca   : > { %v2624_v16 = vmul.f32 %v2593_v57, %v2556_v44  ;;  %2909 = vmatpush.msra.mxu2 %v3254_v35 }
 0xacb   : > { %v2597_v11 = vmul.f32 0.5, %v2596_v12  ;;  %v2575_v22 = vpop.xlane.xlu0 %2574 }
 0xacc   : > { %v2633_v41 = vmul.f32 %v3287_v55, %v2624_v16  ;;  %v2579_v51 = vmul.f32 %v2575_v22, %v3913_v25 }
 0xacd   : > { %v2598_v8 = vsub.f32 1.5, %v2597_v11  ;;  %v3253_v11 = vld [vmem:[%s4626_s14 + $0x60] sm:$0xff] }
 0xace   : > { %v3394_v10 = vpop.eup %3393  ;;  %v2642_v59 = vadd.f32 %v3288_v14, %v2633_v41  ;;  %v2583_v19 = vadd.f32 1e-05, %v2579_v51  ;;  %2910 = vmatpush.msra.mxu2 %v3253_v11 }
 0xacf   : > { %v2599_v17 = vmul.f32 %v3392_v58, %v2598_v8  ;;  %v2605_v43 = vmul.f32 %v3394_v10, %v2582_v37  ;;  %vm2611_vm12 = vweird.f32 %v3394_v10 }
 0xad0   : > { %3395 = vrsqrt.f32 %v2583_v19  ;;  %3241 = vmatmul.msk.f32.vlgmr.msra.gmra.mxu1 %vm550_vm0, %v2642_v59  ;;  %vm2612_vm14 = vmor %vm2610_vm13, %vm2611_vm12  ;;  %vm2620_vm3 = vweird.f32 %v2583_v19  ;;  %v3252_v59 = vld [vmem:[%s4626_s14 + $0x58] sm:$0xff] }
 0xad1   : > { %v2603_v15 = vsel %vm2602_vm11, %v3392_v58, %v2599_v17  ;;  %v2606_v21 = vmul.f32 %v3394_v10, %v2605_v43  ;;  %2911 = vmatpush.msra.mxu2 %v3252_v59 }
 0xad2   : > { %v2625_v47 = vmul.f32 %v2603_v15, %v4430_v24 }
 0xad3   : > { %v2607_v2 = vmul.f32 0.5, %v2606_v21  ;;  %v3251_v21 = vld [vmem:[%s4626_s14 + $0x50] sm:$0xff] }
 0xad4   : > { %v2634_v46 = vmul.f32 %v3287_v55, %v2625_v47  ;;  %2912 = vmatpush.msra.mxu2 %v3251_v21 }
 0xad5   : > { %v2608_v44 = vsub.f32 1.5, %v2607_v2 }
 0xad6   : > { %v3396_v25 = vpop.eup %3395  ;;  %v2643_v7 = vadd.f32 %v3288_v14, %v2634_v46 }
 0xad7   : > { %v2609_v9 = vmul.f32 %v3394_v10, %v2608_v44  ;;  %v2615_v23 = vmul.f32 %v3396_v25, %v2583_v19  ;;  %vm2621_vm15 = vweird.f32 %v3396_v25 }
 0xad8   : > { %3242 = vmatmul.msk.f32.gmra.mxu1 %vm550_vm0, %v2643_v7  ;;  %vm2622_vm4 = vmor %vm2620_vm3, %vm2621_vm15 }
 0xad9   : > { %v2613_v1 = vsel %vm2612_vm14, %v3394_v10, %v2609_v9  ;;  %v2616_v3 = vmul.f32 %v3396_v25, %v2615_v23 }
 0xada   : > { %v2626_v62 = vmul.f32 %v2613_v1, %v4437_v27  ;;  %v3289_v27 = vld [vmem:[%s4625_s13 + $0x1] ss:$0 sm:$0xff] }
 0xadb   : > { %v2617_v26 = vmul.f32 0.5, %v2616_v3 }
 0xadc   : > { %v2635_v5 = vmul.f32 %v3287_v55, %v2626_v62 }
 0xadd   : > { %v2618_v29 = vsub.f32 1.5, %v2617_v26  ;;  %v3249_v26 = vld [vmem:[%s4626_s14 + $0x40] sm:$0xff] }
 0xade   : > { %v2644_v24 = vadd.f32 %v3288_v14, %v2635_v5 }
 0xadf   : > { %v2619_v30 = vmul.f32 %v3396_v25, %v2618_v29 }
 0xae0   : > { %3243 = vmatmul.msk.f32.gmra.mxu1 %vm550_vm0, %v2644_v24 }
 0xae1   : > { %v2623_v32 = vsel %vm2622_vm4, %v3396_v25, %v2619_v30  ;;  %v3250_v25 = vld [vmem:[%s4626_s14 + $0x48] sm:$0xff] }
 0xae2   : > { %v2627_v36 = vmul.f32 %v2623_v32, %v4444_v38  ;;  %2913 = vmatpush.msra.mxu2 %v3250_v25 }
 0xae4   : > { %v2636_v34 = vmul.f32 %v3287_v55, %v2627_v36  ;;  %2914 = vmatpush.msra.mxu2 %v3249_v26 }
 0xae6   : > { %v2645_v52 = vadd.f32 %v3288_v14, %v2636_v34 }
 0xae8   : > { %3244 = vmatmul.msk.f32.gmra.mxu1 %vm550_vm0, %v2645_v52 }
 0xb4d   : > { %v2685_v56 = vpop.f32.mrf.mxu1 }
 0xb4e   : > { %v4481_v42 = vadd.f32 %v3289_v27, %v2685_v56 }
 0xb50   : > { %v4484_v4 = vmul.f32 0.70710677, %v4481_v42 }
 0xb52   : > { %v2705_v33 = vmul.f32 %v4484_v4, %v4484_v4 }
 0xb54   : > { %v4488_v39 = vmin.f32 %v2705_v33, 16.0 }
 0xb55   : > { %v2688_v38 = vpop.f32.mrf.mxu1 }
 0xb56   : > { %v2707_v61 = vmul.f32 2.1237322e-06, %v4488_v39  ;;  %v2718_v53 = vmul.f32 3.8918573e-05, %v4488_v39  ;;  %v4492_v63 = vadd.f32 %v3289_v27, %v2688_v38 }
 0xb58   : > { %v2708_v49 = vadd.f32 0.00028619796, %v2707_v61  ;;  %v2719_v13 = vadd.f32 0.001143296, %v2718_v53  ;;  %v4495_v45 = vmul.f32 0.70710677, %v4492_v63 }
 0xb5a   : > { %v2709_v54 = vmul.f32 %v2708_v49, %v4488_v39  ;;  %v2720_v31 = vmul.f32 %v2719_v13, %v4488_v39  ;;  %v2745_v50 = vmul.f32 %v4495_v45, %v4495_v45 }
 0xb5c   : > { %v2710_v48 = vadd.f32 0.0036580483, %v2709_v54  ;;  %v2721_v58 = vadd.f32 0.014752088, %v2720_v31  ;;  %v4507_v37 = vmin.f32 %v2745_v50, 16.0 }
 0xb5d   : > { %v2691_v40 = vpop.f32.mrf.mxu1 }
 0xb5e   : > { %v2722_v55 = vmul.f32 %v2721_v58, %v4488_v39  ;;  %v4513_v57 = vadd.f32 %v3289_v27, %v2691_v40  ;;  %v2711_v12 = vmul.f32 %v2710_v48, %v4488_v39  ;;  %v2747_v14 = vmul.f32 2.1237322e-06, %v4507_v37 }
 0xb5f   : > { %v2758_v16 = vmul.f32 3.8918573e-05, %v4507_v37 }
 0xb60   : > { %v2723_v22 = vadd.f32 0.112945676, %v2722_v55  ;;  %v2748_v41 = vadd.f32 0.00028619796, %v2747_v14  ;;  %v4522_v8 = vmul.f32 0.70710677, %v4513_v57 }
 0xb61   : > { %v2759_v51 = vadd.f32 0.001143296, %v2758_v16  ;;  %v2712_v19 = vadd.f32 0.05243302, %v2711_v12 }
 0xb62   : > { %v2724_v10 = vmul.f32 %v2723_v22, %v4488_v39  ;;  %v2749_v17 = vmul.f32 %v2748_v41, %v4507_v37  ;;  %v2785_v15 = vmul.f32 %v4522_v8, %v4522_v8 }
 0xb63   : > { %v2760_v43 = vmul.f32 %v2759_v51, %v4507_v37  ;;  %v2713_v1 = vmul.f32 %v2712_v19, %v4488_v39 }
 0xb64   : > { %v2725_v47 = vadd.f32 0.4994258, %v2724_v10  ;;  %v4535_v46 = vmin.f32 %v2785_v15, 16.0  ;;  %v2750_v9 = vadd.f32 0.0036580483, %v2749_v17 }
 0xb65   : > { %v2761_v2 = vadd.f32 0.014752088, %v2760_v43  ;;  %v2694_v44 = vpop.f32.mrf.mxu1  ;;  %v2714_v34 = vadd.f32 0.18741608, %v2713_v1 }
 0xb66   : > { %v2726_v7 = vmul.f32 %v2725_v47, %v4488_v39  ;;  %v4541_v23 = vadd.f32 %v3289_v27, %v2694_v44  ;;  %v2787_v62 = vmul.f32 2.1237322e-06, %v4535_v46  ;;  %v2798_v29 = vmul.f32 3.8918573e-05, %v4535_v46 }
 0xb67   : > { %v2762_v3 = vmul.f32 %v2761_v2, %v4507_v37  ;;  %v2751_v36 = vmul.f32 %v2750_v9, %v4507_v37  ;;  %v2715_v13 = vmul.f32 %v2714_v34, %v4488_v39 }
 0xb68   : > { %v2727_v5 = vadd.f32 1.0, %v2726_v7  ;;  %v4551_v24 = vmul.f32 0.70710677, %v4541_v23  ;;  %v2788_v32 = vadd.f32 0.00028619796, %v2787_v62 }
 0xb69   : > { %v2763_v30 = vadd.f32 0.112945676, %v2762_v3  ;;  %v2799_v56 = vadd.f32 0.001143296, %v2798_v29  ;;  %v2752_v61 = vadd.f32 0.05243302, %v2751_v36 }
 0xb6a   : > { %3397 = vrcp.f32 %v2727_v5  ;;  %v2789_v27 = vmul.f32 %v2788_v32, %v4535_v46  ;;  %v2825_v33 = vmul.f32 %v4551_v24, %v4551_v24  ;;  %v2716_v16 = vadd.f32 1.1283791, %v2715_v13 }
 0xb6b   : > { %v2764_v52 = vmul.f32 %v2763_v30, %v4507_v37  ;;  %v2800_v53 = vmul.f32 %v2799_v56, %v4535_v46  ;;  %v2753_v35 = vmul.f32 %v2752_v61, %v4507_v37  ;;  %v2737_v39 = vand.u32 2147483647, %v2727_v5 }
 0xb6c   : > { %v4559_v49 = vmin.f32 %v2825_v33, 16.0  ;;  %v2790_v54 = vadd.f32 0.0036580483, %v2789_v27  ;;  %v2739_v22 = vand.u32 2147483648, %v2727_v5  ;;  %vm2733_vm6 = vweird.f32 %v2727_v5 }
 0xb6d   : > { %v2765_v38 = vadd.f32 0.4994258, %v2764_v52  ;;  %v2801_v50 = vadd.f32 0.014752088, %v2800_v53  ;;  %v2754_v17 = vadd.f32 0.18741608, %v2753_v35  ;;  %v2717_v47 = vmul.f32 %v2716_v16, %v4484_v4 }
 0xb6e   : > { %v2827_v28 = vmul.f32 2.1237322e-06, %v4559_v49  ;;  %v2838_v48 = vmul.f32 3.8918573e-05, %v4559_v49  ;;  %v2791_v41 = vmul.f32 %v2790_v54, %v4535_v46  ;;  %v2740_v2 = vor.u32 1.1754944e-38, %v2739_v22 }
 0xb6f   : > { %v2766_v6 = vmul.f32 %v2765_v38, %v4507_v37  ;;  %v2802_v55 = vmul.f32 %v2801_v50, %v4535_v46  ;;  %vm2738_vm2 = vcmp.eq.f32.partialorder %v2737_v39, 8.507059e+37  ;;  %v2755_v26 = vmul.f32 %v2754_v17, %v4507_v37 }
 0xb70   : > { %v3398_v31 = vpop.eup %3397  ;;  %v2828_v12 = vadd.f32 0.00028619796, %v2827_v28  ;;  %v2839_v14 = vadd.f32 0.001143296, %v2838_v48  ;;  %v2792_v44 = vadd.f32 0.05243302, %v2791_v41 }
 0xb71   : > { %v2729_v58 = vmul.f32 %v3398_v31, %v2727_v5  ;;  %v2767_v40 = vadd.f32 1.0, %v2766_v6  ;;  %v2803_v51 = vadd.f32 0.112945676, %v2802_v55  ;;  %vm2734_vm5 = vweird.f32 %v3398_v31 }
 0xb72   : > { %v2829_v59 = vmul.f32 %v2828_v12, %v4559_v49  ;;  %v2840_v19 = vmul.f32 %v2839_v14, %v4559_v49  ;;  %vm2735_vm1 = vmor %vm2733_vm6, %vm2734_vm5  ;;  %v2793_v34 = vmul.f32 %v2792_v44, %v4535_v46  ;;  %v2756_v38 = vadd.f32 1.1283791, %v2755_v26 }
 0xb73   : > { %v2730_v11 = vsub.f32 1.0, %v2729_v58  ;;  %3399 = vrcp.f32 %v2767_v40  ;;  %v2804_v43 = vmul.f32 %v2803_v51, %v4535_v46  ;;  %v2779_v4 = vand.u32 2147483648, %v2767_v40 }
 0xb74   : > { %v2841_v21 = vadd.f32 0.014752088, %v2840_v19  ;;  %v2830_v1 = vadd.f32 0.0036580483, %v2829_v59  ;;  %v2777_v53 = vand.u32 2147483647, %v2767_v40  ;;  %vm2773_vm9 = vweird.f32 %v2767_v40 }
 0xb75   : > { %v2731_v10 = vmul.f32 %v3398_v31, %v2730_v11  ;;  %v2805_v25 = vadd.f32 0.4994258, %v2804_v43  ;;  %v2697_v37 = vmul.f32 0.5, %v4481_v42  ;;  %v2780_v50 = vor.u32 1.1754944e-38, %v2779_v4 }
 0xb76   : > { %v2842_v3 = vmul.f32 %v2841_v21, %v4559_v49  ;;  %v2831_v56 = vmul.f32 %v2830_v1, %v4559_v49  ;;  %v2794_v28 = vadd.f32 0.18741608, %v2793_v34  ;;  %v2757_v58 = vmul.f32 %v2756_v38, %v4495_v45 }
 0xb77   : > { %v2732_v15 = vadd.f32 %v3398_v31, %v2731_v10  ;;  %v2806_v5 = vmul.f32 %v2805_v25, %v4535_v46  ;;  %vm2778_vm11 = vcmp.eq.f32.partialorder %v2777_v53, 8.507059e+37  ;;  %v2698_v41 = vmul.f32 0.5, %v4492_v63 }
 0xb78   : > { %v2843_v32 = vadd.f32 0.112945676, %v2842_v3  ;;  %v2832_v48 = vadd.f32 0.05243302, %v2831_v56 }
 0xb79   : > { %v3400_v7 = vpop.eup %3399  ;;  %v2736_v9 = vsel %vm2735_vm1, %v3398_v31, %v2732_v15  ;;  %v2807_v27 = vadd.f32 1.0, %v2806_v5  ;;  %v2699_v5 = vmul.f32 0.5, %v4513_v57 }
 0xb7a   : > { %v2741_v62 = vsel %vm2738_vm2, %v2740_v2, %v2736_v9  ;;  %v2769_v29 = vmul.f32 %v3400_v7, %v2767_v40  ;;  %v2844_v33 = vmul.f32 %v2843_v32, %v4559_v49  ;;  %vm2774_vm8 = vweird.f32 %v3400_v7 }
 0xb7b   : > { %v2742_v30 = vmul.f32 %v2741_v62, %v2717_v47  ;;  %3401 = vrcp.f32 %v2807_v27  ;;  %vm2775_vm10 = vmor %vm2773_vm9, %vm2774_vm8  ;;  %v2795_v40 = vmul.f32 %v2794_v28, %v4535_v46  ;;  %v2833_v11 = vmul.f32 %v2832_v48, %v4559_v49 }
 0xb7c   : > { %v2770_v36 = vsub.f32 1.0, %v2769_v29  ;;  %v2845_v54 = vadd.f32 0.4994258, %v2844_v33  ;;  %v2819_v59 = vand.u32 2147483648, %v2807_v27  ;;  %v2817_v15 = vand.u32 2147483647, %v2807_v27 }
 0xb7d   : > { %v3245_v52 = vclamps-f32 %v2742_v30, 1.0  ;;  %v2796_v10 = vadd.f32 1.1283791, %v2795_v40  ;;  %v2834_v19 = vadd.f32 0.18741608, %v2833_v11  ;;  %vm2813_vm13 = vweird.f32 %v2807_v27 }
 0xb7e   : > { %v2771_v61 = vmul.f32 %v3400_v7, %v2770_v36  ;;  %v2846_v55 = vmul.f32 %v2845_v54, %v4559_v49  ;;  %v2820_v47 = vor.u32 1.1754944e-38, %v2819_v59  ;;  %vm2818_vm15 = vcmp.eq.f32.partialorder %v2817_v15, 8.507059e+37 }
 0xb7f   : > { %v2865_v13 = vadd.f32 1.0, %v3245_v52  ;;  %v2835_v2 = vmul.f32 %v2834_v19, %v4559_v49  ;;  %v2797_v63 = vmul.f32 %v2796_v10, %v4522_v8  ;;  %v2700_v33 = vmul.f32 0.5, %v4541_v23 }
 0xb80   : > { %v2772_v6 = vadd.f32 %v3400_v7, %v2771_v61  ;;  %v2847_v14 = vadd.f32 1.0, %v2846_v55  ;;  %v3290_v61 = vld [vmem:[%s4627_s15 + $0x1] ss:$0 sm:$0xff] }
 0xb81   : > { %v2869_v31 = vmul.f32 %v2865_v13, %v2697_v37  ;;  %v3402_v16 = vpop.eup %3401  ;;  %v2836_v3 = vadd.f32 1.1283791, %v2835_v2 }
 0xb82   : > { %v2776_v35 = vsel %vm2775_vm10, %v3400_v7, %v2772_v6  ;;  %v2809_v22 = vmul.f32 %v3402_v16, %v2807_v27  ;;  %3403 = vrcp.f32 %v2847_v14  ;;  %vm2814_vm12 = vweird.f32 %v3402_v16 }
 0xb83   : > { %v2781_v12 = vsel %vm2778_vm11, %v2780_v50, %v2776_v35  ;;  %3258 = vmatmul.msk.f32.vlgmr.msra.gmra.mxu2 %vm1720_vm7, %v2869_v31  ;;  %vm2815_vm14 = vmor %vm2813_vm13, %vm2814_vm12  ;;  %v2859_v62 = vand.u32 2147483648, %v2847_v14  ;;  %v2857_v30 = vand.u32 2147483647, %v2847_v14  ;;  %vm2853_vm4 = vweird.f32 %v2847_v14 }
 0xb84   : > { %v2782_v42 = vmul.f32 %v2781_v12, %v2757_v58  ;;  %v2810_v51 = vsub.f32 1.0, %v2809_v22  ;;  %v2837_v4 = vmul.f32 %v2836_v3, %v4551_v24 }
 0xb85   : > { %v2860_v49 = vor.u32 1.1754944e-38, %v2859_v62  ;;  %vm2858_vm6 = vcmp.eq.f32.partialorder %v2857_v30, 8.507059e+37 }
 0xb86   : > { %v3246_v39 = vclamps-f32 %v2782_v42, 1.0  ;;  %v2811_v43 = vmul.f32 %v3402_v16, %v2810_v51 }
 0xb88   : > { %v2866_v45 = vadd.f32 1.0, %v3246_v39  ;;  %v2812_v21 = vadd.f32 %v3402_v16, %v2811_v43  ;;  %v3404_v46 = vpop.eup %3403 }
 0xb89   : > { %v2849_v25 = vmul.f32 %v3404_v46, %v2847_v14  ;;  %vm2854_vm3 = vweird.f32 %v3404_v46 }
 0xb8a   : > { %v2870_v17 = vmul.f32 %v2866_v45, %v2698_v41  ;;  %v2816_v44 = vsel %vm2815_vm14, %v3402_v16, %v2812_v21  ;;  %vm2855_vm5 = vmor %vm2853_vm4, %vm2854_vm3 }
 0xb8b   : > { %v2821_v7 = vsel %vm2818_vm15, %v2820_v47, %v2816_v44  ;;  %v2850_v1 = vsub.f32 1.0, %v2849_v25 }
 0xb8c   : > { %3259 = vmatmul.msk.f32.gmra.mxu2 %vm1720_vm7, %v2870_v17  ;;  %v2822_v9 = vmul.f32 %v2821_v7, %v2797_v63 }
 0xb8d   : > { %v2851_v29 = vmul.f32 %v3404_v46, %v2850_v1 }
 0xb8e   : > { %v3247_v26 = vclamps-f32 %v2822_v9, 1.0 }
 0xb8f   : > { %v2852_v36 = vadd.f32 %v3404_v46, %v2851_v29 }
 0xb90   : > { %v2867_v32 = vadd.f32 1.0, %v3247_v26 }
 0xb91   : > { %v2856_v34 = vsel %vm2855_vm5, %v3404_v46, %v2852_v36 }
 0xb92   : > { %v2871_v8 = vmul.f32 %v2867_v32, %v2699_v5  ;;  %v2861_v52 = vsel %vm2858_vm6, %v2860_v49, %v2856_v34 }
 0xb93   : > { %v2862_v27 = vmul.f32 %v2861_v52, %v2837_v4 }
 0xb94   : > { %3260 = vmatmul.msk.f32.gmra.mxu2 %vm1720_vm7, %v2871_v8 }
 0xb95   : > { %v3248_v56 = vclamps-f32 %v2862_v27, 1.0 }
 0xb97   : > { %v2868_v38 = vadd.f32 1.0, %v3248_v56 }
 0xb99   : > { %v2872_v57 = vmul.f32 %v2868_v38, %v2700_v33 }
 0xb9c   : > { %3261 = vmatmul.msk.f32.gmra.mxu2 %vm1720_vm7, %v2872_v57 }
 0xc06   : > { %v2916_v53 = vpop.f32.mrf.mxu2 }
 0xc07   : > { %v2917_v37 = vadd.f32 %v3290_v61, %v2916_v53 }
 0xc09   : > { %v2928_v24 = vadd.f32 %v2917_v37, %v4406_v60 }
 0xc0b   : > { %2932 = vst.msk [vmem:[%s523_s20] sm:$0xff] %vm550_vm0, %v2928_v24 }
 0xc0f   : > { %v2919_v23 = vpop.f32.mrf.mxu2 }
 0xc10   : > { %v2920_v13 = vadd.f32 %v3290_v61, %v2919_v23 }
 0xc12   : > { %v2929_v6 = vadd.f32 %v2920_v13, %v4411_v18 }
 0xc14   : > { %2933 = vst.msk [vmem:[%s523_s20 + $0x8] sm:$0xff] %vm550_vm0, %v2929_v6 }
 0xc17   : > { %v2922_v54 = vpop.f32.mrf.mxu2 }
 0xc18   : > { %v2923_v31 = vadd.f32 %v3290_v61, %v2922_v54 }
 0xc1a   : > { %v2930_v50 = vadd.f32 %v2923_v31, %v4416_v20 }
 0xc1c   : > { %2934 = vst.msk [vmem:[%s523_s20 + $0x10] sm:$0xff] %vm550_vm0, %v2930_v50 }
 0xc1f   : > { %v2925_v28 = vpop.f32.mrf.mxu2 }
 0xc20   : > { %v2926_v48 = vadd.f32 %v3290_v61, %v2925_v28 }
 0xc22   : > { %v2931_v58 = vadd.f32 %v2926_v48, %v4421_v0 }
 0xc24   : > { %2935 = vst.msk [vmem:[%s523_s20 + $0x18] sm:$0xff] %vm550_vm0, %v2931_v58 }
 0xc25 PF: > { %s26_s21 = sadd.s32 1, %s3432_s21  }
 0xc26   : > { %p23_p4 = scmp.ge.s32.totalorder %s26_s21, 4  }
 0xc28   :  { %25 = sbr.rel (!%p23_p4) target bundleno = 2 (0x2), region = 126 }

</bundles_post_ra>
